<compile_context>
chip_gen: v7x
topology: tpu7x:2x2x1
jax: 0.10.0
libtpu: 0.0.40
codegen_flags: <defaults>
</compile_context>

<pallas_src>
import functools

import jax
import jax.numpy as jnp
from jax import lax
from jax.experimental import pallas as pl
from jax.experimental.pallas import tpu as pltpu

# ---- small synthetic config (real checkpoint: 384 / 2048 / 12 layers / k=31 / 12001) ----
IN_DIM     = 50      # matches nn.Linear(50, conformer_size)
CONF_DIM   = 64      # conformer_size  (real: 384)
NUM_HEADS  = 4
HEAD_DIM   = CONF_DIM // NUM_HEADS
FFN_DIM    = 128     # real: 2048
NUM_LAYERS = 2       # real: 12
DW_KERNEL  = 7       # depthwise conv kernel (real: 31, odd)
TARGET_DIM = 128     # real: 12001
LN_EPS     = 1e-5
BN_EPS     = 1e-5
NEG_INF    = -1e30   # finite "minus infinity" (avoids inf-inf NaNs in online softmax)


def _default_vmem_limit():
    """~70% of physical VMEM, capped: ~45 MiB on v7x, ~90 MiB on v5e/v6e."""
    try:
        cap = int(pltpu.get_tpu_info().vmem_capacity_bytes)
        return max(32 * 1024 * 1024, min(100 * 1024 * 1024, int(cap * 0.7)))
    except Exception:
        return 48 * 1024 * 1024


VMEM_LIMIT = _default_vmem_limit()


# ----------------------------- tiny hardware probes -----------------------------

_ROLL_SIGN = None     # +1: pltpu.roll == jnp.roll, -1: reversed, 0: unavailable
_SINGLE_BUF = None    # whether pl.Buffered(buffer_count=1) lowers


def _roll_probe_kernel(x_ref, o_ref):
    o_ref[...] = pltpu.roll(x_ref[...], 1, axis=0)


def _roll_sign():
    global _ROLL_SIGN
    if _ROLL_SIGN is None:
        try:
            x = lax.broadcasted_iota(jnp.float32, (8, 128), 0)
            y = pl.pallas_call(
                _roll_probe_kernel,
                out_shape=jax.ShapeDtypeStruct((8, 128), jnp.float32))(x)
            v = float(jax.device_get(y)[0, 0])
            _ROLL_SIGN = 1 if v == 7.0 else (-1 if v == 1.0 else 0)
        except Exception:
            _ROLL_SIGN = 0
    return _ROLL_SIGN


def _supports_single_buffer():
    global _SINGLE_BUF
    if _SINGLE_BUF is None:
        try:
            def k(x_ref, w_ref, o_ref):
                o_ref[...] = x_ref[...] + w_ref[...]

            y = pl.pallas_call(
                k, grid=(2,),
                out_shape=jax.ShapeDtypeStruct((16, 128), jnp.float32),
                in_specs=[pl.BlockSpec((8, 128), lambda i: (i, 0)),
                          pl.BlockSpec((8, 128), lambda i: (0, 0),
                                       pipeline_mode=pl.Buffered(buffer_count=1))],
                out_specs=pl.BlockSpec((8, 128), lambda i: (i, 0)),
            )(jnp.ones((16, 128), jnp.float32), jnp.ones((8, 128), jnp.float32))
            jax.block_until_ready(y)
            _SINGLE_BUF = True
        except Exception:
            _SINGLE_BUF = False
    return _SINGLE_BUF


def _const_spec(a):
    """Full-array BlockSpec with constant index map; single-buffered if possible."""
    index_map = lambda *args, n=a.ndim: (0,) * n
    if _supports_single_buffer():
        return pl.BlockSpec(a.shape, index_map,
                            pipeline_mode=pl.Buffered(buffer_count=1))
    return pl.BlockSpec(a.shape, index_map)


def _shift_rows(x, s):
    """out[t] = x[t - s] if 0 <= t - s < T else 0  (zero-padded row shift, XLU roll)."""
    if s == 0:
        return x
    t = x.shape[0]
    sign = _roll_sign()
    if sign != 0:
        amt = (sign * s) % t
        rolled = pltpu.roll(x, amt, axis=0) if amt else x
        row = lax.broadcasted_iota(jnp.int32, (t, 1), 0)
        return jnp.where((row >= s) & (row < t + s), rolled, 0.0)
    # Fallback: explicit zero-pad + static slice (correct, layout-heavier).
    zeros = jnp.zeros((abs(s),) + x.shape[1:], x.dtype)
    if s > 0:
        return jnp.concatenate([zeros, x[:t - s]], axis=0)
    return jnp.concatenate([x[-s:], zeros], axis=0)


# ----------------------------- Pallas kernels -----------------------------

def _linear_kernel(x_ref, w_ref, b_ref, o_ref):
    # bf16 operands, f32 MXU accumulation, cast to output dtype on store.
    o_ref[...] = (jnp.dot(x_ref[...].astype(jnp.bfloat16), w_ref[...],
                          preferred_element_type=jnp.float32)
                  + b_ref[...]).astype(o_ref.dtype)


def _downsample_kernel(xe_ref, xo_ref, w_ref, b_ref, o_ref):
    """Conv1d(C, C, k=5, stride=2, pad=2) decomposed over input parity.

    out[t] = xe[t-1]·W0 + xo[t-1]·W1 + xe[t]·W2 + xo[t]·W3 + xe[t+1]·W4 + b
    """
    xe = xe_ref[0]
    xo = xo_ref[0]
    y0 = jnp.dot(xe, w_ref[0], preferred_element_type=jnp.float32)
    y1 = jnp.dot(xo, w_ref[1], preferred_element_type=jnp.float32)
    y2 = jnp.dot(xe, w_ref[2], preferred_element_type=jnp.float32)
    y3 = jnp.dot(xo, w_ref[3], preferred_element_type=jnp.float32)
    y4 = jnp.dot(xe, w_ref[4], preferred_element_type=jnp.float32)
    out = (_shift_rows(y0, 1) + _shift_rows(y1, 1) + y2 + y3
           + _shift_rows(y4, -1) + b_ref[...])
    o_ref[0] = out.astype(o_ref.dtype)


def _upsample_kernel(x_ref, w_ref, b_ref, oe_ref, oo_ref):
    """ConvTranspose1d(C, C, k=5, stride=2, pad=1) decomposed over output parity.

    out[2m]   = x[m]·N1 + x[m-1]·N3 + b
    out[2m+1] = x[m+1]·N0 + x[m]·N2 + x[m-1]·N4 + b
    """
    xb = x_ref[0]
    z0 = jnp.dot(xb, w_ref[0], preferred_element_type=jnp.float32)
    z1 = jnp.dot(xb, w_ref[1], preferred_element_type=jnp.float32)
    z2 = jnp.dot(xb, w_ref[2], preferred_element_type=jnp.float32)
    z3 = jnp.dot(xb, w_ref[3], preferred_element_type=jnp.float32)
    z4 = jnp.dot(xb, w_ref[4], preferred_element_type=jnp.float32)
    b = b_ref[...]
    oe_ref[0] = (z1 + _shift_rows(z3, 1) + b).astype(oe_ref.dtype)
    oo_ref[0] = (_shift_rows(z0, -1) + z2 + _shift_rows(z4, 1) + b).astype(oo_ref.dtype)


def _conformer_block_kernel(x_ref, len_ref, *args, kv_tile):
    """One full Conformer block (conv-first) for one batch element.

    x_ref:   (1, T, C) bf16 residual stream
    len_ref: (1, 1, 1) int32 valid (downsampled) sequence length
    then 36 parameter refs, the bf16 output ref, and 5 VMEM scratch refs.
    """
    (ff1_g, ff1_b, ff1_w1, ff1_b1, ff1_w2, ff1_b2,
     cv_g, cv_b, cv_w1a, cv_b1a, cv_w1g, cv_b1g, cv_dww, cv_dwb, cv_bns, cv_bnh,
     cv_w2, cv_b2,
     mh_g, mh_b, mh_wq, mh_bq, mh_wk, mh_bk, mh_wv, mh_bv, mh_wo, mh_bo,
     ff2_g, ff2_b, ff2_w1, ff2_b1, ff2_w2, ff2_b2,
     fin_g, fin_b,
     o_ref, k_scr, v_scr, m_scr, l_scr, acc_scr) = args

    T = o_ref.shape[1]
    C = o_ref.shape[2]
    K = cv_dww.shape[0]
    PAD = (K - 1) // 2
    H = mh_wq.shape[0]
    t_pad = k_scr.shape[0]
    n_kv = t_pad // kv_tile

    def ln(v, g_ref, b_ref):
        mu = jnp.mean(v, axis=-1, keepdims=True)
        vc = v - mu
        var = jnp.mean(vc * vc, axis=-1, keepdims=True)
        return vc * lax.rsqrt(var + LN_EPS) * g_ref[...] + b_ref[...]

    def ffn(v, g_ref, b_ref, w1_ref, b1_ref, w2_ref, b2_ref):
        # LayerNorm -> Linear -> SiLU -> Linear -> 0.5*out + residual
        vn = ln(v, g_ref, b_ref).astype(jnp.bfloat16)
        h = jnp.dot(vn, w1_ref[...], preferred_element_type=jnp.float32) + b1_ref[...]
        h = (h * jax.nn.sigmoid(h)).astype(jnp.bfloat16)   # SiLU; bf16 hidden
        y = jnp.dot(h, w2_ref[...], preferred_element_type=jnp.float32) + b2_ref[...]
        return 0.5 * y + v

    x = x_ref[0].astype(jnp.float32)                        # (T, C) residual stream

    # ---------------- FF module 1 ----------------
    x = ffn(x, ff1_g, ff1_b, ff1_w1, ff1_b1, ff1_w2, ff1_b2)

    # ---------------- Convolution module (conv-first) ----------------
    xn = ln(x, cv_g, cv_b).astype(jnp.bfloat16)
    pa = jnp.dot(xn, cv_w1a[...], preferred_element_type=jnp.float32) + cv_b1a[...]
    pg = jnp.dot(xn, cv_w1g[...], preferred_element_type=jnp.float32) + cv_b1g[...]
    glu = pa * jax.nn.sigmoid(pg)                           # GLU(dim=-1) -> (T, C)

    # depthwise conv: K static taps via XLU row-rolls + edge masks (no misaligned slices)
    dww = cv_dww[...]                                       # (K, C) f32
    acc = glu * dww[PAD:PAD + 1, :]
    for k in range(K):
        if k == PAD:
            continue
        acc = acc + _shift_rows(glu, PAD - k) * dww[k:k + 1, :]
    acc = acc + cv_dwb[...]
    acc = acc * cv_bns[...] + cv_bnh[...]                   # folded BatchNorm1d (eval)
    acc = acc * jax.nn.sigmoid(acc)                         # SiLU
    y = jnp.dot(acc.astype(jnp.bfloat16), cv_w2[...],
                preferred_element_type=jnp.float32) + cv_b2[...]
    x = y + x

    # ---------------- MHSA module (flash-style, per head) ----------------
    xn = ln(x, mh_g, mh_b).astype(jnp.bfloat16)
    len_val = len_ref[0]                                    # (1, 1) valid key length
    y_attn = jnp.zeros((T, C), jnp.float32)

    for h in range(H):                                      # static head loop
        # per-head projections (scale 1/sqrt(D) folded into wq/bq at prep time)
        q = (jnp.dot(xn, mh_wq[h], preferred_element_type=jnp.float32)
             + mh_bq[h]).astype(jnp.bfloat16)
        kh = jnp.dot(xn, mh_wk[h], preferred_element_type=jnp.float32) + mh_bk[h]
        vh = jnp.dot(xn, mh_wv[h], preferred_element_type=jnp.float32) + mh_bv[h]
        if t_pad != T:
            k_scr[...] = jnp.zeros_like(k_scr)
            v_scr[...] = jnp.zeros_like(v_scr)
            k_scr[0:T, :] = kh.astype(jnp.bfloat16)
            v_scr[0:T, :] = vh.astype(jnp.bfloat16)
        else:
            k_scr[...] = kh.astype(jnp.bfloat16)
            v_scr[...] = vh.astype(jnp.bfloat16)

        m_scr[...] = jnp.full_like(m_scr, NEG_INF)
        l_scr[...] = jnp.zeros_like(l_scr)
        acc_scr[...] = jnp.zeros_like(acc_scr)

        @pl.loop(0, n_kv)
        def _(step):
            start = pl.multiple_of(step * kv_tile, kv_tile)
            kc = k_scr[pl.ds(start, kv_tile), :]
            vc = v_scr[pl.ds(start, kv_tile), :]
            s = lax.dot_general(q, kc, (((1,), (1,)), ((), ())),
                                preferred_element_type=jnp.float32)   # (T, kv_tile)
            col = start + lax.broadcasted_iota(jnp.int32, (1, kv_tile), 1)
            s = s + jnp.where(col < len_val, 0.0, NEG_INF)            # key padding mask
            m_prev = m_scr[...]
            m_new = jnp.maximum(m_prev, jnp.max(s, axis=-1, keepdims=True))
            alpha = jnp.exp(m_prev - m_new)
            p = jnp.exp(s - m_new)
            l_scr[...] = alpha * l_scr[...] + jnp.sum(p, axis=-1, keepdims=True)
            acc_scr[...] = alpha * acc_scr[...] + jnp.dot(
                p.astype(jnp.bfloat16), vc, preferred_element_type=jnp.float32)
            m_scr[...] = m_new

        ctx = (acc_scr[...] / l_scr[...]).astype(jnp.bfloat16)        # (T, D)
        # fold head context straight into the output projection (no concat)
        y_attn = y_attn + jnp.dot(ctx, mh_wo[h], preferred_element_type=jnp.float32)

    x = y_attn + mh_bo[...] + x

    # ---------------- FF module 2 + final layer norm ----------------
    x = ffn(x, ff2_g, ff2_b, ff2_w1, ff2_b1, ff2_w2, ff2_b2)
    o_ref[0] = ln(x, fin_g, fin_b).astype(o_ref.dtype)


def _classifier_ce_kernel(x_ref, wt_ref, bcol_ref, ce_ref, lse_ref, m_scr, l_scr,
                          *, v_total):
    """Pass 1: CE-order logits tile (V_tile, T_tile) + online logsumexp over V."""
    j = pl.program_id(2)
    nv = pl.num_programs(2)

    @pl.when(j == 0)
    def _():
        m_scr[...] = jnp.full_like(m_scr, NEG_INF)
        l_scr[...] = jnp.zeros_like(l_scr)

    # transposed logits tile computed directly on the MXU: (TV, C) x (TT, C)^T
    t = lax.dot_general(wt_ref[...], x_ref[0].astype(jnp.bfloat16),
                        (((1,), (1,)), ((), ())),
                        preferred_element_type=jnp.float32) + bcol_ref[...]
    ce_ref[0] = t

    tv = t.shape[0]
    vrow = j * tv + lax.broadcasted_iota(jnp.int32, (tv, 1), 0)
    tm = jnp.where(vrow < v_total, t, NEG_INF)          # mask vocab-overhang rows
    m_prev = m_scr[...]
    m_new = jnp.maximum(m_prev, jnp.max(tm, axis=0, keepdims=True))
    l_scr[...] = (l_scr[...] * jnp.exp(m_prev - m_new)
                  + jnp.sum(jnp.exp(tm - m_new), axis=0, keepdims=True))
    m_scr[...] = m_new

    @pl.when(j == nv - 1)
    def _():
        lse_ref[0] = m_scr[...] + jnp.log(l_scr[...])


def _classifier_lp_kernel(x_ref, w_ref, brow_ref, lse_ref, lp_ref):
    """Pass 2: recompute the row-major logits tile and subtract the logsumexp."""
    logits = (jnp.dot(x_ref[0].astype(jnp.bfloat16), w_ref[...],
                      preferred_element_type=jnp.float32) + brow_ref[...])
    lp_ref[0] = logits - lse_ref[0]


# ----------------------------- Pallas wrappers -----------------------------

def pallas_linear(x, w, b_row, out_dtype=jnp.float32):
    """x:(M,K), w:(K,N) bf16, b:(1,N) f32 -> (M,N); M-tiled cdiv grid."""
    M, K = x.shape
    N = w.shape[1]
    TM = M if M <= 256 else 256
    return pl.pallas_call(
        _linear_kernel,
        grid=(pl.cdiv(M, TM),),
        out_shape=jax.ShapeDtypeStruct((M, N), out_dtype),
        in_specs=[pl.BlockSpec((TM, K), lambda i: (i, 0)),
                  _const_spec(w), _const_spec(b_row)],
        out_specs=pl.BlockSpec((TM, N), lambda i: (i, 0)),
        compiler_params=pltpu.CompilerParams(
            dimension_semantics=("parallel",),
            vmem_limit_bytes=VMEM_LIMIT),
    )(x, w, b_row)


def pallas_downsample(xe, xo, w, b):
    B, Td, C = xe.shape
    return pl.pallas_call(
        _downsample_kernel,
        grid=(B,),
        out_shape=jax.ShapeDtypeStruct((B, Td, C), jnp.bfloat16),
        in_specs=[pl.BlockSpec((1, Td, C), lambda i: (i, 0, 0)),
                  pl.BlockSpec((1, Td, C), lambda i: (i, 0, 0)),
                  _const_spec(w), _const_spec(b)],
        out_specs=pl.BlockSpec((1, Td, C), lambda i: (i, 0, 0)),
        compiler_params=pltpu.CompilerParams(
            dimension_semantics=("parallel",),
            vmem_limit_bytes=VMEM_LIMIT),
    )(xe, xo, w, b)


def pallas_upsample(x, w, b):
    B, Td, C = x.shape
    out_spec = pl.BlockSpec((1, Td, C), lambda i: (i, 0, 0))
    return pl.pallas_call(
        _upsample_kernel,
        grid=(B,),
        out_shape=(jax.ShapeDtypeStruct((B, Td, C), jnp.bfloat16),
                   jax.ShapeDtypeStruct((B, Td, C), jnp.bfloat16)),
        in_specs=[pl.BlockSpec((1, Td, C), lambda i: (i, 0, 0)),
                  _const_spec(w), _const_spec(b)],
        out_specs=(out_spec, out_spec),
        compiler_params=pltpu.CompilerParams(
            dimension_semantics=("parallel",),
            vmem_limit_bytes=VMEM_LIMIT),
    )(x, w, b)


def pallas_conformer_block(x, len_down, plist):
    """x: (B, T, C) bf16; len_down: (B,1,1) int32; plist: 36 prepared params."""
    B, T, C = x.shape
    D = C // NUM_HEADS
    kv_tile = T if T <= 256 else 256
    n_kv = pl.cdiv(T, kv_tile)
    t_pad = n_kv * kv_tile

    in_specs = [pl.BlockSpec((1, T, C), lambda b: (b, 0, 0)),
                pl.BlockSpec((1, 1, 1), lambda b: (b, 0, 0))]
    in_specs += [_const_spec(a) for a in plist]

    return pl.pallas_call(
        functools.partial(_conformer_block_kernel, kv_tile=kv_tile),
        grid=(B,),
        out_shape=jax.ShapeDtypeStruct((B, T, C), jnp.bfloat16),
        in_specs=in_specs,
        out_specs=pl.BlockSpec((1, T, C), lambda b: (b, 0, 0)),
        scratch_shapes=[pltpu.VMEM((t_pad, D), jnp.bfloat16),   # K
                        pltpu.VMEM((t_pad, D), jnp.bfloat16),   # V
                        pltpu.VMEM((T, 1), jnp.float32),        # running max
                        pltpu.VMEM((T, 1), jnp.float32),        # running sum
                        pltpu.VMEM((T, D), jnp.float32)],       # ctx accumulator
        compiler_params=pltpu.CompilerParams(
            dimension_semantics=("parallel",),
            vmem_limit_bytes=VMEM_LIMIT),
    )(x, len_down, *plist)


def pallas_classifier(x, w, w_t, b_row, b_col):
    """Fused final linear + log-softmax, vocab-tiled.

    Returns (log_probs (B,T,V) f32, logits_ce_order (B,V,T) f32)."""
    B, T, C = x.shape
    V = w.shape[1]
    TT = T if T <= 128 else 128
    TV = V if V <= 512 else 256
    nt = pl.cdiv(T, TT)
    nv = pl.cdiv(V, TV)

    ce, lse = pl.pallas_call(
        functools.partial(_classifier_ce_kernel, v_total=V),
        grid=(B, nt, nv),
        out_shape=(jax.ShapeDtypeStruct((B, V, T), jnp.float32),
                   jax.ShapeDtypeStruct((B, 1, T), jnp.float32)),
        in_specs=[pl.BlockSpec((1, TT, C), lambda b, i, j: (b, i, 0)),
                  pl.BlockSpec((TV, C), lambda b, i, j: (j, 0)),
                  pl.BlockSpec((TV, 1), lambda b, i, j: (j, 0))],
        out_specs=(pl.BlockSpec((1, TV, TT), lambda b, i, j: (b, j, i)),
                   pl.BlockSpec((1, 1, TT), lambda b, i, j: (b, 0, i))),
        scratch_shapes=[pltpu.VMEM((1, TT), jnp.float32),
                        pltpu.VMEM((1, TT), jnp.float32)],
        compiler_params=pltpu.CompilerParams(
            dimension_semantics=("parallel", "parallel", "arbitrary"),
            vmem_limit_bytes=VMEM_LIMIT),
    )(x, w_t, b_col)

    lse_col = lse.reshape(B, T, 1)          # tiny (B,1,T)->(B,T,1) relayout

    logp = pl.pallas_call(
        _classifier_lp_kernel,
        grid=(B, nt, nv),
        out_shape=jax.ShapeDtypeStruct((B, T, V), jnp.float32),
        in_specs=[pl.BlockSpec((1, TT, C), lambda b, i, j: (b, i, 0)),
                  pl.BlockSpec((C, TV), lambda b, i, j: (0, j)),
                  pl.BlockSpec((1, TV), lambda b, i, j: (0, j)),
                  pl.BlockSpec((1, TT, 1), lambda b, i, j: (b, i, 0))],
        out_specs=pl.BlockSpec((1, TT, TV), lambda b, i, j: (b, i, j)),
        compiler_params=pltpu.CompilerParams(
            dimension_semantics=("parallel", "parallel", "parallel"),
            vmem_limit_bytes=VMEM_LIMIT),
    )(x, w, b_row, lse_col)
    return logp, ce


# ----------------------------- model forward -----------------------------

def conformer_forward(x, lengths, kp):
    B, T, C = x.shape
    assert T % 2 == 0  # TODO(synk): odd T would need one extra padded row for the parity split

    # --- downsample Conv1d(C, C, k=5, stride=2, padding=2): parity split (plain-JAX
    #     strided view) + per-tap matmuls / masked row shifts fully in VMEM
    xe = x[:, 0::2, :]
    xo = x[:, 1::2, :]
    xd = pallas_downsample(xe, xo, kp['down_w'], kp['down_b'])     # (B, T//2, C) bf16

    # key-padding handled in-kernel from downsampled lengths
    # (PyTorch builds the mask from max((lengths+1)//2); requires max(lengths) == T)
    len_down = ((lengths + 1) // 2).astype(jnp.int32).reshape(B, 1, 1)

    xb = xd
    for plist in kp['layers']:
        xb = pallas_conformer_block(xb, len_down, plist)

    # --- upsample ConvTranspose1d(C, C, k=5, stride=2, padding=1), rows [0:T]
    oe, oo = pallas_upsample(xb, kp['up_w'], kp['up_b'])           # even/odd output rows
    out = jnp.stack([oe, oo], axis=2).reshape(B, T, C)             # interleave (tiny glue)
    return out, lengths


def model_forward(audio_features, audio_features_len, kp):
    # eval mode: SpecAugment masking and dropout are identity
    B, T, F_in = audio_features.shape
    x = pallas_linear(audio_features.reshape(B * T, F_in),
                      kp['init_w'], kp['init_b'],
                      out_dtype=jnp.bfloat16).reshape(B, T, CONF_DIM)

    conf_out, _ = conformer_forward(x, audio_features_len, kp)     # (B, T, C) bf16

    # fused final projection + log-softmax; CE-order logits emitted directly
    log_probs, logits_ce_order = pallas_classifier(
        conf_out, kp['final_w'], kp['final_w_t'],
        kp['final_b_row'], kp['final_b_col'])
    return log_probs, logits_ce_order


# ----------------------------- parameter init / prep -----------------------------

def init_params(key):
    """Parameters in (folded) PyTorch-like layout."""
    keys = iter(jax.random.split(key, 512))

    def nrm(shape, scale=0.05):
        return scale * jax.random.normal(next(keys), shape, jnp.float32)

    C = CONF_DIM

    def ff_params():
        return dict(ln_g=1.0 + nrm((C,), 0.01), ln_b=nrm((C,)),
                    w1=nrm((C, FFN_DIM)), b1=nrm((FFN_DIM,)),
                    w2=nrm((FFN_DIM, C)), b2=nrm((C,)))

    def conv_params():
        gamma = 1.0 + nrm((C,), 0.01)
        beta = nrm((C,))
        r_mean = nrm((C,))
        r_var = 1.0 + jnp.abs(nrm((C,), 0.1))
        bn_scale = gamma / jnp.sqrt(r_var + BN_EPS)     # folded eval BatchNorm1d
        bn_shift = beta - r_mean * bn_scale
        return dict(ln_g=1.0 + nrm((C,), 0.01), ln_b=nrm((C,)),
                    pw1_wa=nrm((C, C)), pw1_ba=nrm((C,)),
                    pw1_wg=nrm((C, C)), pw1_bg=nrm((C,)),
                    dw_w=nrm((DW_KERNEL, C)), dw_b=nrm((C,)),
                    bn_scale=bn_scale, bn_shift=bn_shift,
                    pw2_w=nrm((C, C)), pw2_b=nrm((C,)))

    def mhsa_params():
        return dict(ln_g=1.0 + nrm((C,), 0.01), ln_b=nrm((C,)),
                    in_w=nrm((C, 3 * C)), in_b=nrm((3 * C,)),
                    out_w=nrm((C, C)), out_b=nrm((C,)))

    def layer_params():
        return dict(ff1=ff_params(), conv=conv_params(), mhsa=mhsa_params(),
                    ff2=ff_params(),
                    final_ln_g=1.0 + nrm((C,), 0.01), final_ln_b=nrm((C,)))

    return dict(
        init_w=nrm((IN_DIM, C)), init_b=nrm((C,)),
        down_w=nrm((C, C, 5)), down_b=nrm((C,)),      # torch Conv1d layout (out, in, K)
        up_w=nrm((C, C, 5)), up_b=nrm((C,)),          # torch ConvTranspose1d layout (in, out, K)
        layers=[layer_params() for _ in range(NUM_LAYERS)],
        final_w=nrm((C, TARGET_DIM)), final_b=nrm((TARGET_DIM,)),
    )


def prepare_kernel_params(params):
    """Convert to kernel layout: bf16 matmul weights, (1,N) f32 vectors, per-tap
    down/upsample matrices, per-head (pre-split, scale-folded) attention weights."""
    C, H, D = CONF_DIM, NUM_HEADS, HEAD_DIM

    def row(v):
        return v.reshape(1, -1).astype(jnp.float32)

    def wmat(w):
        return w.astype(jnp.bfloat16)

    def ff_list(p):
        return [row(p['ln_g']), row(p['ln_b']),
                wmat(p['w1']), row(p['b1']),
                wmat(p['w2']), row(p['b2'])]

    def split_heads_cols(w):    # (C, C) -> (H, C, D)
        return jnp.stack([w[:, h * D:(h + 1) * D] for h in range(H)], axis=0)

    def split_heads_rows(w):    # (C, C) -> (H, D, C)
        return jnp.stack([w[h * D:(h + 1) * D, :] for h in range(H)], axis=0)

    kp = dict(
        init_w=wmat(params['init_w']), init_b=row(params['init_b']),
        # Conv1d weight (out, in, K) -> per-tap (in, out) matrices, stacked (5, C, C)
        down_w=wmat(jnp.stack([params['down_w'][:, :, k].T for k in range(5)], axis=0)),
        down_b=row(params['down_b']),
        # ConvTranspose1d weight (in, out, K) -> per-tap (in, out), stacked (5, C, C)
        up_w=wmat(jnp.stack([params['up_w'][:, :, k] for k in range(5)], axis=0)),
        up_b=row(params['up_b']),
        final_w=wmat(params['final_w']),
        final_w_t=wmat(params['final_w'].T),
        final_b_row=row(params['final_b']),
        final_b_col=params['final_b'].reshape(-1, 1).astype(jnp.float32),
        layers=[],
    )

    scale = 1.0 / (D ** 0.5)
    for lp in params['layers']:
        cv, mh = lp['conv'], lp['mhsa']
        wq = mh['in_w'][:, 0 * C:1 * C] * scale       # fold 1/sqrt(D) into q proj
        wk = mh['in_w'][:, 1 * C:2 * C]
        wv = mh['in_w'][:, 2 * C:3 * C]
        bq = mh['in_b'][0 * C:1 * C] * scale
        bk = mh['in_b'][1 * C:2 * C]
        bv = mh['in_b'][2 * C:3 * C]
        plist = (
            ff_list(lp['ff1'])
            + [row(cv['ln_g']), row(cv['ln_b']),
               wmat(cv['pw1_wa']), row(cv['pw1_ba']),
               wmat(cv['pw1_wg']), row(cv['pw1_bg']),
               cv['dw_w'].astype(jnp.float32), row(cv['dw_b']),
               row(cv['bn_scale']), row(cv['bn_shift']),
               wmat(cv['pw2_w']), row(cv['pw2_b'])]
            + [row(mh['ln_g']), row(mh['ln_b']),
               wmat(split_heads_cols(wq)), bq.reshape(H, 1, D).astype(jnp.float32),
               wmat(split_heads_cols(wk)), bk.reshape(H, 1, D).astype(jnp.float32),
               wmat(split_heads_cols(wv)), bv.reshape(H, 1, D).astype(jnp.float32),
               wmat(split_heads_rows(mh['out_w'])), row(mh['out_b'])]
            + ff_list(lp['ff2'])
            + [row(lp['final_ln_g']), row(lp['final_ln_b'])]
        )
        kp['layers'].append(plist)
    return kp


# ----------------------------- main -----------------------------

if __name__ == "__main__":
    # Resolve the tiny hardware probes once, outside any trace.
    _roll_sign()
    _supports_single_buffer()

    key = jax.random.PRNGKey(0)
    k_in, k_par = jax.random.split(key)

    B, T = 2, 16
    audio_features = jax.random.normal(k_in, (B, T, IN_DIM), jnp.float32)
    audio_features_len = jnp.array([16, 11], jnp.int32)
    # PyTorch builds the key-padding mask from max((lengths+1)//2); we require it
    # to equal the static downsampled length (true whenever max(lengths) == T).
    assert int(jnp.max(audio_features_len)) == T
    assert T % 2 == 0

    params = init_params(k_par)
    kparams = prepare_kernel_params(params)

    fwd = jax.jit(model_forward)
    log_probs, logits_ce_order = fwd(audio_features, audio_features_len, kparams)
    jax.block_until_ready((log_probs, logits_ce_order))

    assert log_probs.shape == (B, T, TARGET_DIM)
    assert logits_ce_order.shape == (B, TARGET_DIM, T)
    assert bool(jnp.all(jnp.isfinite(log_probs)))
    assert bool(jnp.all(jnp.isfinite(logits_ce_order)))
    # log-softmax rows must exponentiate-sum to 1
    row_sums = jnp.sum(jnp.exp(log_probs), axis=-1)
    assert bool(jnp.all(jnp.abs(row_sums - 1.0) < 1e-3))
    # the two classifier passes and the CE-order output must be mutually consistent
    ref_lp = jax.nn.log_softmax(jnp.transpose(logits_ce_order, (0, 2, 1)), axis=-1)
    assert bool(jnp.max(jnp.abs(ref_lp - log_probs)) < 2e-2)

    print("KERNEL_OK")
</pallas_src>

<mosaic_0001>
module attributes {stable_mosaic.version = 11 : i64} {
  func.func @_roll_probe_kernel(%arg0: memref<8x128xf32, #tpu.memory_space<vmem>>, %arg1: memref<8x128xf32, #tpu.memory_space<vmem>>) attributes {dimension_semantics = [], scalar_prefetch = 0 : i64, scratch_operands = 0 : i64, tpu.core_type = #tpu.core_type<tc>} {
    %c0 = arith.constant 0 : index
    %c0_0 = arith.constant 0 : index
    %0 = vector.load %arg0[%c0, %c0_0] : memref<8x128xf32, #tpu.memory_space<vmem>>, vector<8x128xf32>
    %c1_i32 = arith.constant 1 : i32
    %1 = tpu.dynamic_rotate %0 by %c1_i32 dim 0 : vector<8x128xf32>, i32 -> vector<8x128xf32>
    %c0_1 = arith.constant 0 : index
    %c0_2 = arith.constant 0 : index
    %2 = vector.load %arg1[%c0_1, %c0_2] : memref<8x128xf32, #tpu.memory_space<vmem>>, vector<8x128xf32>
    tpu.vector_store %arg1[%c0_1, %c0_2], %1 {strides = array<i32>} : memref<8x128xf32, #tpu.memory_space<vmem>>, vector<8x128xf32>,
    return
  }
}

module attributes {stable_mosaic.version = 11 : i64} {
  func.func @k(%arg0: i32, %arg1: memref<8x128xf32, #tpu.memory_space<vmem>>, %arg2: memref<8x128xf32, #tpu.memory_space<vmem>>, %arg3: memref<8x128xf32, #tpu.memory_space<vmem>>) attributes {dimension_semantics = [#tpu.dimension_semantics<arbitrary>], iteration_bounds = array<i64: 2>, scalar_prefetch = 0 : i64, scratch_operands = 0 : i64, tpu.core_type = #tpu.core_type<tc>, window_params = [{transform_indices = @transform_0, window_bounds = array<i64: 8, 128>}, {pipeline_mode = #tpu.pipeline_mode<synchronous>, transform_indices = @transform_1, window_bounds = array<i64: 8, 128>}, {transform_indices = @transform_2, window_bounds = array<i64: 8, 128>}]} {
    %c0 = arith.constant 0 : index
    %c0_0 = arith.constant 0 : index
    %0 = vector.load %arg1[%c0, %c0_0] : memref<8x128xf32, #tpu.memory_space<vmem>>, vector<8x128xf32>
    %c0_1 = arith.constant 0 : index
    %c0_2 = arith.constant 0 : index
    %1 = vector.load %arg2[%c0_1, %c0_2] : memref<8x128xf32, #tpu.memory_space<vmem>>, vector<8x128xf32>
    %2 = arith.addf %0, %1 : vector<8x128xf32>
    %c0_3 = arith.constant 0 : index
    %c0_4 = arith.constant 0 : index
    %3 = vector.load %arg3[%c0_3, %c0_4] : memref<8x128xf32, #tpu.memory_space<vmem>>, vector<8x128xf32>
    tpu.vector_store %arg3[%c0_3, %c0_4], %2 {strides = array<i32>} : memref<8x128xf32, #tpu.memory_space<vmem>>, vector<8x128xf32>,
    return
  }
  func.func @transform_0(%arg0: i32) -> (i32, i32) {
    %c0_i32 = arith.constant 0 : i32
    %c0_i32_0 = arith.constant 0 : i32
    return %arg0, %c0_i32 : i32, i32
  }
  func.func @transform_1(%arg0: i32) -> (i32, i32) {
    %c0_i32 = arith.constant 0 : i32
    %c0_i32_0 = arith.constant 0 : i32
    %c0_i32_1 = arith.constant 0 : i32
    return %c0_i32, %c0_i32_0 : i32, i32
  }
  func.func @transform_2(%arg0: i32) -> (i32, i32) {
    %c0_i32 = arith.constant 0 : i32
    %c0_i32_0 = arith.constant 0 : i32
    return %arg0, %c0_i32 : i32, i32
  }
}

module attributes {stable_mosaic.version = 11 : i64} {
  func.func @_downsample_kernel(%arg0: i32, %arg1: memref<1x8x64xbf16, #tpu.memory_space<vmem>>, %arg2: memref<1x8x64xbf16, #tpu.memory_space<vmem>>, %arg3: memref<5x64x64xbf16, #tpu.memory_space<vmem>>, %arg4: memref<1x64xf32, #tpu.memory_space<vmem>>, %arg5: memref<1x8x64xbf16, #tpu.memory_space<vmem>>) attributes {dimension_semantics = [#tpu.dimension_semantics<parallel>], iteration_bounds = array<i64: 2>, scalar_prefetch = 0 : i64, scratch_operands = 0 : i64, tpu.core_type = #tpu.core_type<tc>, window_params = [{transform_indices = @transform_0, window_bounds = array<i64: 1, 8, 64>}, {transform_indices = @transform_1, window_bounds = array<i64: 1, 8, 64>}, {pipeline_mode = #tpu.pipeline_mode<synchronous>, transform_indices = @transform_2, window_bounds = array<i64: 5, 64, 64>}, {pipeline_mode = #tpu.pipeline_mode<synchronous>, transform_indices = @transform_3, window_bounds = array<i64: 1, 64>}, {transform_indices = @transform_4, window_bounds = array<i64: 1, 8, 64>}]} {
    %c0 = arith.constant 0 : index
    %c0_0 = arith.constant 0 : index
    %c0_1 = arith.constant 0 : index
    %0 = vector.load %arg1[%c0, %c0_0, %c0_1] : memref<1x8x64xbf16, #tpu.memory_space<vmem>>, vector<1x8x64xbf16>
    %1 = vector.shape_cast %0 : vector<1x8x64xbf16> to vector<8x64xbf16>
    %c0_2 = arith.constant 0 : index
    %c0_3 = arith.constant 0 : index
    %c0_4 = arith.constant 0 : index
    %2 = vector.load %arg2[%c0_2, %c0_3, %c0_4] : memref<1x8x64xbf16, #tpu.memory_space<vmem>>, vector<1x8x64xbf16>
    %3 = vector.shape_cast %2 : vector<1x8x64xbf16> to vector<8x64xbf16>
    %c0_5 = arith.constant 0 : index
    %c0_6 = arith.constant 0 : index
    %c0_7 = arith.constant 0 : index
    %4 = vector.load %arg3[%c0_5, %c0_6, %c0_7] : memref<5x64x64xbf16, #tpu.memory_space<vmem>>, vector<1x64x64xbf16>
    %5 = vector.shape_cast %4 : vector<1x64x64xbf16> to vector<64x64xbf16>
    %cst = arith.constant dense<0.000000e+00> : vector<8x64xf32>
    %6 = tpu.matmul %1, %5, %cst {dimension_numbers = #tpu.dot_dimension_numbers<[1], [0], [0], [1], [0, 0, 1, 1], [], []>} : vector<8x64xbf16>, vector<64x64xbf16>, vector<8x64xf32> -> vector<8x64xf32>
    %c1 = arith.constant 1 : index
    %c0_8 = arith.constant 0 : index
    %c0_9 = arith.constant 0 : index
    %7 = vector.load %arg3[%c1, %c0_8, %c0_9] : memref<5x64x64xbf16, #tpu.memory_space<vmem>>, vector<1x64x64xbf16>
    %8 = vector.shape_cast %7 : vector<1x64x64xbf16> to vector<64x64xbf16>
    %cst_10 = arith.constant dense<0.000000e+00> : vector<8x64xf32>
    %9 = tpu.matmul %3, %8, %cst_10 {dimension_numbers = #tpu.dot_dimension_numbers<[1], [0], [0], [1], [0, 0, 1, 1], [], []>} : vector<8x64xbf16>, vector<64x64xbf16>, vector<8x64xf32> -> vector<8x64xf32>
    %c2 = arith.constant 2 : index
    %c0_11 = arith.constant 0 : index
    %c0_12 = arith.constant 0 : index
    %10 = vector.load %arg3[%c2, %c0_11, %c0_12] : memref<5x64x64xbf16, #tpu.memory_space<vmem>>, vector<1x64x64xbf16>
    %11 = vector.shape_cast %10 : vector<1x64x64xbf16> to vector<64x64xbf16>
    %cst_13 = arith.constant dense<0.000000e+00> : vector<8x64xf32>
    %12 = tpu.matmul %1, %11, %cst_13 {dimension_numbers = #tpu.dot_dimension_numbers<[1], [0], [0], [1], [0, 0, 1, 1], [], []>} : vector<8x64xbf16>, vector<64x64xbf16>, vector<8x64xf32> -> vector<8x64xf32>
    %c3 = arith.constant 3 : index
    %c0_14 = arith.constant 0 : index
    %c0_15 = arith.constant 0 : index
    %13 = vector.load %arg3[%c3, %c0_14, %c0_15] : memref<5x64x64xbf16, #tpu.memory_space<vmem>>, vector<1x64x64xbf16>
    %14 = vector.shape_cast %13 : vector<1x64x64xbf16> to vector<64x64xbf16>
    %cst_16 = arith.constant dense<0.000000e+00> : vector<8x64xf32>
    %15 = tpu.matmul %3, %14, %cst_16 {dimension_numbers = #tpu.dot_dimension_numbers<[1], [0], [0], [1], [0, 0, 1, 1], [], []>} : vector<8x64xbf16>, vector<64x64xbf16>, vector<8x64xf32> -> vector<8x64xf32>
    %c4 = arith.constant 4 : index
    %c0_17 = arith.constant 0 : index
    %c0_18 = arith.constant 0 : index
    %16 = vector.load %arg3[%c4, %c0_17, %c0_18] : memref<5x64x64xbf16, #tpu.memory_space<vmem>>, vector<1x64x64xbf16>
    %17 = vector.shape_cast %16 : vector<1x64x64xbf16> to vector<64x64xbf16>
    %cst_19 = arith.constant dense<0.000000e+00> : vector<8x64xf32>
    %18 = tpu.matmul %1, %17, %cst_19 {dimension_numbers = #tpu.dot_dimension_numbers<[1], [0], [0], [1], [0, 0, 1, 1], [], []>} : vector<8x64xbf16>, vector<64x64xbf16>, vector<8x64xf32> -> vector<8x64xf32>
    %cst_20 = arith.constant 0.000000e+00 : f32
    %19 = vector.broadcast %cst_20 : f32 to vector<1x64xf32>
    %20 = vector.extract_strided_slice %6 {offsets = [0, 0], sizes = [7, 64], strides = [1, 1]} : vector<8x64xf32> to vector<7x64xf32>
    %21 = tpu.concatenate %19, %20 in 0 : vector<1x64xf32>, vector<7x64xf32> -> vector<8x64xf32>
    %cst_21 = arith.constant 0.000000e+00 : f32
    %22 = vector.broadcast %cst_21 : f32 to vector<1x64xf32>
    %23 = vector.extract_strided_slice %9 {offsets = [0, 0], sizes = [7, 64], strides = [1, 1]} : vector<8x64xf32> to vector<7x64xf32>
    %24 = tpu.concatenate %22, %23 in 0 : vector<1x64xf32>, vector<7x64xf32> -> vector<8x64xf32>
    %25 = arith.addf %21, %24 : vector<8x64xf32>
    %26 = arith.addf %25, %12 : vector<8x64xf32>
    %27 = arith.addf %26, %15 : vector<8x64xf32>
    %cst_22 = arith.constant 0.000000e+00 : f32
    %28 = vector.broadcast %cst_22 : f32 to vector<1x64xf32>
    %29 = vector.extract_strided_slice %18 {offsets = [1, 0], sizes = [7, 64], strides = [1, 1]} : vector<8x64xf32> to vector<7x64xf32>
    %30 = tpu.concatenate %29, %28 in 0 : vector<7x64xf32>, vector<1x64xf32> -> vector<8x64xf32>
    %31 = arith.addf %27, %30 : vector<8x64xf32>
    %c0_23 = arith.constant 0 : index
    %c0_24 = arith.constant 0 : index
    %32 = vector.load %arg4[%c0_23, %c0_24] : memref<1x64xf32, #tpu.memory_space<vmem>>, vector<1x64xf32>
    %33 = vector.broadcast %32 : vector<1x64xf32> to vector<8x64xf32>
    %34 = arith.addf %31, %33 : vector<8x64xf32>
    %35 = arith.truncf %34 : vector<8x64xf32> to vector<8x64xbf16>
    %c0_25 = arith.constant 0 : index
    %c0_26 = arith.constant 0 : index
    %c0_27 = arith.constant 0 : index
    %36 = vector.load %arg5[%c0_25, %c0_26, %c0_27] : memref<1x8x64xbf16, #tpu.memory_space<vmem>>, vector<1x8x64xbf16>
    %37 = vector.shape_cast %36 : vector<1x8x64xbf16> to vector<8x64xbf16>
    %38 = vector.shape_cast %35 : vector<8x64xbf16> to vector<1x8x64xbf16>
    tpu.vector_store %arg5[%c0_25, %c0_26, %c0_27], %38 {strides = array<i32>} : memref<1x8x64xbf16, #tpu.memory_space<vmem>>, vector<1x8x64xbf16>,
    return
  }
  func.func @transform_0(%arg0: i32) -> (i32, i32, i32) {
    %c0_i32 = arith.constant 0 : i32
    %c0_i32_0 = arith.constant 0 : i32
    %c0_i32_1 = arith.constant 0 : i32
    return %arg0, %c0_i32, %c0_i32_0 : i32, i32, i32
  }
  func.func @transform_1(%arg0: i32) -> (i32, i32, i32) {
    %c0_i32 = arith.constant 0 : i32
    %c0_i32_0 = arith.constant 0 : i32
    %c0_i32_1 = arith.constant 0 : i32
    return %arg0, %c0_i32, %c0_i32_0 : i32, i32, i32
  }
  func.func @transform_2(%arg0: i32) -> (i32, i32, i32) {
    %c0_i32 = arith.constant 0 : i32
    %c0_i32_0 = arith.constant 0 : i32
    %c0_i32_1 = arith.constant 0 : i32
    %c0_i32_2 = arith.constant 0 : i32
    return %c0_i32, %c0_i32_0, %c0_i32_1 : i32, i32, i32
  }
  func.func @transform_3(%arg0: i32) -> (i32, i32) {
    %c0_i32 = arith.constant 0 : i32
    %c0_i32_0 = arith.constant 0 : i32
    %c0_i32_1 = arith.constant 0 : i32
    return %c0_i32, %c0_i32_0 : i32, i32
  }
  func.func @transform_4(%arg0: i32) -> (i32, i32, i32) {
    %c0_i32 = arith.constant 0 : i32
    %c0_i32_0 = arith.constant 0 : i32
    %c0_i32_1 = arith.constant 0 : i32
    return %arg0, %c0_i32, %c0_i32_0 : i32, i32, i32
  }
}

module attributes {stable_mosaic.version = 11 : i64} {
  func.func @_linear_kernel(%arg0: i32, %arg1: memref<32x50xf32, #tpu.memory_space<vmem>>, %arg2: memref<50x64xbf16, #tpu.memory_space<vmem>>, %arg3: memref<1x64xf32, #tpu.memory_space<vmem>>, %arg4: memref<32x64xbf16, #tpu.memory_space<vmem>>) attributes {dimension_semantics = [#tpu.dimension_semantics<parallel>], iteration_bounds = array<i64: 1>, scalar_prefetch = 0 : i64, scratch_operands = 0 : i64, tpu.core_type = #tpu.core_type<tc>, window_params = [{transform_indices = @transform_0, window_bounds = array<i64: 32, 50>}, {pipeline_mode = #tpu.pipeline_mode<synchronous>, transform_indices = @transform_1, window_bounds = array<i64: 50, 64>}, {pipeline_mode = #tpu.pipeline_mode<synchronous>, transform_indices = @transform_2, window_bounds = array<i64: 1, 64>}, {transform_indices = @transform_3, window_bounds = array<i64: 32, 64>}]} {
    %c0 = arith.constant 0 : index
    %c0_0 = arith.constant 0 : index
    %0 = vector.load %arg1[%c0, %c0_0] : memref<32x50xf32, #tpu.memory_space<vmem>>, vector<32x50xf32>
    %1 = arith.truncf %0 : vector<32x50xf32> to vector<32x50xbf16>
    %c0_1 = arith.constant 0 : index
    %c0_2 = arith.constant 0 : index
    %2 = vector.load %arg2[%c0_1, %c0_2] : memref<50x64xbf16, #tpu.memory_space<vmem>>, vector<50x64xbf16>
    %cst = arith.constant dense<0.000000e+00> : vector<32x64xf32>
    %3 = tpu.matmul %1, %2, %cst {dimension_numbers = #tpu.dot_dimension_numbers<[1], [0], [0], [1], [0, 0, 1, 1], [], []>} : vector<32x50xbf16>, vector<50x64xbf16>, vector<32x64xf32> -> vector<32x64xf32>
    %c0_3 = arith.constant 0 : index
    %c0_4 = arith.constant 0 : index
    %4 = vector.load %arg3[%c0_3, %c0_4] : memref<1x64xf32, #tpu.memory_space<vmem>>, vector<1x64xf32>
    %5 = vector.broadcast %4 : vector<1x64xf32> to vector<32x64xf32>
    %6 = arith.addf %3, %5 : vector<32x64xf32>
    %7 = arith.truncf %6 : vector<32x64xf32> to vector<32x64xbf16>
    %c0_5 = arith.constant 0 : index
    %c0_6 = arith.constant 0 : index
    %8 = vector.load %arg4[%c0_5, %c0_6] : memref<32x64xbf16, #tpu.memory_space<vmem>>, vector<32x64xbf16>
    tpu.vector_store %arg4[%c0_5, %c0_6], %7 {strides = array<i32>} : memref<32x64xbf16, #tpu.memory_space<vmem>>, vector<32x64xbf16>,
    return
  }
  func.func @transform_0(%arg0: i32) -> (i32, i32) {
    %c0_i32 = arith.constant 0 : i32
    %c0_i32_0 = arith.constant 0 : i32
    return %arg0, %c0_i32 : i32, i32
  }
  func.func @transform_1(%arg0: i32) -> (i32, i32) {
    %c0_i32 = arith.constant 0 : i32
    %c0_i32_0 = arith.constant 0 : i32
    %c0_i32_1 = arith.constant 0 : i32
    return %c0_i32, %c0_i32_0 : i32, i32
  }
  func.func @transform_2(%arg0: i32) -> (i32, i32) {
    %c0_i32 = arith.constant 0 : i32
    %c0_i32_0 = arith.constant 0 : i32
    %c0_i32_1 = arith.constant 0 : i32
    return %c0_i32, %c0_i32_0 : i32, i32
  }
  func.func @transform_3(%arg0: i32) -> (i32, i32) {
    %c0_i32 = arith.constant 0 : i32
    %c0_i32_0 = arith.constant 0 : i32
    return %arg0, %c0_i32 : i32, i32
  }
}

module attributes {stable_mosaic.version = 11 : i64} {
  func.func @_upsample_kernel(%arg0: i32, %arg1: memref<1x8x64xbf16, #tpu.memory_space<vmem>>, %arg2: memref<5x64x64xbf16, #tpu.memory_space<vmem>>, %arg3: memref<1x64xf32, #tpu.memory_space<vmem>>, %arg4: memref<1x8x64xbf16, #tpu.memory_space<vmem>>, %arg5: memref<1x8x64xbf16, #tpu.memory_space<vmem>>) attributes {dimension_semantics = [#tpu.dimension_semantics<parallel>], iteration_bounds = array<i64: 2>, scalar_prefetch = 0 : i64, scratch_operands = 0 : i64, tpu.core_type = #tpu.core_type<tc>, window_params = [{transform_indices = @transform_0, window_bounds = array<i64: 1, 8, 64>}, {pipeline_mode = #tpu.pipeline_mode<synchronous>, transform_indices = @transform_1, window_bounds = array<i64: 5, 64, 64>}, {pipeline_mode = #tpu.pipeline_mode<synchronous>, transform_indices = @transform_2, window_bounds = array<i64: 1, 64>}, {transform_indices = @transform_3, window_bounds = array<i64: 1, 8, 64>}, {transform_indices = @transform_4, window_bounds = array<i64: 1, 8, 64>}]} {
    %c0 = arith.constant 0 : index
    %c0_0 = arith.constant 0 : index
    %c0_1 = arith.constant 0 : index
    %0 = vector.load %arg1[%c0, %c0_0, %c0_1] : memref<1x8x64xbf16, #tpu.memory_space<vmem>>, vector<1x8x64xbf16>
    %1 = vector.shape_cast %0 : vector<1x8x64xbf16> to vector<8x64xbf16>
    %c0_2 = arith.constant 0 : index
    %c0_3 = arith.constant 0 : index
    %c0_4 = arith.constant 0 : index
    %2 = vector.load %arg2[%c0_2, %c0_3, %c0_4] : memref<5x64x64xbf16, #tpu.memory_space<vmem>>, vector<1x64x64xbf16>
    %3 = vector.shape_cast %2 : vector<1x64x64xbf16> to vector<64x64xbf16>
    %cst = arith.constant dense<0.000000e+00> : vector<8x64xf32>
    %4 = tpu.matmul %1, %3, %cst {dimension_numbers = #tpu.dot_dimension_numbers<[1], [0], [0], [1], [0, 0, 1, 1], [], []>} : vector<8x64xbf16>, vector<64x64xbf16>, vector<8x64xf32> -> vector<8x64xf32>
    %c1 = arith.constant 1 : index
    %c0_5 = arith.constant 0 : index
    %c0_6 = arith.constant 0 : index
    %5 = vector.load %arg2[%c1, %c0_5, %c0_6] : memref<5x64x64xbf16, #tpu.memory_space<vmem>>, vector<1x64x64xbf16>
    %6 = vector.shape_cast %5 : vector<1x64x64xbf16> to vector<64x64xbf16>
    %cst_7 = arith.constant dense<0.000000e+00> : vector<8x64xf32>
    %7 = tpu.matmul %1, %6, %cst_7 {dimension_numbers = #tpu.dot_dimension_numbers<[1], [0], [0], [1], [0, 0, 1, 1], [], []>} : vector<8x64xbf16>, vector<64x64xbf16>, vector<8x64xf32> -> vector<8x64xf32>
    %c2 = arith.constant 2 : index
    %c0_8 = arith.constant 0 : index
    %c0_9 = arith.constant 0 : index
    %8 = vector.load %arg2[%c2, %c0_8, %c0_9] : memref<5x64x64xbf16, #tpu.memory_space<vmem>>, vector<1x64x64xbf16>
    %9 = vector.shape_cast %8 : vector<1x64x64xbf16> to vector<64x64xbf16>
    %cst_10 = arith.constant dense<0.000000e+00> : vector<8x64xf32>
    %10 = tpu.matmul %1, %9, %cst_10 {dimension_numbers = #tpu.dot_dimension_numbers<[1], [0], [0], [1], [0, 0, 1, 1], [], []>} : vector<8x64xbf16>, vector<64x64xbf16>, vector<8x64xf32> -> vector<8x64xf32>
    %c3 = arith.constant 3 : index
    %c0_11 = arith.constant 0 : index
    %c0_12 = arith.constant 0 : index
    %11 = vector.load %arg2[%c3, %c0_11, %c0_12] : memref<5x64x64xbf16, #tpu.memory_space<vmem>>, vector<1x64x64xbf16>
    %12 = vector.shape_cast %11 : vector<1x64x64xbf16> to vector<64x64xbf16>
    %cst_13 = arith.constant dense<0.000000e+00> : vector<8x64xf32>
    %13 = tpu.matmul %1, %12, %cst_13 {dimension_numbers = #tpu.dot_dimension_numbers<[1], [0], [0], [1], [0, 0, 1, 1], [], []>} : vector<8x64xbf16>, vector<64x64xbf16>, vector<8x64xf32> -> vector<8x64xf32>
    %c4 = arith.constant 4 : index
    %c0_14 = arith.constant 0 : index
    %c0_15 = arith.constant 0 : index
    %14 = vector.load %arg2[%c4, %c0_14, %c0_15] : memref<5x64x64xbf16, #tpu.memory_space<vmem>>, vector<1x64x64xbf16>
    %15 = vector.shape_cast %14 : vector<1x64x64xbf16> to vector<64x64xbf16>
    %cst_16 = arith.constant dense<0.000000e+00> : vector<8x64xf32>
    %16 = tpu.matmul %1, %15, %cst_16 {dimension_numbers = #tpu.dot_dimension_numbers<[1], [0], [0], [1], [0, 0, 1, 1], [], []>} : vector<8x64xbf16>, vector<64x64xbf16>, vector<8x64xf32> -> vector<8x64xf32>
    %c0_17 = arith.constant 0 : index
    %c0_18 = arith.constant 0 : index
    %17 = vector.load %arg3[%c0_17, %c0_18] : memref<1x64xf32, #tpu.memory_space<vmem>>, vector<1x64xf32>
    %cst_19 = arith.constant 0.000000e+00 : f32
    %18 = vector.broadcast %cst_19 : f32 to vector<1x64xf32>
    %19 = vector.extract_strided_slice %13 {offsets = [0, 0], sizes = [7, 64], strides = [1, 1]} : vector<8x64xf32> to vector<7x64xf32>
    %20 = tpu.concatenate %18, %19 in 0 : vector<1x64xf32>, vector<7x64xf32> -> vector<8x64xf32>
    %21 = arith.addf %7, %20 : vector<8x64xf32>
    %22 = vector.broadcast %17 : vector<1x64xf32> to vector<8x64xf32>
    %23 = arith.addf %21, %22 : vector<8x64xf32>
    %24 = arith.truncf %23 : vector<8x64xf32> to vector<8x64xbf16>
    %c0_20 = arith.constant 0 : index
    %c0_21 = arith.constant 0 : index
    %c0_22 = arith.constant 0 : index
    %25 = vector.load %arg4[%c0_20, %c0_21, %c0_22] : memref<1x8x64xbf16, #tpu.memory_space<vmem>>, vector<1x8x64xbf16>
    %26 = vector.shape_cast %25 : vector<1x8x64xbf16> to vector<8x64xbf16>
    %27 = vector.shape_cast %24 : vector<8x64xbf16> to vector<1x8x64xbf16>
    tpu.vector_store %arg4[%c0_20, %c0_21, %c0_22], %27 {strides = array<i32>} : memref<1x8x64xbf16, #tpu.memory_space<vmem>>, vector<1x8x64xbf16>,
    %cst_23 = arith.constant 0.000000e+00 : f32
    %28 = vector.broadcast %cst_23 : f32 to vector<1x64xf32>
    %29 = vector.extract_strided_slice %4 {offsets = [1, 0], sizes = [7, 64], strides = [1, 1]} : vector<8x64xf32> to vector<7x64xf32>
    %30 = tpu.concatenate %29, %28 in 0 : vector<7x64xf32>, vector<1x64xf32> -> vector<8x64xf32>
    %31 = arith.addf %30, %10 : vector<8x64xf32>
    %cst_24 = arith.constant 0.000000e+00 : f32
    %32 = vector.broadcast %cst_24 : f32 to vector<1x64xf32>
    %33 = vector.extract_strided_slice %16 {offsets = [0, 0], sizes = [7, 64], strides = [1, 1]} : vector<8x64xf32> to vector<7x64xf32>
    %34 = tpu.concatenate %32, %33 in 0 : vector<1x64xf32>, vector<7x64xf32> -> vector<8x64xf32>
    %35 = arith.addf %31, %34 : vector<8x64xf32>
    %36 = vector.broadcast %17 : vector<1x64xf32> to vector<8x64xf32>
    %37 = arith.addf %35, %36 : vector<8x64xf32>
    %38 = arith.truncf %37 : vector<8x64xf32> to vector<8x64xbf16>
    %c0_25 = arith.constant 0 : index
    %c0_26 = arith.constant 0 : index
    %c0_27 = arith.constant 0 : index
    %39 = vector.load %arg5[%c0_25, %c0_26, %c0_27] : memref<1x8x64xbf16, #tpu.memory_space<vmem>>, vector<1x8x64xbf16>
    %40 = vector.shape_cast %39 : vector<1x8x64xbf16> to vector<8x64xbf16>
    %41 = vector.shape_cast %38 : vector<8x64xbf16> to vector<1x8x64xbf16>
    tpu.vector_store %arg5[%c0_25, %c0_26, %c0_27], %41 {strides = array<i32>} : memref<1x8x64xbf16, #tpu.memory_space<vmem>>, vector<1x8x64xbf16>,
    return
  }
  func.func @transform_0(%arg0: i32) -> (i32, i32, i32) {
    %c0_i32 = arith.constant 0 : i32
    %c0_i32_0 = arith.constant 0 : i32
    %c0_i32_1 = arith.constant 0 : i32
    return %arg0, %c0_i32, %c0_i32_0 : i32, i32, i32
  }
  func.func @transform_1(%arg0: i32) -> (i32, i32, i32) {
    %c0_i32 = arith.constant 0 : i32
    %c0_i32_0 = arith.constant 0 : i32
    %c0_i32_1 = arith.constant 0 : i32
    %c0_i32_2 = arith.constant 0 : i32
    return %c0_i32, %c0_i32_0, %c0_i32_1 : i32, i32, i32
  }
  func.func @transform_2(%arg0: i32) -> (i32, i32) {
    %c0_i32 = arith.constant 0 : i32
    %c0_i32_0 = arith.constant 0 : i32
    %c0_i32_1 = arith.constant 0 : i32
    return %c0_i32, %c0_i32_0 : i32, i32
  }
  func.func @transform_3(%arg0: i32) -> (i32, i32, i32) {
    %c0_i32 = arith.constant 0 : i32
    %c0_i32_0 = arith.constant 0 : i32
    %c0_i32_1 = arith.constant 0 : i32
    return %arg0, %c0_i32, %c0_i32_0 : i32, i32, i32
  }
  func.func @transform_4(%arg0: i32) -> (i32, i32, i32) {
    %c0_i32 = arith.constant 0 : i32
    %c0_i32_0 = arith.constant 0 : i32
    %c0_i32_1 = arith.constant 0 : i32
    return %arg0, %c0_i32, %c0_i32_0 : i32, i32, i32
  }
}

module attributes {stable_mosaic.version = 11 : i64} {
  func.func @_conformer_block_kernel(%arg0: i32, %arg1: memref<1x8x64xbf16, #tpu.memory_space<vmem>>, %arg2: memref<1x1x1xi32, #tpu.memory_space<vmem>>, %arg3: memref<1x64xf32, #tpu.memory_space<vmem>>, %arg4: memref<1x64xf32, #tpu.memory_space<vmem>>, %arg5: memref<64x128xbf16, #tpu.memory_space<vmem>>, %arg6: memref<1x128xf32, #tpu.memory_space<vmem>>, %arg7: memref<128x64xbf16, #tpu.memory_space<vmem>>, %arg8: memref<1x64xf32, #tpu.memory_space<vmem>>, %arg9: memref<1x64xf32, #tpu.memory_space<vmem>>, %arg10: memref<1x64xf32, #tpu.memory_space<vmem>>, %arg11: memref<64x64xbf16, #tpu.memory_space<vmem>>, %arg12: memref<1x64xf32, #tpu.memory_space<vmem>>, %arg13: memref<64x64xbf16, #tpu.memory_space<vmem>>, %arg14: memref<1x64xf32, #tpu.memory_space<vmem>>, %arg15: memref<7x64xf32, #tpu.memory_space<vmem>>, %arg16: memref<1x64xf32, #tpu.memory_space<vmem>>, %arg17: memref<1x64xf32, #tpu.memory_space<vmem>>, %arg18: memref<1x64xf32, #tpu.memory_space<vmem>>, %arg19: memref<64x64xbf16, #tpu.memory_space<vmem>>, %arg20: memref<1x64xf32, #tpu.memory_space<vmem>>, %arg21: memref<1x64xf32, #tpu.memory_space<vmem>>, %arg22: memref<1x64xf32, #tpu.memory_space<vmem>>, %arg23: memref<4x64x16xbf16, #tpu.memory_space<vmem>>, %arg24: memref<4x1x16xf32, #tpu.memory_space<vmem>>, %arg25: memref<4x64x16xbf16, #tpu.memory_space<vmem>>, %arg26: memref<4x1x16xf32, #tpu.memory_space<vmem>>, %arg27: memref<4x64x16xbf16, #tpu.memory_space<vmem>>, %arg28: memref<4x1x16xf32, #tpu.memory_space<vmem>>, %arg29: memref<4x16x64xbf16, #tpu.memory_space<vmem>>, %arg30: memref<1x64xf32, #tpu.memory_space<vmem>>, %arg31: memref<1x64xf32, #tpu.memory_space<vmem>>, %arg32: memref<1x64xf32, #tpu.memory_space<vmem>>, %arg33: memref<64x128xbf16, #tpu.memory_space<vmem>>, %arg34: memref<1x128xf32, #tpu.memory_space<vmem>>, %arg35: memref<128x64xbf16, #tpu.memory_space<vmem>>, %arg36: memref<1x64xf32, #tpu.memory_space<vmem>>, %arg37: memref<1x64xf32, #tpu.memory_space<vmem>>, %arg38: memref<1x64xf32, #tpu.memory_space<vmem>>, %arg39: memref<1x8x64xbf16, #tpu.memory_space<vmem>>, %arg40: memref<8x16xbf16, #tpu.memory_space<vmem>>, %arg41: memref<8x16xbf16, #tpu.memory_space<vmem>>, %arg42: memref<8x1xf32, #tpu.memory_space<vmem>>, %arg43: memref<8x1xf32, #tpu.memory_space<vmem>>, %arg44: memref<8x16xf32, #tpu.memory_space<vmem>>) attributes {dimension_semantics = [#tpu.dimension_semantics<parallel>], iteration_bounds = array<i64: 2>, scalar_prefetch = 0 : i64, scratch_operands = 5 : i64, tpu.core_type = #tpu.core_type<tc>, window_params = [{transform_indices = @transform_0, window_bounds = array<i64: 1, 8, 64>}, {transform_indices = @transform_1, window_bounds = array<i64: 1, 1, 1>}, {pipeline_mode = #tpu.pipeline_mode<synchronous>, transform_indices = @transform_2, window_bounds = array<i64: 1, 64>}, {pipeline_mode = #tpu.pipeline_mode<synchronous>, transform_indices = @transform_3, window_bounds = array<i64: 1, 64>}, {pipeline_mode = #tpu.pipeline_mode<synchronous>, transform_indices = @transform_4, window_bounds = array<i64: 64, 128>}, {pipeline_mode = #tpu.pipeline_mode<synchronous>, transform_indices = @transform_5, window_bounds = array<i64: 1, 128>}, {pipeline_mode = #tpu.pipeline_mode<synchronous>, transform_indices = @transform_6, window_bounds = array<i64: 128, 64>}, {pipeline_mode = #tpu.pipeline_mode<synchronous>, transform_indices = @transform_7, window_bounds = array<i64: 1, 64>}, {pipeline_mode = #tpu.pipeline_mode<synchronous>, transform_indices = @transform_8, window_bounds = array<i64: 1, 64>}, {pipeline_mode = #tpu.pipeline_mode<synchronous>, transform_indices = @transform_9, window_bounds = array<i64: 1, 64>}, {pipeline_mode = #tpu.pipeline_mode<synchronous>, transform_indices = @transform_10, window_bounds = array<i64: 64, 64>}, {pipeline_mode = #tpu.pipeline_mode<synchronous>, transform_indices = @transform_11, window_bounds = array<i64: 1, 64>}, {pipeline_mode = #tpu.pipeline_mode<synchronous>, transform_indices = @transform_12, window_bounds = array<i64: 64, 64>}, {pipeline_mode = #tpu.pipeline_mode<synchronous>, transform_indices = @transform_13, window_bounds = array<i64: 1, 64>}, {pipeline_mode = #tpu.pipeline_mode<synchronous>, transform_indices = @transform_14, window_bounds = array<i64: 7, 64>}, {pipeline_mode = #tpu.pipeline_mode<synchronous>, transform_indices = @transform_15, window_bounds = array<i64: 1, 64>}, {pipeline_mode = #tpu.pipeline_mode<synchronous>, transform_indices = @transform_16, window_bounds = array<i64: 1, 64>}, {pipeline_mode = #tpu.pipeline_mode<synchronous>, transform_indices = @transform_17, window_bounds = array<i64: 1, 64>}, {pipeline_mode = #tpu.pipeline_mode<synchronous>, transform_indices = @transform_18, window_bounds = array<i64: 64, 64>}, {pipeline_mode = #tpu.pipeline_mode<synchronous>, transform_indices = @transform_19, window_bounds = array<i64: 1, 64>}, {pipeline_mode = #tpu.pipeline_mode<synchronous>, transform_indices = @transform_20, window_bounds = array<i64: 1, 64>}, {pipeline_mode = #tpu.pipeline_mode<synchronous>, transform_indices = @transform_21, window_bounds = array<i64: 1, 64>}, {pipeline_mode = #tpu.pipeline_mode<synchronous>, transform_indices = @transform_22, window_bounds = array<i64: 4, 64, 16>}, {pipeline_mode = #tpu.pipeline_mode<synchronous>, transform_indices = @transform_23, window_bounds = array<i64: 4, 1, 16>}, {pipeline_mode = #tpu.pipeline_mode<synchronous>, transform_indices = @transform_24, window_bounds = array<i64: 4, 64, 16>}, {pipeline_mode = #tpu.pipeline_mode<synchronous>, transform_indices = @transform_25, window_bounds = array<i64: 4, 1, 16>}, {pipeline_mode = #tpu.pipeline_mode<synchronous>, transform_indices = @transform_26, window_bounds = array<i64: 4, 64, 16>}, {pipeline_mode = #tpu.pipeline_mode<synchronous>, transform_indices = @transform_27, window_bounds = array<i64: 4, 1, 16>}, {pipeline_mode = #tpu.pipeline_mode<synchronous>, transform_indices = @transform_28, window_bounds = array<i64: 4, 16, 64>}, {pipeline_mode = #tpu.pipeline_mode<synchronous>, transform_indices = @transform_29, window_bounds = array<i64: 1, 64>}, {pipeline_mode = #tpu.pipeline_mode<synchronous>, transform_indices = @transform_30, window_bounds = array<i64: 1, 64>}, {pipeline_mode = #tpu.pipeline_mode<synchronous>, transform_indices = @transform_31, window_bounds = array<i64: 1, 64>}, {pipeline_mode = #tpu.pipeline_mode<synchronous>, transform_indices = @transform_32, window_bounds = array<i64: 64, 128>}, {pipeline_mode = #tpu.pipeline_mode<synchronous>, transform_indices = @transform_33, window_bounds = array<i64: 1, 128>}, {pipeline_mode = #tpu.pipeline_mode<synchronous>, transform_indices = @transform_34, window_bounds = array<i64: 128, 64>}, {pipeline_mode = #tpu.pipeline_mode<synchronous>, transform_indices = @transform_35, window_bounds = array<i64: 1, 64>}, {pipeline_mode = #tpu.pipeline_mode<synchronous>, transform_indices = @transform_36, window_bounds = array<i64: 1, 64>}, {pipeline_mode = #tpu.pipeline_mode<synchronous>, transform_indices = @transform_37, window_bounds = array<i64: 1, 64>}, {transform_indices = @transform_38, window_bounds = array<i64: 1, 8, 64>}]} {
    %c0 = arith.constant 0 : index
    %c0_0 = arith.constant 0 : index
    %c0_1 = arith.constant 0 : index
    %0 = vector.load %arg1[%c0, %c0_0, %c0_1] : memref<1x8x64xbf16, #tpu.memory_space<vmem>>, vector<1x8x64xbf16>
    %1 = vector.shape_cast %0 : vector<1x8x64xbf16> to vector<8x64xbf16>
    %2 = arith.extf %1 : vector<8x64xbf16> to vector<8x64xf32>
    %cst = arith.constant dense<0.000000e+00> : vector<8xf32>
    %3 = vector.multi_reduction <add>, %2, %cst [1] : vector<8x64xf32> to vector<8xf32>
    %4 = vector.shape_cast %3 : vector<8xf32> to vector<8x1xf32>
    %cst_2 = arith.constant 6.400000e+01 : f32
    %5 = vector.broadcast %cst_2 : f32 to vector<8x1xf32>
    %6 = arith.divf %4, %5 : vector<8x1xf32>
    %7 = vector.broadcast %6 : vector<8x1xf32> to vector<8x64xf32>
    %8 = arith.subf %2, %7 : vector<8x64xf32>
    %9 = arith.mulf %8, %8 : vector<8x64xf32>
    %cst_3 = arith.constant dense<0.000000e+00> : vector<8xf32>
    %10 = vector.multi_reduction <add>, %9, %cst_3 [1] : vector<8x64xf32> to vector<8xf32>
    %11 = vector.shape_cast %10 : vector<8xf32> to vector<8x1xf32>
    %cst_4 = arith.constant 6.400000e+01 : f32
    %12 = vector.broadcast %cst_4 : f32 to vector<8x1xf32>
    %13 = arith.divf %11, %12 : vector<8x1xf32>
    %cst_5 = arith.constant 9.99999974E-6 : f32
    %14 = vector.broadcast %cst_5 : f32 to vector<8x1xf32>
    %15 = arith.addf %13, %14 : vector<8x1xf32>
    %16 = math.rsqrt %15 : vector<8x1xf32>
    %17 = vector.broadcast %16 : vector<8x1xf32> to vector<8x64xf32>
    %18 = arith.mulf %8, %17 : vector<8x64xf32>
    %c0_6 = arith.constant 0 : index
    %c0_7 = arith.constant 0 : index
    %19 = vector.load %arg3[%c0_6, %c0_7] : memref<1x64xf32, #tpu.memory_space<vmem>>, vector<1x64xf32>
    %20 = vector.broadcast %19 : vector<1x64xf32> to vector<8x64xf32>
    %21 = arith.mulf %18, %20 : vector<8x64xf32>
    %c0_8 = arith.constant 0 : index
    %c0_9 = arith.constant 0 : index
    %22 = vector.load %arg4[%c0_8, %c0_9] : memref<1x64xf32, #tpu.memory_space<vmem>>, vector<1x64xf32>
    %23 = vector.broadcast %22 : vector<1x64xf32> to vector<8x64xf32>
    %24 = arith.addf %21, %23 : vector<8x64xf32>
    %25 = arith.truncf %24 : vector<8x64xf32> to vector<8x64xbf16>
    %c0_10 = arith.constant 0 : index
    %c0_11 = arith.constant 0 : index
    %26 = vector.load %arg5[%c0_10, %c0_11] : memref<64x128xbf16, #tpu.memory_space<vmem>>, vector<64x128xbf16>
    %cst_12 = arith.constant dense<0.000000e+00> : vector<8x128xf32>
    %27 = tpu.matmul %25, %26, %cst_12 {dimension_numbers = #tpu.dot_dimension_numbers<[1], [0], [0], [1], [0, 0, 1, 1], [], []>} : vector<8x64xbf16>, vector<64x128xbf16>, vector<8x128xf32> -> vector<8x128xf32>
    %c0_13 = arith.constant 0 : index
    %c0_14 = arith.constant 0 : index
    %28 = vector.load %arg6[%c0_13, %c0_14] : memref<1x128xf32, #tpu.memory_space<vmem>>, vector<1x128xf32>
    %29 = vector.broadcast %28 : vector<1x128xf32> to vector<8x128xf32>
    %30 = arith.addf %27, %29 : vector<8x128xf32>
    %31 = arith.negf %30 : vector<8x128xf32>
    %32 = math.exp %31 : vector<8x128xf32>
    %cst_15 = arith.constant 1.000000e+00 : f32
    %33 = vector.broadcast %cst_15 : f32 to vector<8x128xf32>
    %34 = arith.addf %33, %32 : vector<8x128xf32>
    %35 = arith.divf %33, %34 : vector<8x128xf32>
    %36 = arith.mulf %30, %35 : vector<8x128xf32>
    %37 = arith.truncf %36 : vector<8x128xf32> to vector<8x128xbf16>
    %c0_16 = arith.constant 0 : index
    %c0_17 = arith.constant 0 : index
    %38 = vector.load %arg7[%c0_16, %c0_17] : memref<128x64xbf16, #tpu.memory_space<vmem>>, vector<128x64xbf16>
    %cst_18 = arith.constant dense<0.000000e+00> : vector<8x64xf32>
    %39 = tpu.matmul %37, %38, %cst_18 {dimension_numbers = #tpu.dot_dimension_numbers<[1], [0], [0], [1], [0, 0, 1, 1], [], []>} : vector<8x128xbf16>, vector<128x64xbf16>, vector<8x64xf32> -> vector<8x64xf32>
    %c0_19 = arith.constant 0 : index
    %c0_20 = arith.constant 0 : index
    %40 = vector.load %arg8[%c0_19, %c0_20] : memref<1x64xf32, #tpu.memory_space<vmem>>, vector<1x64xf32>
    %41 = vector.broadcast %40 : vector<1x64xf32> to vector<8x64xf32>
    %42 = arith.addf %39, %41 : vector<8x64xf32>
    %cst_21 = arith.constant 5.000000e-01 : f32
    %43 = vector.broadcast %cst_21 : f32 to vector<8x64xf32>
    %44 = arith.mulf %43, %42 : vector<8x64xf32>
    %45 = arith.addf %44, %2 : vector<8x64xf32>
    %cst_22 = arith.constant dense<0.000000e+00> : vector<8xf32>
    %46 = vector.multi_reduction <add>, %45, %cst_22 [1] : vector<8x64xf32> to vector<8xf32>
    %47 = vector.shape_cast %46 : vector<8xf32> to vector<8x1xf32>
    %cst_23 = arith.constant 6.400000e+01 : f32
    %48 = vector.broadcast %cst_23 : f32 to vector<8x1xf32>
    %49 = arith.divf %47, %48 : vector<8x1xf32>
    %50 = vector.broadcast %49 : vector<8x1xf32> to vector<8x64xf32>
    %51 = arith.subf %45, %50 : vector<8x64xf32>
    %52 = arith.mulf %51, %51 : vector<8x64xf32>
    %cst_24 = arith.constant dense<0.000000e+00> : vector<8xf32>
    %53 = vector.multi_reduction <add>, %52, %cst_24 [1] : vector<8x64xf32> to vector<8xf32>
    %54 = vector.shape_cast %53 : vector<8xf32> to vector<8x1xf32>
    %cst_25 = arith.constant 6.400000e+01 : f32
    %55 = vector.broadcast %cst_25 : f32 to vector<8x1xf32>
    %56 = arith.divf %54, %55 : vector<8x1xf32>
    %cst_26 = arith.constant 9.99999974E-6 : f32
    %57 = vector.broadcast %cst_26 : f32 to vector<8x1xf32>
    %58 = arith.addf %56, %57 : vector<8x1xf32>
    %59 = math.rsqrt %58 : vector<8x1xf32>
    %60 = vector.broadcast %59 : vector<8x1xf32> to vector<8x64xf32>
    %61 = arith.mulf %51, %60 : vector<8x64xf32>
    %c0_27 = arith.constant 0 : index
    %c0_28 = arith.constant 0 : index
    %62 = vector.load %arg9[%c0_27, %c0_28] : memref<1x64xf32, #tpu.memory_space<vmem>>, vector<1x64xf32>
    %63 = vector.broadcast %62 : vector<1x64xf32> to vector<8x64xf32>
    %64 = arith.mulf %61, %63 : vector<8x64xf32>
    %c0_29 = arith.constant 0 : index
    %c0_30 = arith.constant 0 : index
    %65 = vector.load %arg10[%c0_29, %c0_30] : memref<1x64xf32, #tpu.memory_space<vmem>>, vector<1x64xf32>
    %66 = vector.broadcast %65 : vector<1x64xf32> to vector<8x64xf32>
    %67 = arith.addf %64, %66 : vector<8x64xf32>
    %68 = arith.truncf %67 : vector<8x64xf32> to vector<8x64xbf16>
    %c0_31 = arith.constant 0 : index
    %c0_32 = arith.constant 0 : index
    %69 = vector.load %arg11[%c0_31, %c0_32] : memref<64x64xbf16, #tpu.memory_space<vmem>>, vector<64x64xbf16>
    %cst_33 = arith.constant dense<0.000000e+00> : vector<8x64xf32>
    %70 = tpu.matmul %68, %69, %cst_33 {dimension_numbers = #tpu.dot_dimension_numbers<[1], [0], [0], [1], [0, 0, 1, 1], [], []>} : vector<8x64xbf16>, vector<64x64xbf16>, vector<8x64xf32> -> vector<8x64xf32>
    %c0_34 = arith.constant 0 : index
    %c0_35 = arith.constant 0 : index
    %71 = vector.load %arg12[%c0_34, %c0_35] : memref<1x64xf32, #tpu.memory_space<vmem>>, vector<1x64xf32>
    %72 = vector.broadcast %71 : vector<1x64xf32> to vector<8x64xf32>
    %73 = arith.addf %70, %72 : vector<8x64xf32>
    %c0_36 = arith.constant 0 : index
    %c0_37 = arith.constant 0 : index
    %74 = vector.load %arg13[%c0_36, %c0_37] : memref<64x64xbf16, #tpu.memory_space<vmem>>, vector<64x64xbf16>
    %cst_38 = arith.constant dense<0.000000e+00> : vector<8x64xf32>
    %75 = tpu.matmul %68, %74, %cst_38 {dimension_numbers = #tpu.dot_dimension_numbers<[1], [0], [0], [1], [0, 0, 1, 1], [], []>} : vector<8x64xbf16>, vector<64x64xbf16>, vector<8x64xf32> -> vector<8x64xf32>
    %c0_39 = arith.constant 0 : index
    %c0_40 = arith.constant 0 : index
    %76 = vector.load %arg14[%c0_39, %c0_40] : memref<1x64xf32, #tpu.memory_space<vmem>>, vector<1x64xf32>
    %77 = vector.broadcast %76 : vector<1x64xf32> to vector<8x64xf32>
    %78 = arith.addf %75, %77 : vector<8x64xf32>
    %79 = arith.negf %78 : vector<8x64xf32>
    %80 = math.exp %79 : vector<8x64xf32>
    %cst_41 = arith.constant 1.000000e+00 : f32
    %81 = vector.broadcast %cst_41 : f32 to vector<8x64xf32>
    %82 = arith.addf %81, %80 : vector<8x64xf32>
    %83 = arith.divf %81, %82 : vector<8x64xf32>
    %84 = arith.mulf %73, %83 : vector<8x64xf32>
    %c0_42 = arith.constant 0 : index
    %c0_43 = arith.constant 0 : index
    %85 = vector.load %arg15[%c0_42, %c0_43] : memref<7x64xf32, #tpu.memory_space<vmem>>, vector<7x64xf32>
    %86 = vector.extract_strided_slice %85 {offsets = [3, 0], sizes = [1, 64], strides = [1, 1]} : vector<7x64xf32> to vector<1x64xf32>
    %87 = vector.broadcast %86 : vector<1x64xf32> to vector<8x64xf32>
    %88 = arith.mulf %84, %87 : vector<8x64xf32>
    %cst_44 = arith.constant 0.000000e+00 : f32
    %89 = vector.broadcast %cst_44 : f32 to vector<3x64xf32>
    %90 = vector.extract_strided_slice %84 {offsets = [0, 0], sizes = [5, 64], strides = [1, 1]} : vector<8x64xf32> to vector<5x64xf32>
    %91 = tpu.concatenate %89, %90 in 0 : vector<3x64xf32>, vector<5x64xf32> -> vector<8x64xf32>
    %92 = vector.extract_strided_slice %85 {offsets = [0, 0], sizes = [1, 64], strides = [1, 1]} : vector<7x64xf32> to vector<1x64xf32>
    %93 = vector.broadcast %92 : vector<1x64xf32> to vector<8x64xf32>
    %94 = arith.mulf %91, %93 : vector<8x64xf32>
    %95 = arith.addf %88, %94 : vector<8x64xf32>
    %cst_45 = arith.constant 0.000000e+00 : f32
    %96 = vector.broadcast %cst_45 : f32 to vector<2x64xf32>
    %97 = vector.extract_strided_slice %84 {offsets = [0, 0], sizes = [6, 64], strides = [1, 1]} : vector<8x64xf32> to vector<6x64xf32>
    %98 = tpu.concatenate %96, %97 in 0 : vector<2x64xf32>, vector<6x64xf32> -> vector<8x64xf32>
    %99 = vector.extract_strided_slice %85 {offsets = [1, 0], sizes = [1, 64], strides = [1, 1]} : vector<7x64xf32> to vector<1x64xf32>
    %100 = vector.broadcast %99 : vector<1x64xf32> to vector<8x64xf32>
    %101 = arith.mulf %98, %100 : vector<8x64xf32>
    %102 = arith.addf %95, %101 : vector<8x64xf32>
    %cst_46 = arith.constant 0.000000e+00 : f32
    %103 = vector.broadcast %cst_46 : f32 to vector<1x64xf32>
    %104 = vector.extract_strided_slice %84 {offsets = [0, 0], sizes = [7, 64], strides = [1, 1]} : vector<8x64xf32> to vector<7x64xf32>
    %105 = tpu.concatenate %103, %104 in 0 : vector<1x64xf32>, vector<7x64xf32> -> vector<8x64xf32>
    %106 = vector.extract_strided_slice %85 {offsets = [2, 0], sizes = [1, 64], strides = [1, 1]} : vector<7x64xf32> to vector<1x64xf32>
    %107 = vector.broadcast %106 : vector<1x64xf32> to vector<8x64xf32>
    %108 = arith.mulf %105, %107 : vector<8x64xf32>
    %109 = arith.addf %102, %108 : vector<8x64xf32>
    %cst_47 = arith.constant 0.000000e+00 : f32
    %110 = vector.broadcast %cst_47 : f32 to vector<1x64xf32>
    %111 = vector.extract_strided_slice %84 {offsets = [1, 0], sizes = [7, 64], strides = [1, 1]} : vector<8x64xf32> to vector<7x64xf32>
    %112 = tpu.concatenate %111, %110 in 0 : vector<7x64xf32>, vector<1x64xf32> -> vector<8x64xf32>
    %113 = vector.extract_strided_slice %85 {offsets = [4, 0], sizes = [1, 64], strides = [1, 1]} : vector<7x64xf32> to vector<1x64xf32>
    %114 = vector.broadcast %113 : vector<1x64xf32> to vector<8x64xf32>
    %115 = arith.mulf %112, %114 : vector<8x64xf32>
    %116 = arith.addf %109, %115 : vector<8x64xf32>
    %cst_48 = arith.constant 0.000000e+00 : f32
    %117 = vector.broadcast %cst_48 : f32 to vector<2x64xf32>
    %118 = vector.extract_strided_slice %84 {offsets = [2, 0], sizes = [6, 64], strides = [1, 1]} : vector<8x64xf32> to vector<6x64xf32>
    %119 = tpu.concatenate %118, %117 in 0 : vector<6x64xf32>, vector<2x64xf32> -> vector<8x64xf32>
    %120 = vector.extract_strided_slice %85 {offsets = [5, 0], sizes = [1, 64], strides = [1, 1]} : vector<7x64xf32> to vector<1x64xf32>
    %121 = vector.broadcast %120 : vector<1x64xf32> to vector<8x64xf32>
    %122 = arith.mulf %119, %121 : vector<8x64xf32>
    %123 = arith.addf %116, %122 : vector<8x64xf32>
    %cst_49 = arith.constant 0.000000e+00 : f32
    %124 = vector.broadcast %cst_49 : f32 to vector<3x64xf32>
    %125 = vector.extract_strided_slice %84 {offsets = [3, 0], sizes = [5, 64], strides = [1, 1]} : vector<8x64xf32> to vector<5x64xf32>
    %126 = tpu.concatenate %125, %124 in 0 : vector<5x64xf32>, vector<3x64xf32> -> vector<8x64xf32>
    %127 = vector.extract_strided_slice %85 {offsets = [6, 0], sizes = [1, 64], strides = [1, 1]} : vector<7x64xf32> to vector<1x64xf32>
    %128 = vector.broadcast %127 : vector<1x64xf32> to vector<8x64xf32>
    %129 = arith.mulf %126, %128 : vector<8x64xf32>
    %130 = arith.addf %123, %129 : vector<8x64xf32>
    %c0_50 = arith.constant 0 : index
    %c0_51 = arith.constant 0 : index
    %131 = vector.load %arg16[%c0_50, %c0_51] : memref<1x64xf32, #tpu.memory_space<vmem>>, vector<1x64xf32>
    %132 = vector.broadcast %131 : vector<1x64xf32> to vector<8x64xf32>
    %133 = arith.addf %130, %132 : vector<8x64xf32>
    %c0_52 = arith.constant 0 : index
    %c0_53 = arith.constant 0 : index
    %134 = vector.load %arg17[%c0_52, %c0_53] : memref<1x64xf32, #tpu.memory_space<vmem>>, vector<1x64xf32>
    %135 = vector.broadcast %134 : vector<1x64xf32> to vector<8x64xf32>
    %136 = arith.mulf %133, %135 : vector<8x64xf32>
    %c0_54 = arith.constant 0 : index
    %c0_55 = arith.constant 0 : index
    %137 = vector.load %arg18[%c0_54, %c0_55] : memref<1x64xf32, #tpu.memory_space<vmem>>, vector<1x64xf32>
    %138 = vector.broadcast %137 : vector<1x64xf32> to vector<8x64xf32>
    %139 = arith.addf %136, %138 : vector<8x64xf32>
    %140 = arith.negf %139 : vector<8x64xf32>
    %141 = math.exp %140 : vector<8x64xf32>
    %cst_56 = arith.constant 1.000000e+00 : f32
    %142 = vector.broadcast %cst_56 : f32 to vector<8x64xf32>
    %143 = arith.addf %142, %141 : vector<8x64xf32>
    %144 = arith.divf %142, %143 : vector<8x64xf32>
    %145 = arith.mulf %139, %144 : vector<8x64xf32>
    %146 = arith.truncf %145 : vector<8x64xf32> to vector<8x64xbf16>
    %c0_57 = arith.constant 0 : index
    %c0_58 = arith.constant 0 : index
    %147 = vector.load %arg19[%c0_57, %c0_58] : memref<64x64xbf16, #tpu.memory_space<vmem>>, vector<64x64xbf16>
    %cst_59 = arith.constant dense<0.000000e+00> : vector<8x64xf32>
    %148 = tpu.matmul %146, %147, %cst_59 {dimension_numbers = #tpu.dot_dimension_numbers<[1], [0], [0], [1], [0, 0, 1, 1], [], []>} : vector<8x64xbf16>, vector<64x64xbf16>, vector<8x64xf32> -> vector<8x64xf32>
    %c0_60 = arith.constant 0 : index
    %c0_61 = arith.constant 0 : index
    %149 = vector.load %arg20[%c0_60, %c0_61] : memref<1x64xf32, #tpu.memory_space<vmem>>, vector<1x64xf32>
    %150 = vector.broadcast %149 : vector<1x64xf32> to vector<8x64xf32>
    %151 = arith.addf %148, %150 : vector<8x64xf32>
    %152 = arith.addf %151, %45 : vector<8x64xf32>
    %cst_62 = arith.constant dense<0.000000e+00> : vector<8xf32>
    %153 = vector.multi_reduction <add>, %152, %cst_62 [1] : vector<8x64xf32> to vector<8xf32>
    %154 = vector.shape_cast %153 : vector<8xf32> to vector<8x1xf32>
    %cst_63 = arith.constant 6.400000e+01 : f32
    %155 = vector.broadcast %cst_63 : f32 to vector<8x1xf32>
    %156 = arith.divf %154, %155 : vector<8x1xf32>
    %157 = vector.broadcast %156 : vector<8x1xf32> to vector<8x64xf32>
    %158 = arith.subf %152, %157 : vector<8x64xf32>
    %159 = arith.mulf %158, %158 : vector<8x64xf32>
    %cst_64 = arith.constant dense<0.000000e+00> : vector<8xf32>
    %160 = vector.multi_reduction <add>, %159, %cst_64 [1] : vector<8x64xf32> to vector<8xf32>
    %161 = vector.shape_cast %160 : vector<8xf32> to vector<8x1xf32>
    %cst_65 = arith.constant 6.400000e+01 : f32
    %162 = vector.broadcast %cst_65 : f32 to vector<8x1xf32>
    %163 = arith.divf %161, %162 : vector<8x1xf32>
    %cst_66 = arith.constant 9.99999974E-6 : f32
    %164 = vector.broadcast %cst_66 : f32 to vector<8x1xf32>
    %165 = arith.addf %163, %164 : vector<8x1xf32>
    %166 = math.rsqrt %165 : vector<8x1xf32>
    %167 = vector.broadcast %166 : vector<8x1xf32> to vector<8x64xf32>
    %168 = arith.mulf %158, %167 : vector<8x64xf32>
    %c0_67 = arith.constant 0 : index
    %c0_68 = arith.constant 0 : index
    %169 = vector.load %arg21[%c0_67, %c0_68] : memref<1x64xf32, #tpu.memory_space<vmem>>, vector<1x64xf32>
    %170 = vector.broadcast %169 : vector<1x64xf32> to vector<8x64xf32>
    %171 = arith.mulf %168, %170 : vector<8x64xf32>
    %c0_69 = arith.constant 0 : index
    %c0_70 = arith.constant 0 : index
    %172 = vector.load %arg22[%c0_69, %c0_70] : memref<1x64xf32, #tpu.memory_space<vmem>>, vector<1x64xf32>
    %173 = vector.broadcast %172 : vector<1x64xf32> to vector<8x64xf32>
    %174 = arith.addf %171, %173 : vector<8x64xf32>
    %175 = arith.truncf %174 : vector<8x64xf32> to vector<8x64xbf16>
    %c0_71 = arith.constant 0 : index
    %c0_72 = arith.constant 0 : index
    %c0_73 = arith.constant 0 : index
    %176 = vector.load %arg2[%c0_71, %c0_72, %c0_73] : memref<1x1x1xi32, #tpu.memory_space<vmem>>, vector<1x1x1xi32>
    %177 = vector.shape_cast %176 : vector<1x1x1xi32> to vector<1x1xi32>
    %cst_74 = arith.constant 0.000000e+00 : f32
    %178 = vector.broadcast %cst_74 : f32 to vector<8x64xf32>
    %c0_75 = arith.constant 0 : index
    %c0_76 = arith.constant 0 : index
    %c0_77 = arith.constant 0 : index
    %179 = vector.load %arg23[%c0_75, %c0_76, %c0_77] : memref<4x64x16xbf16, #tpu.memory_space<vmem>>, vector<1x64x16xbf16>
    %180 = vector.shape_cast %179 : vector<1x64x16xbf16> to vector<64x16xbf16>
    %cst_78 = arith.constant dense<0.000000e+00> : vector<8x16xf32>
    %181 = tpu.matmul %175, %180, %cst_78 {dimension_numbers = #tpu.dot_dimension_numbers<[1], [0], [0], [1], [0, 0, 1, 1], [], []>} : vector<8x64xbf16>, vector<64x16xbf16>, vector<8x16xf32> -> vector<8x16xf32>
    %c0_79 = arith.constant 0 : index
    %c0_80 = arith.constant 0 : index
    %c0_81 = arith.constant 0 : index
    %182 = vector.load %arg24[%c0_79, %c0_80, %c0_81] : memref<4x1x16xf32, #tpu.memory_space<vmem>>, vector<1x1x16xf32>
    %183 = vector.shape_cast %182 : vector<1x1x16xf32> to vector<1x16xf32>
    %184 = vector.broadcast %183 : vector<1x16xf32> to vector<8x16xf32>
    %185 = arith.addf %181, %184 : vector<8x16xf32>
    %186 = arith.truncf %185 : vector<8x16xf32> to vector<8x16xbf16>
    %c0_82 = arith.constant 0 : index
    %c0_83 = arith.constant 0 : index
    %c0_84 = arith.constant 0 : index
    %187 = vector.load %arg25[%c0_82, %c0_83, %c0_84] : memref<4x64x16xbf16, #tpu.memory_space<vmem>>, vector<1x64x16xbf16>
    %188 = vector.shape_cast %187 : vector<1x64x16xbf16> to vector<64x16xbf16>
    %cst_85 = arith.constant dense<0.000000e+00> : vector<8x16xf32>
    %189 = tpu.matmul %175, %188, %cst_85 {dimension_numbers = #tpu.dot_dimension_numbers<[1], [0], [0], [1], [0, 0, 1, 1], [], []>} : vector<8x64xbf16>, vector<64x16xbf16>, vector<8x16xf32> -> vector<8x16xf32>
    %c0_86 = arith.constant 0 : index
    %c0_87 = arith.constant 0 : index
    %c0_88 = arith.constant 0 : index
    %190 = vector.load %arg26[%c0_86, %c0_87, %c0_88] : memref<4x1x16xf32, #tpu.memory_space<vmem>>, vector<1x1x16xf32>
    %191 = vector.shape_cast %190 : vector<1x1x16xf32> to vector<1x16xf32>
    %192 = vector.broadcast %191 : vector<1x16xf32> to vector<8x16xf32>
    %193 = arith.addf %189, %192 : vector<8x16xf32>
    %c0_89 = arith.constant 0 : index
    %c0_90 = arith.constant 0 : index
    %c0_91 = arith.constant 0 : index
    %194 = vector.load %arg27[%c0_89, %c0_90, %c0_91] : memref<4x64x16xbf16, #tpu.memory_space<vmem>>, vector<1x64x16xbf16>
    %195 = vector.shape_cast %194 : vector<1x64x16xbf16> to vector<64x16xbf16>
    %cst_92 = arith.constant dense<0.000000e+00> : vector<8x16xf32>
    %196 = tpu.matmul %175, %195, %cst_92 {dimension_numbers = #tpu.dot_dimension_numbers<[1], [0], [0], [1], [0, 0, 1, 1], [], []>} : vector<8x64xbf16>, vector<64x16xbf16>, vector<8x16xf32> -> vector<8x16xf32>
    %c0_93 = arith.constant 0 : index
    %c0_94 = arith.constant 0 : index
    %c0_95 = arith.constant 0 : index
    %197 = vector.load %arg28[%c0_93, %c0_94, %c0_95] : memref<4x1x16xf32, #tpu.memory_space<vmem>>, vector<1x1x16xf32>
    %198 = vector.shape_cast %197 : vector<1x1x16xf32> to vector<1x16xf32>
    %199 = vector.broadcast %198 : vector<1x16xf32> to vector<8x16xf32>
    %200 = arith.addf %196, %199 : vector<8x16xf32>
    %201 = arith.truncf %193 : vector<8x16xf32> to vector<8x16xbf16>
    %c0_96 = arith.constant 0 : index
    %c0_97 = arith.constant 0 : index
    %202 = vector.load %arg40[%c0_96, %c0_97] : memref<8x16xbf16, #tpu.memory_space<vmem>>, vector<8x16xbf16>
    tpu.vector_store %arg40[%c0_96, %c0_97], %201 {strides = array<i32>} : memref<8x16xbf16, #tpu.memory_space<vmem>>, vector<8x16xbf16>,
    %203 = arith.truncf %200 : vector<8x16xf32> to vector<8x16xbf16>
    %c0_98 = arith.constant 0 : index
    %c0_99 = arith.constant 0 : index
    %204 = vector.load %arg41[%c0_98, %c0_99] : memref<8x16xbf16, #tpu.memory_space<vmem>>, vector<8x16xbf16>
    tpu.vector_store %arg41[%c0_98, %c0_99], %203 {strides = array<i32>} : memref<8x16xbf16, #tpu.memory_space<vmem>>, vector<8x16xbf16>,
    %cst_100 = arith.constant -1.000000e+30 : f32
    %205 = vector.broadcast %cst_100 : f32 to vector<8x1xf32>
    %c0_101 = arith.constant 0 : index
    %c0_102 = arith.constant 0 : index
    %206 = vector.load %arg42[%c0_101, %c0_102] : memref<8x1xf32, #tpu.memory_space<vmem>>, vector<8x1xf32>
    tpu.vector_store %arg42[%c0_101, %c0_102], %205 {strides = array<i32>} : memref<8x1xf32, #tpu.memory_space<vmem>>, vector<8x1xf32>,
    %cst_103 = arith.constant 0.000000e+00 : f32
    %207 = vector.broadcast %cst_103 : f32 to vector<8x1xf32>
    %c0_104 = arith.constant 0 : index
    %c0_105 = arith.constant 0 : index
    %208 = vector.load %arg43[%c0_104, %c0_105] : memref<8x1xf32, #tpu.memory_space<vmem>>, vector<8x1xf32>
    tpu.vector_store %arg43[%c0_104, %c0_105], %207 {strides = array<i32>} : memref<8x1xf32, #tpu.memory_space<vmem>>, vector<8x1xf32>,
    %cst_106 = arith.constant 0.000000e+00 : f32
    %209 = vector.broadcast %cst_106 : f32 to vector<8x16xf32>
    %c0_107 = arith.constant 0 : index
    %c0_108 = arith.constant 0 : index
    %210 = vector.load %arg44[%c0_107, %c0_108] : memref<8x16xf32, #tpu.memory_space<vmem>>, vector<8x16xf32>
    tpu.vector_store %arg44[%c0_107, %c0_108], %209 {strides = array<i32>} : memref<8x16xf32, #tpu.memory_space<vmem>>, vector<8x16xf32>,
    %c0_i32 = arith.constant 0 : i32
    %c1_i32 = arith.constant 1 : i32
    %211 = arith.muli %c0_i32, %c1_i32 : i32
    %c0_i32_109 = arith.constant 0 : i32
    %212 = arith.addi %c0_i32_109, %211 : i32
    %c8_i32 = arith.constant 8 : i32
    %213 = arith.muli %212, %c8_i32 : i32
    %214 = tpu.assume_multiple %213, 8 : i32
    %215 = arith.index_cast %214 : i32 to index
    %c0_110 = arith.constant 0 : index
    %216 = vector.load %arg40[%215, %c0_110] : memref<8x16xbf16, #tpu.memory_space<vmem>>, vector<8x16xbf16>
    %217 = arith.index_cast %214 : i32 to index
    %c0_111 = arith.constant 0 : index
    %218 = vector.load %arg41[%217, %c0_111] : memref<8x16xbf16, #tpu.memory_space<vmem>>, vector<8x16xbf16>
    %cst_112 = arith.constant dense<0.000000e+00> : vector<8x8xf32>
    %219 = tpu.matmul %186, %216, %cst_112 {dimension_numbers = #tpu.dot_dimension_numbers<[1], [1], [0], [0], [0, 0, 1, 0], [], []>} : vector<8x16xbf16>, vector<8x16xbf16>, vector<8x8xf32> -> vector<8x8xf32>
    %220 = tpu.iota {dimensions = array<i32: 1>} : vector<1x8xi32>
    %221 = vector.broadcast %214 : i32 to vector<1x8xi32>
    %222 = arith.addi %221, %220 : vector<1x8xi32>
    %223 = vector.broadcast %177 : vector<1x1xi32> to vector<1x8xi32>
    %224 = arith.cmpi slt, %222, %223 : vector<1x8xi32>
    %cst_113 = arith.constant 0.000000e+00 : f32
    %cst_114 = arith.constant -1.000000e+30 : f32
    %225 = vector.broadcast %cst_113 : f32 to vector<1x8xf32>
    %226 = vector.broadcast %cst_114 : f32 to vector<1x8xf32>
    %227 = arith.select %224, %225, %226 : vector<1x8xi1>, vector<1x8xf32>
    %228 = vector.broadcast %227 : vector<1x8xf32> to vector<8x8xf32>
    %229 = arith.addf %219, %228 : vector<8x8xf32>
    %c0_115 = arith.constant 0 : index
    %c0_116 = arith.constant 0 : index
    %230 = vector.load %arg42[%c0_115, %c0_116] : memref<8x1xf32, #tpu.memory_space<vmem>>, vector<8x1xf32>
    %cst_117 = arith.constant dense<0xFF800000> : vector<8xf32>
    %231 = vector.multi_reduction <maximumf>, %229, %cst_117 [1] : vector<8x8xf32> to vector<8xf32>
    %232 = vector.shape_cast %231 : vector<8xf32> to vector<8x1xf32>
    %233 = arith.maximumf %230, %232 : vector<8x1xf32>
    %234 = arith.subf %230, %233 : vector<8x1xf32>
    %235 = math.exp %234 : vector<8x1xf32>
    %236 = vector.broadcast %233 : vector<8x1xf32> to vector<8x8xf32>
    %237 = arith.subf %229, %236 : vector<8x8xf32>
    %238 = math.exp %237 : vector<8x8xf32>
    %c0_118 = arith.constant 0 : index
    %c0_119 = arith.constant 0 : index
    %239 = vector.load %arg43[%c0_118, %c0_119] : memref<8x1xf32, #tpu.memory_space<vmem>>, vector<8x1xf32>
    %240 = arith.mulf %235, %239 : vector<8x1xf32>
    %cst_120 = arith.constant dense<0.000000e+00> : vector<8xf32>
    %241 = vector.multi_reduction <add>, %238, %cst_120 [1] : vector<8x8xf32> to vector<8xf32>
    %242 = vector.shape_cast %241 : vector<8xf32> to vector<8x1xf32>
    %243 = arith.addf %240, %242 : vector<8x1xf32>
    %c0_121 = arith.constant 0 : index
    %c0_122 = arith.constant 0 : index
    %244 = vector.load %arg43[%c0_121, %c0_122] : memref<8x1xf32, #tpu.memory_space<vmem>>, vector<8x1xf32>
    tpu.vector_store %arg43[%c0_121, %c0_122], %243 {strides = array<i32>} : memref<8x1xf32, #tpu.memory_space<vmem>>, vector<8x1xf32>,
    %c0_123 = arith.constant 0 : index
    %c0_124 = arith.constant 0 : index
    %245 = vector.load %arg44[%c0_123, %c0_124] : memref<8x16xf32, #tpu.memory_space<vmem>>, vector<8x16xf32>
    %246 = vector.broadcast %235 : vector<8x1xf32> to vector<8x16xf32>
    %247 = arith.mulf %246, %245 : vector<8x16xf32>
    %248 = arith.truncf %238 : vector<8x8xf32> to vector<8x8xbf16>
    %cst_125 = arith.constant dense<0.000000e+00> : vector<8x16xf32>
    %249 = tpu.matmul %248, %218, %cst_125 {dimension_numbers = #tpu.dot_dimension_numbers<[1], [0], [0], [1], [0, 0, 1, 1], [], []>} : vector<8x8xbf16>, vector<8x16xbf16>, vector<8x16xf32> -> vector<8x16xf32>
    %250 = arith.addf %247, %249 : vector<8x16xf32>
    %c0_126 = arith.constant 0 : index
    %c0_127 = arith.constant 0 : index
    %251 = vector.load %arg44[%c0_126, %c0_127] : memref<8x16xf32, #tpu.memory_space<vmem>>, vector<8x16xf32>
    tpu.vector_store %arg44[%c0_126, %c0_127], %250 {strides = array<i32>} : memref<8x16xf32, #tpu.memory_space<vmem>>, vector<8x16xf32>,
    %c0_128 = arith.constant 0 : index
    %c0_129 = arith.constant 0 : index
    %252 = vector.load %arg42[%c0_128, %c0_129] : memref<8x1xf32, #tpu.memory_space<vmem>>, vector<8x1xf32>
    tpu.vector_store %arg42[%c0_128, %c0_129], %233 {strides = array<i32>} : memref<8x1xf32, #tpu.memory_space<vmem>>, vector<8x1xf32>,
    %c1_i32_130 = arith.constant 1 : i32
    %c0_131 = arith.constant 0 : index
    %c0_132 = arith.constant 0 : index
    %253 = vector.load %arg44[%c0_131, %c0_132] : memref<8x16xf32, #tpu.memory_space<vmem>>, vector<8x16xf32>
    %c0_133 = arith.constant 0 : index
    %c0_134 = arith.constant 0 : index
    %254 = vector.load %arg43[%c0_133, %c0_134] : memref<8x1xf32, #tpu.memory_space<vmem>>, vector<8x1xf32>
    %255 = vector.broadcast %254 : vector<8x1xf32> to vector<8x16xf32>
    %256 = arith.divf %253, %255 : vector<8x16xf32>
    %257 = arith.truncf %256 : vector<8x16xf32> to vector<8x16xbf16>
    %c0_135 = arith.constant 0 : index
    %c0_136 = arith.constant 0 : index
    %c0_137 = arith.constant 0 : index
    %258 = vector.load %arg29[%c0_135, %c0_136, %c0_137] : memref<4x16x64xbf16, #tpu.memory_space<vmem>>, vector<1x16x64xbf16>
    %259 = vector.shape_cast %258 : vector<1x16x64xbf16> to vector<16x64xbf16>
    %cst_138 = arith.constant dense<0.000000e+00> : vector<8x64xf32>
    %260 = tpu.matmul %257, %259, %cst_138 {dimension_numbers = #tpu.dot_dimension_numbers<[1], [0], [0], [1], [0, 0, 1, 1], [], []>} : vector<8x16xbf16>, vector<16x64xbf16>, vector<8x64xf32> -> vector<8x64xf32>
    %261 = arith.addf %178, %260 : vector<8x64xf32>
    %c1 = arith.constant 1 : index
    %c0_139 = arith.constant 0 : index
    %c0_140 = arith.constant 0 : index
    %262 = vector.load %arg23[%c1, %c0_139, %c0_140] : memref<4x64x16xbf16, #tpu.memory_space<vmem>>, vector<1x64x16xbf16>
    %263 = vector.shape_cast %262 : vector<1x64x16xbf16> to vector<64x16xbf16>
    %cst_141 = arith.constant dense<0.000000e+00> : vector<8x16xf32>
    %264 = tpu.matmul %175, %263, %cst_141 {dimension_numbers = #tpu.dot_dimension_numbers<[1], [0], [0], [1], [0, 0, 1, 1], [], []>} : vector<8x64xbf16>, vector<64x16xbf16>, vector<8x16xf32> -> vector<8x16xf32>
    %c1_142 = arith.constant 1 : index
    %c0_143 = arith.constant 0 : index
    %c0_144 = arith.constant 0 : index
    %265 = vector.load %arg24[%c1_142, %c0_143, %c0_144] : memref<4x1x16xf32, #tpu.memory_space<vmem>>, vector<1x1x16xf32>
    %266 = vector.shape_cast %265 : vector<1x1x16xf32> to vector<1x16xf32>
    %267 = vector.broadcast %266 : vector<1x16xf32> to vector<8x16xf32>
    %268 = arith.addf %264, %267 : vector<8x16xf32>
    %269 = arith.truncf %268 : vector<8x16xf32> to vector<8x16xbf16>
    %c1_145 = arith.constant 1 : index
    %c0_146 = arith.constant 0 : index
    %c0_147 = arith.constant 0 : index
    %270 = vector.load %arg25[%c1_145, %c0_146, %c0_147] : memref<4x64x16xbf16, #tpu.memory_space<vmem>>, vector<1x64x16xbf16>
    %271 = vector.shape_cast %270 : vector<1x64x16xbf16> to vector<64x16xbf16>
    %cst_148 = arith.constant dense<0.000000e+00> : vector<8x16xf32>
    %272 = tpu.matmul %175, %271, %cst_148 {dimension_numbers = #tpu.dot_dimension_numbers<[1], [0], [0], [1], [0, 0, 1, 1], [], []>} : vector<8x64xbf16>, vector<64x16xbf16>, vector<8x16xf32> -> vector<8x16xf32>
    %c1_149 = arith.constant 1 : index
    %c0_150 = arith.constant 0 : index
    %c0_151 = arith.constant 0 : index
    %273 = vector.load %arg26[%c1_149, %c0_150, %c0_151] : memref<4x1x16xf32, #tpu.memory_space<vmem>>, vector<1x1x16xf32>
    %274 = vector.shape_cast %273 : vector<1x1x16xf32> to vector<1x16xf32>
    %275 = vector.broadcast %274 : vector<1x16xf32> to vector<8x16xf32>
    %276 = arith.addf %272, %275 : vector<8x16xf32>
    %c1_152 = arith.constant 1 : index
    %c0_153 = arith.constant 0 : index
    %c0_154 = arith.constant 0 : index
    %277 = vector.load %arg27[%c1_152, %c0_153, %c0_154] : memref<4x64x16xbf16, #tpu.memory_space<vmem>>, vector<1x64x16xbf16>
    %278 = vector.shape_cast %277 : vector<1x64x16xbf16> to vector<64x16xbf16>
    %cst_155 = arith.constant dense<0.000000e+00> : vector<8x16xf32>
    %279 = tpu.matmul %175, %278, %cst_155 {dimension_numbers = #tpu.dot_dimension_numbers<[1], [0], [0], [1], [0, 0, 1, 1], [], []>} : vector<8x64xbf16>, vector<64x16xbf16>, vector<8x16xf32> -> vector<8x16xf32>
    %c1_156 = arith.constant 1 : index
    %c0_157 = arith.constant 0 : index
    %c0_158 = arith.constant 0 : index
    %280 = vector.load %arg28[%c1_156, %c0_157, %c0_158] : memref<4x1x16xf32, #tpu.memory_space<vmem>>, vector<1x1x16xf32>
    %281 = vector.shape_cast %280 : vector<1x1x16xf32> to vector<1x16xf32>
    %282 = vector.broadcast %281 : vector<1x16xf32> to vector<8x16xf32>
    %283 = arith.addf %279, %282 : vector<8x16xf32>
    %284 = arith.truncf %276 : vector<8x16xf32> to vector<8x16xbf16>
    %c0_159 = arith.constant 0 : index
    %c0_160 = arith.constant 0 : index
    %285 = vector.load %arg40[%c0_159, %c0_160] : memref<8x16xbf16, #tpu.memory_space<vmem>>, vector<8x16xbf16>
    tpu.vector_store %arg40[%c0_159, %c0_160], %284 {strides = array<i32>} : memref<8x16xbf16, #tpu.memory_space<vmem>>, vector<8x16xbf16>,
    %286 = arith.truncf %283 : vector<8x16xf32> to vector<8x16xbf16>
    %c0_161 = arith.constant 0 : index
    %c0_162 = arith.constant 0 : index
    %287 = vector.load %arg41[%c0_161, %c0_162] : memref<8x16xbf16, #tpu.memory_space<vmem>>, vector<8x16xbf16>
    tpu.vector_store %arg41[%c0_161, %c0_162], %286 {strides = array<i32>} : memref<8x16xbf16, #tpu.memory_space<vmem>>, vector<8x16xbf16>,
    %cst_163 = arith.constant -1.000000e+30 : f32
    %288 = vector.broadcast %cst_163 : f32 to vector<8x1xf32>
    %c0_164 = arith.constant 0 : index
    %c0_165 = arith.constant 0 : index
    %289 = vector.load %arg42[%c0_164, %c0_165] : memref<8x1xf32, #tpu.memory_space<vmem>>, vector<8x1xf32>
    tpu.vector_store %arg42[%c0_164, %c0_165], %288 {strides = array<i32>} : memref<8x1xf32, #tpu.memory_space<vmem>>, vector<8x1xf32>,
    %cst_166 = arith.constant 0.000000e+00 : f32
    %290 = vector.broadcast %cst_166 : f32 to vector<8x1xf32>
    %c0_167 = arith.constant 0 : index
    %c0_168 = arith.constant 0 : index
    %291 = vector.load %arg43[%c0_167, %c0_168] : memref<8x1xf32, #tpu.memory_space<vmem>>, vector<8x1xf32>
    tpu.vector_store %arg43[%c0_167, %c0_168], %290 {strides = array<i32>} : memref<8x1xf32, #tpu.memory_space<vmem>>, vector<8x1xf32>,
    %cst_169 = arith.constant 0.000000e+00 : f32
    %292 = vector.broadcast %cst_169 : f32 to vector<8x16xf32>
    %c0_170 = arith.constant 0 : index
    %c0_171 = arith.constant 0 : index
    %293 = vector.load %arg44[%c0_170, %c0_171] : memref<8x16xf32, #tpu.memory_space<vmem>>, vector<8x16xf32>
    tpu.vector_store %arg44[%c0_170, %c0_171], %292 {strides = array<i32>} : memref<8x16xf32, #tpu.memory_space<vmem>>, vector<8x16xf32>,
    %c0_i32_172 = arith.constant 0 : i32
    %c1_i32_173 = arith.constant 1 : i32
    %294 = arith.muli %c0_i32_172, %c1_i32_173 : i32
    %c0_i32_174 = arith.constant 0 : i32
    %295 = arith.addi %c0_i32_174, %294 : i32
    %c8_i32_175 = arith.constant 8 : i32
    %296 = arith.muli %295, %c8_i32_175 : i32
    %297 = tpu.assume_multiple %296, 8 : i32
    %298 = arith.index_cast %297 : i32 to index
    %c0_176 = arith.constant 0 : index
    %299 = vector.load %arg40[%298, %c0_176] : memref<8x16xbf16, #tpu.memory_space<vmem>>, vector<8x16xbf16>
    %300 = arith.index_cast %297 : i32 to index
    %c0_177 = arith.constant 0 : index
    %301 = vector.load %arg41[%300, %c0_177] : memref<8x16xbf16, #tpu.memory_space<vmem>>, vector<8x16xbf16>
    %cst_178 = arith.constant dense<0.000000e+00> : vector<8x8xf32>
    %302 = tpu.matmul %269, %299, %cst_178 {dimension_numbers = #tpu.dot_dimension_numbers<[1], [1], [0], [0], [0, 0, 1, 0], [], []>} : vector<8x16xbf16>, vector<8x16xbf16>, vector<8x8xf32> -> vector<8x8xf32>
    %303 = tpu.iota {dimensions = array<i32: 1>} : vector<1x8xi32>
    %304 = vector.broadcast %297 : i32 to vector<1x8xi32>
    %305 = arith.addi %304, %303 : vector<1x8xi32>
    %306 = vector.broadcast %177 : vector<1x1xi32> to vector<1x8xi32>
    %307 = arith.cmpi slt, %305, %306 : vector<1x8xi32>
    %cst_179 = arith.constant 0.000000e+00 : f32
    %cst_180 = arith.constant -1.000000e+30 : f32
    %308 = vector.broadcast %cst_179 : f32 to vector<1x8xf32>
    %309 = vector.broadcast %cst_180 : f32 to vector<1x8xf32>
    %310 = arith.select %307, %308, %309 : vector<1x8xi1>, vector<1x8xf32>
    %311 = vector.broadcast %310 : vector<1x8xf32> to vector<8x8xf32>
    %312 = arith.addf %302, %311 : vector<8x8xf32>
    %c0_181 = arith.constant 0 : index
    %c0_182 = arith.constant 0 : index
    %313 = vector.load %arg42[%c0_181, %c0_182] : memref<8x1xf32, #tpu.memory_space<vmem>>, vector<8x1xf32>
    %cst_183 = arith.constant dense<0xFF800000> : vector<8xf32>
    %314 = vector.multi_reduction <maximumf>, %312, %cst_183 [1] : vector<8x8xf32> to vector<8xf32>
    %315 = vector.shape_cast %314 : vector<8xf32> to vector<8x1xf32>
    %316 = arith.maximumf %313, %315 : vector<8x1xf32>
    %317 = arith.subf %313, %316 : vector<8x1xf32>
    %318 = math.exp %317 : vector<8x1xf32>
    %319 = vector.broadcast %316 : vector<8x1xf32> to vector<8x8xf32>
    %320 = arith.subf %312, %319 : vector<8x8xf32>
    %321 = math.exp %320 : vector<8x8xf32>
    %c0_184 = arith.constant 0 : index
    %c0_185 = arith.constant 0 : index
    %322 = vector.load %arg43[%c0_184, %c0_185] : memref<8x1xf32, #tpu.memory_space<vmem>>, vector<8x1xf32>
    %323 = arith.mulf %318, %322 : vector<8x1xf32>
    %cst_186 = arith.constant dense<0.000000e+00> : vector<8xf32>
    %324 = vector.multi_reduction <add>, %321, %cst_186 [1] : vector<8x8xf32> to vector<8xf32>
    %325 = vector.shape_cast %324 : vector<8xf32> to vector<8x1xf32>
    %326 = arith.addf %323, %325 : vector<8x1xf32>
    %c0_187 = arith.constant 0 : index
    %c0_188 = arith.constant 0 : index
    %327 = vector.load %arg43[%c0_187, %c0_188] : memref<8x1xf32, #tpu.memory_space<vmem>>, vector<8x1xf32>
    tpu.vector_store %arg43[%c0_187, %c0_188], %326 {strides = array<i32>} : memref<8x1xf32, #tpu.memory_space<vmem>>, vector<8x1xf32>,
    %c0_189 = arith.constant 0 : index
    %c0_190 = arith.constant 0 : index
    %328 = vector.load %arg44[%c0_189, %c0_190] : memref<8x16xf32, #tpu.memory_space<vmem>>, vector<8x16xf32>
    %329 = vector.broadcast %318 : vector<8x1xf32> to vector<8x16xf32>
    %330 = arith.mulf %329, %328 : vector<8x16xf32>
    %331 = arith.truncf %321 : vector<8x8xf32> to vector<8x8xbf16>
    %cst_191 = arith.constant dense<0.000000e+00> : vector<8x16xf32>
    %332 = tpu.matmul %331, %301, %cst_191 {dimension_numbers = #tpu.dot_dimension_numbers<[1], [0], [0], [1], [0, 0, 1, 1], [], []>} : vector<8x8xbf16>, vector<8x16xbf16>, vector<8x16xf32> -> vector<8x16xf32>
    %333 = arith.addf %330, %332 : vector<8x16xf32>
    %c0_192 = arith.constant 0 : index
    %c0_193 = arith.constant 0 : index
    %334 = vector.load %arg44[%c0_192, %c0_193] : memref<8x16xf32, #tpu.memory_space<vmem>>, vector<8x16xf32>
    tpu.vector_store %arg44[%c0_192, %c0_193], %333 {strides = array<i32>} : memref<8x16xf32, #tpu.memory_space<vmem>>, vector<8x16xf32>,
    %c0_194 = arith.constant 0 : index
    %c0_195 = arith.constant 0 : index
    %335 = vector.load %arg42[%c0_194, %c0_195] : memref<8x1xf32, #tpu.memory_space<vmem>>, vector<8x1xf32>
    tpu.vector_store %arg42[%c0_194, %c0_195], %316 {strides = array<i32>} : memref<8x1xf32, #tpu.memory_space<vmem>>, vector<8x1xf32>,
    %c1_i32_196 = arith.constant 1 : i32
    %c0_197 = arith.constant 0 : index
    %c0_198 = arith.constant 0 : index
    %336 = vector.load %arg44[%c0_197, %c0_198] : memref<8x16xf32, #tpu.memory_space<vmem>>, vector<8x16xf32>
    %c0_199 = arith.constant 0 : index
    %c0_200 = arith.constant 0 : index
    %337 = vector.load %arg43[%c0_199, %c0_200] : memref<8x1xf32, #tpu.memory_space<vmem>>, vector<8x1xf32>
    %338 = vector.broadcast %337 : vector<8x1xf32> to vector<8x16xf32>
    %339 = arith.divf %336, %338 : vector<8x16xf32>
    %340 = arith.truncf %339 : vector<8x16xf32> to vector<8x16xbf16>
    %c1_201 = arith.constant 1 : index
    %c0_202 = arith.constant 0 : index
    %c0_203 = arith.constant 0 : index
    %341 = vector.load %arg29[%c1_201, %c0_202, %c0_203] : memref<4x16x64xbf16, #tpu.memory_space<vmem>>, vector<1x16x64xbf16>
    %342 = vector.shape_cast %341 : vector<1x16x64xbf16> to vector<16x64xbf16>
    %cst_204 = arith.constant dense<0.000000e+00> : vector<8x64xf32>
    %343 = tpu.matmul %340, %342, %cst_204 {dimension_numbers = #tpu.dot_dimension_numbers<[1], [0], [0], [1], [0, 0, 1, 1], [], []>} : vector<8x16xbf16>, vector<16x64xbf16>, vector<8x64xf32> -> vector<8x64xf32>
    %344 = arith.addf %261, %343 : vector<8x64xf32>
    %c2 = arith.constant 2 : index
    %c0_205 = arith.constant 0 : index
    %c0_206 = arith.constant 0 : index
    %345 = vector.load %arg23[%c2, %c0_205, %c0_206] : memref<4x64x16xbf16, #tpu.memory_space<vmem>>, vector<1x64x16xbf16>
    %346 = vector.shape_cast %345 : vector<1x64x16xbf16> to vector<64x16xbf16>
    %cst_207 = arith.constant dense<0.000000e+00> : vector<8x16xf32>
    %347 = tpu.matmul %175, %346, %cst_207 {dimension_numbers = #tpu.dot_dimension_numbers<[1], [0], [0], [1], [0, 0, 1, 1], [], []>} : vector<8x64xbf16>, vector<64x16xbf16>, vector<8x16xf32> -> vector<8x16xf32>
    %c2_208 = arith.constant 2 : index
    %c0_209 = arith.constant 0 : index
    %c0_210 = arith.constant 0 : index
    %348 = vector.load %arg24[%c2_208, %c0_209, %c0_210] : memref<4x1x16xf32, #tpu.memory_space<vmem>>, vector<1x1x16xf32>
    %349 = vector.shape_cast %348 : vector<1x1x16xf32> to vector<1x16xf32>
    %350 = vector.broadcast %349 : vector<1x16xf32> to vector<8x16xf32>
    %351 = arith.addf %347, %350 : vector<8x16xf32>
    %352 = arith.truncf %351 : vector<8x16xf32> to vector<8x16xbf16>
    %c2_211 = arith.constant 2 : index
    %c0_212 = arith.constant 0 : index
    %c0_213 = arith.constant 0 : index
    %353 = vector.load %arg25[%c2_211, %c0_212, %c0_213] : memref<4x64x16xbf16, #tpu.memory_space<vmem>>, vector<1x64x16xbf16>
    %354 = vector.shape_cast %353 : vector<1x64x16xbf16> to vector<64x16xbf16>
    %cst_214 = arith.constant dense<0.000000e+00> : vector<8x16xf32>
    %355 = tpu.matmul %175, %354, %cst_214 {dimension_numbers = #tpu.dot_dimension_numbers<[1], [0], [0], [1], [0, 0, 1, 1], [], []>} : vector<8x64xbf16>, vector<64x16xbf16>, vector<8x16xf32> -> vector<8x16xf32>
    %c2_215 = arith.constant 2 : index
    %c0_216 = arith.constant 0 : index
    %c0_217 = arith.constant 0 : index
    %356 = vector.load %arg26[%c2_215, %c0_216, %c0_217] : memref<4x1x16xf32, #tpu.memory_space<vmem>>, vector<1x1x16xf32>
    %357 = vector.shape_cast %356 : vector<1x1x16xf32> to vector<1x16xf32>
    %358 = vector.broadcast %357 : vector<1x16xf32> to vector<8x16xf32>
    %359 = arith.addf %355, %358 : vector<8x16xf32>
    %c2_218 = arith.constant 2 : index
    %c0_219 = arith.constant 0 : index
    %c0_220 = arith.constant 0 : index
    %360 = vector.load %arg27[%c2_218, %c0_219, %c0_220] : memref<4x64x16xbf16, #tpu.memory_space<vmem>>, vector<1x64x16xbf16>
    %361 = vector.shape_cast %360 : vector<1x64x16xbf16> to vector<64x16xbf16>
    %cst_221 = arith.constant dense<0.000000e+00> : vector<8x16xf32>
    %362 = tpu.matmul %175, %361, %cst_221 {dimension_numbers = #tpu.dot_dimension_numbers<[1], [0], [0], [1], [0, 0, 1, 1], [], []>} : vector<8x64xbf16>, vector<64x16xbf16>, vector<8x16xf32> -> vector<8x16xf32>
    %c2_222 = arith.constant 2 : index
    %c0_223 = arith.constant 0 : index
    %c0_224 = arith.constant 0 : index
    %363 = vector.load %arg28[%c2_222, %c0_223, %c0_224] : memref<4x1x16xf32, #tpu.memory_space<vmem>>, vector<1x1x16xf32>
    %364 = vector.shape_cast %363 : vector<1x1x16xf32> to vector<1x16xf32>
    %365 = vector.broadcast %364 : vector<1x16xf32> to vector<8x16xf32>
    %366 = arith.addf %362, %365 : vector<8x16xf32>
    %367 = arith.truncf %359 : vector<8x16xf32> to vector<8x16xbf16>
    %c0_225 = arith.constant 0 : index
    %c0_226 = arith.constant 0 : index
    %368 = vector.load %arg40[%c0_225, %c0_226] : memref<8x16xbf16, #tpu.memory_space<vmem>>, vector<8x16xbf16>
    tpu.vector_store %arg40[%c0_225, %c0_226], %367 {strides = array<i32>} : memref<8x16xbf16, #tpu.memory_space<vmem>>, vector<8x16xbf16>,
    %369 = arith.truncf %366 : vector<8x16xf32> to vector<8x16xbf16>
    %c0_227 = arith.constant 0 : index
    %c0_228 = arith.constant 0 : index
    %370 = vector.load %arg41[%c0_227, %c0_228] : memref<8x16xbf16, #tpu.memory_space<vmem>>, vector<8x16xbf16>
    tpu.vector_store %arg41[%c0_227, %c0_228], %369 {strides = array<i32>} : memref<8x16xbf16, #tpu.memory_space<vmem>>, vector<8x16xbf16>,
    %cst_229 = arith.constant -1.000000e+30 : f32
    %371 = vector.broadcast %cst_229 : f32 to vector<8x1xf32>
    %c0_230 = arith.constant 0 : index
    %c0_231 = arith.constant 0 : index
    %372 = vector.load %arg42[%c0_230, %c0_231] : memref<8x1xf32, #tpu.memory_space<vmem>>, vector<8x1xf32>
    tpu.vector_store %arg42[%c0_230, %c0_231], %371 {strides = array<i32>} : memref<8x1xf32, #tpu.memory_space<vmem>>, vector<8x1xf32>,
    %cst_232 = arith.constant 0.000000e+00 : f32
    %373 = vector.broadcast %cst_232 : f32 to vector<8x1xf32>
    %c0_233 = arith.constant 0 : index
    %c0_234 = arith.constant 0 : index
    %374 = vector.load %arg43[%c0_233, %c0_234] : memref<8x1xf32, #tpu.memory_space<vmem>>, vector<8x1xf32>
    tpu.vector_store %arg43[%c0_233, %c0_234], %373 {strides = array<i32>} : memref<8x1xf32, #tpu.memory_space<vmem>>, vector<8x1xf32>,
    %cst_235 = arith.constant 0.000000e+00 : f32
    %375 = vector.broadcast %cst_235 : f32 to vector<8x16xf32>
    %c0_236 = arith.constant 0 : index
    %c0_237 = arith.constant 0 : index
    %376 = vector.load %arg44[%c0_236, %c0_237] : memref<8x16xf32, #tpu.memory_space<vmem>>, vector<8x16xf32>
    tpu.vector_store %arg44[%c0_236, %c0_237], %375 {strides = array<i32>} : memref<8x16xf32, #tpu.memory_space<vmem>>, vector<8x16xf32>,
    %c0_i32_238 = arith.constant 0 : i32
    %c1_i32_239 = arith.constant 1 : i32
    %377 = arith.muli %c0_i32_238, %c1_i32_239 : i32
    %c0_i32_240 = arith.constant 0 : i32
    %378 = arith.addi %c0_i32_240, %377 : i32
    %c8_i32_241 = arith.constant 8 : i32
    %379 = arith.muli %378, %c8_i32_241 : i32
    %380 = tpu.assume_multiple %379, 8 : i32
    %381 = arith.index_cast %380 : i32 to index
    %c0_242 = arith.constant 0 : index
    %382 = vector.load %arg40[%381, %c0_242] : memref<8x16xbf16, #tpu.memory_space<vmem>>, vector<8x16xbf16>
    %383 = arith.index_cast %380 : i32 to index
    %c0_243 = arith.constant 0 : index
    %384 = vector.load %arg41[%383, %c0_243] : memref<8x16xbf16, #tpu.memory_space<vmem>>, vector<8x16xbf16>
    %cst_244 = arith.constant dense<0.000000e+00> : vector<8x8xf32>
    %385 = tpu.matmul %352, %382, %cst_244 {dimension_numbers = #tpu.dot_dimension_numbers<[1], [1], [0], [0], [0, 0, 1, 0], [], []>} : vector<8x16xbf16>, vector<8x16xbf16>, vector<8x8xf32> -> vector<8x8xf32>
    %386 = tpu.iota {dimensions = array<i32: 1>} : vector<1x8xi32>
    %387 = vector.broadcast %380 : i32 to vector<1x8xi32>
    %388 = arith.addi %387, %386 : vector<1x8xi32>
    %389 = vector.broadcast %177 : vector<1x1xi32> to vector<1x8xi32>
    %390 = arith.cmpi slt, %388, %389 : vector<1x8xi32>
    %cst_245 = arith.constant 0.000000e+00 : f32
    %cst_246 = arith.constant -1.000000e+30 : f32
    %391 = vector.broadcast %cst_245 : f32 to vector<1x8xf32>
    %392 = vector.broadcast %cst_246 : f32 to vector<1x8xf32>
    %393 = arith.select %390, %391, %392 : vector<1x8xi1>, vector<1x8xf32>
    %394 = vector.broadcast %393 : vector<1x8xf32> to vector<8x8xf32>
    %395 = arith.addf %385, %394 : vector<8x8xf32>
    %c0_247 = arith.constant 0 : index
    %c0_248 = arith.constant 0 : index
    %396 = vector.load %arg42[%c0_247, %c0_248] : memref<8x1xf32, #tpu.memory_space<vmem>>, vector<8x1xf32>
    %cst_249 = arith.constant dense<0xFF800000> : vector<8xf32>
    %397 = vector.multi_reduction <maximumf>, %395, %cst_249 [1] : vector<8x8xf32> to vector<8xf32>
    %398 = vector.shape_cast %397 : vector<8xf32> to vector<8x1xf32>
    %399 = arith.maximumf %396, %398 : vector<8x1xf32>
    %400 = arith.subf %396, %399 : vector<8x1xf32>
    %401 = math.exp %400 : vector<8x1xf32>
    %402 = vector.broadcast %399 : vector<8x1xf32> to vector<8x8xf32>
    %403 = arith.subf %395, %402 : vector<8x8xf32>
    %404 = math.exp %403 : vector<8x8xf32>
    %c0_250 = arith.constant 0 : index
    %c0_251 = arith.constant 0 : index
    %405 = vector.load %arg43[%c0_250, %c0_251] : memref<8x1xf32, #tpu.memory_space<vmem>>, vector<8x1xf32>
    %406 = arith.mulf %401, %405 : vector<8x1xf32>
    %cst_252 = arith.constant dense<0.000000e+00> : vector<8xf32>
    %407 = vector.multi_reduction <add>, %404, %cst_252 [1] : vector<8x8xf32> to vector<8xf32>
    %408 = vector.shape_cast %407 : vector<8xf32> to vector<8x1xf32>
    %409 = arith.addf %406, %408 : vector<8x1xf32>
    %c0_253 = arith.constant 0 : index
    %c0_254 = arith.constant 0 : index
    %410 = vector.load %arg43[%c0_253, %c0_254] : memref<8x1xf32, #tpu.memory_space<vmem>>, vector<8x1xf32>
    tpu.vector_store %arg43[%c0_253, %c0_254], %409 {strides = array<i32>} : memref<8x1xf32, #tpu.memory_space<vmem>>, vector<8x1xf32>,
    %c0_255 = arith.constant 0 : index
    %c0_256 = arith.constant 0 : index
    %411 = vector.load %arg44[%c0_255, %c0_256] : memref<8x16xf32, #tpu.memory_space<vmem>>, vector<8x16xf32>
    %412 = vector.broadcast %401 : vector<8x1xf32> to vector<8x16xf32>
    %413 = arith.mulf %412, %411 : vector<8x16xf32>
    %414 = arith.truncf %404 : vector<8x8xf32> to vector<8x8xbf16>
    %cst_257 = arith.constant dense<0.000000e+00> : vector<8x16xf32>
    %415 = tpu.matmul %414, %384, %cst_257 {dimension_numbers = #tpu.dot_dimension_numbers<[1], [0], [0], [1], [0, 0, 1, 1], [], []>} : vector<8x8xbf16>, vector<8x16xbf16>, vector<8x16xf32> -> vector<8x16xf32>
    %416 = arith.addf %413, %415 : vector<8x16xf32>
    %c0_258 = arith.constant 0 : index
    %c0_259 = arith.constant 0 : index
    %417 = vector.load %arg44[%c0_258, %c0_259] : memref<8x16xf32, #tpu.memory_space<vmem>>, vector<8x16xf32>
    tpu.vector_store %arg44[%c0_258, %c0_259], %416 {strides = array<i32>} : memref<8x16xf32, #tpu.memory_space<vmem>>, vector<8x16xf32>,
    %c0_260 = arith.constant 0 : index
    %c0_261 = arith.constant 0 : index
    %418 = vector.load %arg42[%c0_260, %c0_261] : memref<8x1xf32, #tpu.memory_space<vmem>>, vector<8x1xf32>
    tpu.vector_store %arg42[%c0_260, %c0_261], %399 {strides = array<i32>} : memref<8x1xf32, #tpu.memory_space<vmem>>, vector<8x1xf32>,
    %c1_i32_262 = arith.constant 1 : i32
    %c0_263 = arith.constant 0 : index
    %c0_264 = arith.constant 0 : index
    %419 = vector.load %arg44[%c0_263, %c0_264] : memref<8x16xf32, #tpu.memory_space<vmem>>, vector<8x16xf32>
    %c0_265 = arith.constant 0 : index
    %c0_266 = arith.constant 0 : index
    %420 = vector.load %arg43[%c0_265, %c0_266] : memref<8x1xf32, #tpu.memory_space<vmem>>, vector<8x1xf32>
    %421 = vector.broadcast %420 : vector<8x1xf32> to vector<8x16xf32>
    %422 = arith.divf %419, %421 : vector<8x16xf32>
    %423 = arith.truncf %422 : vector<8x16xf32> to vector<8x16xbf16>
    %c2_267 = arith.constant 2 : index
    %c0_268 = arith.constant 0 : index
    %c0_269 = arith.constant 0 : index
    %424 = vector.load %arg29[%c2_267, %c0_268, %c0_269] : memref<4x16x64xbf16, #tpu.memory_space<vmem>>, vector<1x16x64xbf16>
    %425 = vector.shape_cast %424 : vector<1x16x64xbf16> to vector<16x64xbf16>
    %cst_270 = arith.constant dense<0.000000e+00> : vector<8x64xf32>
    %426 = tpu.matmul %423, %425, %cst_270 {dimension_numbers = #tpu.dot_dimension_numbers<[1], [0], [0], [1], [0, 0, 1, 1], [], []>} : vector<8x16xbf16>, vector<16x64xbf16>, vector<8x64xf32> -> vector<8x64xf32>
    %427 = arith.addf %344, %426 : vector<8x64xf32>
    %c3 = arith.constant 3 : index
    %c0_271 = arith.constant 0 : index
    %c0_272 = arith.constant 0 : index
    %428 = vector.load %arg23[%c3, %c0_271, %c0_272] : memref<4x64x16xbf16, #tpu.memory_space<vmem>>, vector<1x64x16xbf16>
    %429 = vector.shape_cast %428 : vector<1x64x16xbf16> to vector<64x16xbf16>
    %cst_273 = arith.constant dense<0.000000e+00> : vector<8x16xf32>
    %430 = tpu.matmul %175, %429, %cst_273 {dimension_numbers = #tpu.dot_dimension_numbers<[1], [0], [0], [1], [0, 0, 1, 1], [], []>} : vector<8x64xbf16>, vector<64x16xbf16>, vector<8x16xf32> -> vector<8x16xf32>
    %c3_274 = arith.constant 3 : index
    %c0_275 = arith.constant 0 : index
    %c0_276 = arith.constant 0 : index
    %431 = vector.load %arg24[%c3_274, %c0_275, %c0_276] : memref<4x1x16xf32, #tpu.memory_space<vmem>>, vector<1x1x16xf32>
    %432 = vector.shape_cast %431 : vector<1x1x16xf32> to vector<1x16xf32>
    %433 = vector.broadcast %432 : vector<1x16xf32> to vector<8x16xf32>
    %434 = arith.addf %430, %433 : vector<8x16xf32>
    %435 = arith.truncf %434 : vector<8x16xf32> to vector<8x16xbf16>
    %c3_277 = arith.constant 3 : index
    %c0_278 = arith.constant 0 : index
    %c0_279 = arith.constant 0 : index
    %436 = vector.load %arg25[%c3_277, %c0_278, %c0_279] : memref<4x64x16xbf16, #tpu.memory_space<vmem>>, vector<1x64x16xbf16>
    %437 = vector.shape_cast %436 : vector<1x64x16xbf16> to vector<64x16xbf16>
    %cst_280 = arith.constant dense<0.000000e+00> : vector<8x16xf32>
    %438 = tpu.matmul %175, %437, %cst_280 {dimension_numbers = #tpu.dot_dimension_numbers<[1], [0], [0], [1], [0, 0, 1, 1], [], []>} : vector<8x64xbf16>, vector<64x16xbf16>, vector<8x16xf32> -> vector<8x16xf32>
    %c3_281 = arith.constant 3 : index
    %c0_282 = arith.constant 0 : index
    %c0_283 = arith.constant 0 : index
    %439 = vector.load %arg26[%c3_281, %c0_282, %c0_283] : memref<4x1x16xf32, #tpu.memory_space<vmem>>, vector<1x1x16xf32>
    %440 = vector.shape_cast %439 : vector<1x1x16xf32> to vector<1x16xf32>
    %441 = vector.broadcast %440 : vector<1x16xf32> to vector<8x16xf32>
    %442 = arith.addf %438, %441 : vector<8x16xf32>
    %c3_284 = arith.constant 3 : index
    %c0_285 = arith.constant 0 : index
    %c0_286 = arith.constant 0 : index
    %443 = vector.load %arg27[%c3_284, %c0_285, %c0_286] : memref<4x64x16xbf16, #tpu.memory_space<vmem>>, vector<1x64x16xbf16>
    %444 = vector.shape_cast %443 : vector<1x64x16xbf16> to vector<64x16xbf16>
    %cst_287 = arith.constant dense<0.000000e+00> : vector<8x16xf32>
    %445 = tpu.matmul %175, %444, %cst_287 {dimension_numbers = #tpu.dot_dimension_numbers<[1], [0], [0], [1], [0, 0, 1, 1], [], []>} : vector<8x64xbf16>, vector<64x16xbf16>, vector<8x16xf32> -> vector<8x16xf32>
    %c3_288 = arith.constant 3 : index
    %c0_289 = arith.constant 0 : index
    %c0_290 = arith.constant 0 : index
    %446 = vector.load %arg28[%c3_288, %c0_289, %c0_290] : memref<4x1x16xf32, #tpu.memory_space<vmem>>, vector<1x1x16xf32>
    %447 = vector.shape_cast %446 : vector<1x1x16xf32> to vector<1x16xf32>
    %448 = vector.broadcast %447 : vector<1x16xf32> to vector<8x16xf32>
    %449 = arith.addf %445, %448 : vector<8x16xf32>
    %450 = arith.truncf %442 : vector<8x16xf32> to vector<8x16xbf16>
    %c0_291 = arith.constant 0 : index
    %c0_292 = arith.constant 0 : index
    %451 = vector.load %arg40[%c0_291, %c0_292] : memref<8x16xbf16, #tpu.memory_space<vmem>>, vector<8x16xbf16>
    tpu.vector_store %arg40[%c0_291, %c0_292], %450 {strides = array<i32>} : memref<8x16xbf16, #tpu.memory_space<vmem>>, vector<8x16xbf16>,
    %452 = arith.truncf %449 : vector<8x16xf32> to vector<8x16xbf16>
    %c0_293 = arith.constant 0 : index
    %c0_294 = arith.constant 0 : index
    %453 = vector.load %arg41[%c0_293, %c0_294] : memref<8x16xbf16, #tpu.memory_space<vmem>>, vector<8x16xbf16>
    tpu.vector_store %arg41[%c0_293, %c0_294], %452 {strides = array<i32>} : memref<8x16xbf16, #tpu.memory_space<vmem>>, vector<8x16xbf16>,
    %cst_295 = arith.constant -1.000000e+30 : f32
    %454 = vector.broadcast %cst_295 : f32 to vector<8x1xf32>
    %c0_296 = arith.constant 0 : index
    %c0_297 = arith.constant 0 : index
    %455 = vector.load %arg42[%c0_296, %c0_297] : memref<8x1xf32, #tpu.memory_space<vmem>>, vector<8x1xf32>
    tpu.vector_store %arg42[%c0_296, %c0_297], %454 {strides = array<i32>} : memref<8x1xf32, #tpu.memory_space<vmem>>, vector<8x1xf32>,
    %cst_298 = arith.constant 0.000000e+00 : f32
    %456 = vector.broadcast %cst_298 : f32 to vector<8x1xf32>
    %c0_299 = arith.constant 0 : index
    %c0_300 = arith.constant 0 : index
    %457 = vector.load %arg43[%c0_299, %c0_300] : memref<8x1xf32, #tpu.memory_space<vmem>>, vector<8x1xf32>
    tpu.vector_store %arg43[%c0_299, %c0_300], %456 {strides = array<i32>} : memref<8x1xf32, #tpu.memory_space<vmem>>, vector<8x1xf32>,
    %cst_301 = arith.constant 0.000000e+00 : f32
    %458 = vector.broadcast %cst_301 : f32 to vector<8x16xf32>
    %c0_302 = arith.constant 0 : index
    %c0_303 = arith.constant 0 : index
    %459 = vector.load %arg44[%c0_302, %c0_303] : memref<8x16xf32, #tpu.memory_space<vmem>>, vector<8x16xf32>
    tpu.vector_store %arg44[%c0_302, %c0_303], %458 {strides = array<i32>} : memref<8x16xf32, #tpu.memory_space<vmem>>, vector<8x16xf32>,
    %c0_i32_304 = arith.constant 0 : i32
    %c1_i32_305 = arith.constant 1 : i32
    %460 = arith.muli %c0_i32_304, %c1_i32_305 : i32
    %c0_i32_306 = arith.constant 0 : i32
    %461 = arith.addi %c0_i32_306, %460 : i32
    %c8_i32_307 = arith.constant 8 : i32
    %462 = arith.muli %461, %c8_i32_307 : i32
    %463 = tpu.assume_multiple %462, 8 : i32
    %464 = arith.index_cast %463 : i32 to index
    %c0_308 = arith.constant 0 : index
    %465 = vector.load %arg40[%464, %c0_308] : memref<8x16xbf16, #tpu.memory_space<vmem>>, vector<8x16xbf16>
    %466 = arith.index_cast %463 : i32 to index
    %c0_309 = arith.constant 0 : index
    %467 = vector.load %arg41[%466, %c0_309] : memref<8x16xbf16, #tpu.memory_space<vmem>>, vector<8x16xbf16>
    %cst_310 = arith.constant dense<0.000000e+00> : vector<8x8xf32>
    %468 = tpu.matmul %435, %465, %cst_310 {dimension_numbers = #tpu.dot_dimension_numbers<[1], [1], [0], [0], [0, 0, 1, 0], [], []>} : vector<8x16xbf16>, vector<8x16xbf16>, vector<8x8xf32> -> vector<8x8xf32>
    %469 = tpu.iota {dimensions = array<i32: 1>} : vector<1x8xi32>
    %470 = vector.broadcast %463 : i32 to vector<1x8xi32>
    %471 = arith.addi %470, %469 : vector<1x8xi32>
    %472 = vector.broadcast %177 : vector<1x1xi32> to vector<1x8xi32>
    %473 = arith.cmpi slt, %471, %472 : vector<1x8xi32>
    %cst_311 = arith.constant 0.000000e+00 : f32
    %cst_312 = arith.constant -1.000000e+30 : f32
    %474 = vector.broadcast %cst_311 : f32 to vector<1x8xf32>
    %475 = vector.broadcast %cst_312 : f32 to vector<1x8xf32>
    %476 = arith.select %473, %474, %475 : vector<1x8xi1>, vector<1x8xf32>
    %477 = vector.broadcast %476 : vector<1x8xf32> to vector<8x8xf32>
    %478 = arith.addf %468, %477 : vector<8x8xf32>
    %c0_313 = arith.constant 0 : index
    %c0_314 = arith.constant 0 : index
    %479 = vector.load %arg42[%c0_313, %c0_314] : memref<8x1xf32, #tpu.memory_space<vmem>>, vector<8x1xf32>
    %cst_315 = arith.constant dense<0xFF800000> : vector<8xf32>
    %480 = vector.multi_reduction <maximumf>, %478, %cst_315 [1] : vector<8x8xf32> to vector<8xf32>
    %481 = vector.shape_cast %480 : vector<8xf32> to vector<8x1xf32>
    %482 = arith.maximumf %479, %481 : vector<8x1xf32>
    %483 = arith.subf %479, %482 : vector<8x1xf32>
    %484 = math.exp %483 : vector<8x1xf32>
    %485 = vector.broadcast %482 : vector<8x1xf32> to vector<8x8xf32>
    %486 = arith.subf %478, %485 : vector<8x8xf32>
    %487 = math.exp %486 : vector<8x8xf32>
    %c0_316 = arith.constant 0 : index
    %c0_317 = arith.constant 0 : index
    %488 = vector.load %arg43[%c0_316, %c0_317] : memref<8x1xf32, #tpu.memory_space<vmem>>, vector<8x1xf32>
    %489 = arith.mulf %484, %488 : vector<8x1xf32>
    %cst_318 = arith.constant dense<0.000000e+00> : vector<8xf32>
    %490 = vector.multi_reduction <add>, %487, %cst_318 [1] : vector<8x8xf32> to vector<8xf32>
    %491 = vector.shape_cast %490 : vector<8xf32> to vector<8x1xf32>
    %492 = arith.addf %489, %491 : vector<8x1xf32>
    %c0_319 = arith.constant 0 : index
    %c0_320 = arith.constant 0 : index
    %493 = vector.load %arg43[%c0_319, %c0_320] : memref<8x1xf32, #tpu.memory_space<vmem>>, vector<8x1xf32>
    tpu.vector_store %arg43[%c0_319, %c0_320], %492 {strides = array<i32>} : memref<8x1xf32, #tpu.memory_space<vmem>>, vector<8x1xf32>,
    %c0_321 = arith.constant 0 : index
    %c0_322 = arith.constant 0 : index
    %494 = vector.load %arg44[%c0_321, %c0_322] : memref<8x16xf32, #tpu.memory_space<vmem>>, vector<8x16xf32>
    %495 = vector.broadcast %484 : vector<8x1xf32> to vector<8x16xf32>
    %496 = arith.mulf %495, %494 : vector<8x16xf32>
    %497 = arith.truncf %487 : vector<8x8xf32> to vector<8x8xbf16>
    %cst_323 = arith.constant dense<0.000000e+00> : vector<8x16xf32>
    %498 = tpu.matmul %497, %467, %cst_323 {dimension_numbers = #tpu.dot_dimension_numbers<[1], [0], [0], [1], [0, 0, 1, 1], [], []>} : vector<8x8xbf16>, vector<8x16xbf16>, vector<8x16xf32> -> vector<8x16xf32>
    %499 = arith.addf %496, %498 : vector<8x16xf32>
    %c0_324 = arith.constant 0 : index
    %c0_325 = arith.constant 0 : index
    %500 = vector.load %arg44[%c0_324, %c0_325] : memref<8x16xf32, #tpu.memory_space<vmem>>, vector<8x16xf32>
    tpu.vector_store %arg44[%c0_324, %c0_325], %499 {strides = array<i32>} : memref<8x16xf32, #tpu.memory_space<vmem>>, vector<8x16xf32>,
    %c0_326 = arith.constant 0 : index
    %c0_327 = arith.constant 0 : index
    %501 = vector.load %arg42[%c0_326, %c0_327] : memref<8x1xf32, #tpu.memory_space<vmem>>, vector<8x1xf32>
    tpu.vector_store %arg42[%c0_326, %c0_327], %482 {strides = array<i32>} : memref<8x1xf32, #tpu.memory_space<vmem>>, vector<8x1xf32>,
    %c1_i32_328 = arith.constant 1 : i32
    %c0_329 = arith.constant 0 : index
    %c0_330 = arith.constant 0 : index
    %502 = vector.load %arg44[%c0_329, %c0_330] : memref<8x16xf32, #tpu.memory_space<vmem>>, vector<8x16xf32>
    %c0_331 = arith.constant 0 : index
    %c0_332 = arith.constant 0 : index
    %503 = vector.load %arg43[%c0_331, %c0_332] : memref<8x1xf32, #tpu.memory_space<vmem>>, vector<8x1xf32>
    %504 = vector.broadcast %503 : vector<8x1xf32> to vector<8x16xf32>
    %505 = arith.divf %502, %504 : vector<8x16xf32>
    %506 = arith.truncf %505 : vector<8x16xf32> to vector<8x16xbf16>
    %c3_333 = arith.constant 3 : index
    %c0_334 = arith.constant 0 : index
    %c0_335 = arith.constant 0 : index
    %507 = vector.load %arg29[%c3_333, %c0_334, %c0_335] : memref<4x16x64xbf16, #tpu.memory_space<vmem>>, vector<1x16x64xbf16>
    %508 = vector.shape_cast %507 : vector<1x16x64xbf16> to vector<16x64xbf16>
    %cst_336 = arith.constant dense<0.000000e+00> : vector<8x64xf32>
    %509 = tpu.matmul %506, %508, %cst_336 {dimension_numbers = #tpu.dot_dimension_numbers<[1], [0], [0], [1], [0, 0, 1, 1], [], []>} : vector<8x16xbf16>, vector<16x64xbf16>, vector<8x64xf32> -> vector<8x64xf32>
    %510 = arith.addf %427, %509 : vector<8x64xf32>
    %c0_337 = arith.constant 0 : index
    %c0_338 = arith.constant 0 : index
    %511 = vector.load %arg30[%c0_337, %c0_338] : memref<1x64xf32, #tpu.memory_space<vmem>>, vector<1x64xf32>
    %512 = vector.broadcast %511 : vector<1x64xf32> to vector<8x64xf32>
    %513 = arith.addf %510, %512 : vector<8x64xf32>
    %514 = arith.addf %513, %152 : vector<8x64xf32>
    %cst_339 = arith.constant dense<0.000000e+00> : vector<8xf32>
    %515 = vector.multi_reduction <add>, %514, %cst_339 [1] : vector<8x64xf32> to vector<8xf32>
    %516 = vector.shape_cast %515 : vector<8xf32> to vector<8x1xf32>
    %cst_340 = arith.constant 6.400000e+01 : f32
    %517 = vector.broadcast %cst_340 : f32 to vector<8x1xf32>
    %518 = arith.divf %516, %517 : vector<8x1xf32>
    %519 = vector.broadcast %518 : vector<8x1xf32> to vector<8x64xf32>
    %520 = arith.subf %514, %519 : vector<8x64xf32>
    %521 = arith.mulf %520, %520 : vector<8x64xf32>
    %cst_341 = arith.constant dense<0.000000e+00> : vector<8xf32>
    %522 = vector.multi_reduction <add>, %521, %cst_341 [1] : vector<8x64xf32> to vector<8xf32>
    %523 = vector.shape_cast %522 : vector<8xf32> to vector<8x1xf32>
    %cst_342 = arith.constant 6.400000e+01 : f32
    %524 = vector.broadcast %cst_342 : f32 to vector<8x1xf32>
    %525 = arith.divf %523, %524 : vector<8x1xf32>
    %cst_343 = arith.constant 9.99999974E-6 : f32
    %526 = vector.broadcast %cst_343 : f32 to vector<8x1xf32>
    %527 = arith.addf %525, %526 : vector<8x1xf32>
    %528 = math.rsqrt %527 : vector<8x1xf32>
    %529 = vector.broadcast %528 : vector<8x1xf32> to vector<8x64xf32>
    %530 = arith.mulf %520, %529 : vector<8x64xf32>
    %c0_344 = arith.constant 0 : index
    %c0_345 = arith.constant 0 : index
    %531 = vector.load %arg31[%c0_344, %c0_345] : memref<1x64xf32, #tpu.memory_space<vmem>>, vector<1x64xf32>
    %532 = vector.broadcast %531 : vector<1x64xf32> to vector<8x64xf32>
    %533 = arith.mulf %530, %532 : vector<8x64xf32>
    %c0_346 = arith.constant 0 : index
    %c0_347 = arith.constant 0 : index
    %534 = vector.load %arg32[%c0_346, %c0_347] : memref<1x64xf32, #tpu.memory_space<vmem>>, vector<1x64xf32>
    %535 = vector.broadcast %534 : vector<1x64xf32> to vector<8x64xf32>
    %536 = arith.addf %533, %535 : vector<8x64xf32>
    %537 = arith.truncf %536 : vector<8x64xf32> to vector<8x64xbf16>
    %c0_348 = arith.constant 0 : index
    %c0_349 = arith.constant 0 : index
    %538 = vector.load %arg33[%c0_348, %c0_349] : memref<64x128xbf16, #tpu.memory_space<vmem>>, vector<64x128xbf16>
    %cst_350 = arith.constant dense<0.000000e+00> : vector<8x128xf32>
    %539 = tpu.matmul %537, %538, %cst_350 {dimension_numbers = #tpu.dot_dimension_numbers<[1], [0], [0], [1], [0, 0, 1, 1], [], []>} : vector<8x64xbf16>, vector<64x128xbf16>, vector<8x128xf32> -> vector<8x128xf32>
    %c0_351 = arith.constant 0 : index
    %c0_352 = arith.constant 0 : index
    %540 = vector.load %arg34[%c0_351, %c0_352] : memref<1x128xf32, #tpu.memory_space<vmem>>, vector<1x128xf32>
    %541 = vector.broadcast %540 : vector<1x128xf32> to vector<8x128xf32>
    %542 = arith.addf %539, %541 : vector<8x128xf32>
    %543 = arith.negf %542 : vector<8x128xf32>
    %544 = math.exp %543 : vector<8x128xf32>
    %cst_353 = arith.constant 1.000000e+00 : f32
    %545 = vector.broadcast %cst_353 : f32 to vector<8x128xf32>
    %546 = arith.addf %545, %544 : vector<8x128xf32>
    %547 = arith.divf %545, %546 : vector<8x128xf32>
    %548 = arith.mulf %542, %547 : vector<8x128xf32>
    %549 = arith.truncf %548 : vector<8x128xf32> to vector<8x128xbf16>
    %c0_354 = arith.constant 0 : index
    %c0_355 = arith.constant 0 : index
    %550 = vector.load %arg35[%c0_354, %c0_355] : memref<128x64xbf16, #tpu.memory_space<vmem>>, vector<128x64xbf16>
    %cst_356 = arith.constant dense<0.000000e+00> : vector<8x64xf32>
    %551 = tpu.matmul %549, %550, %cst_356 {dimension_numbers = #tpu.dot_dimension_numbers<[1], [0], [0], [1], [0, 0, 1, 1], [], []>} : vector<8x128xbf16>, vector<128x64xbf16>, vector<8x64xf32> -> vector<8x64xf32>
    %c0_357 = arith.constant 0 : index
    %c0_358 = arith.constant 0 : index
    %552 = vector.load %arg36[%c0_357, %c0_358] : memref<1x64xf32, #tpu.memory_space<vmem>>, vector<1x64xf32>
    %553 = vector.broadcast %552 : vector<1x64xf32> to vector<8x64xf32>
    %554 = arith.addf %551, %553 : vector<8x64xf32>
    %cst_359 = arith.constant 5.000000e-01 : f32
    %555 = vector.broadcast %cst_359 : f32 to vector<8x64xf32>
    %556 = arith.mulf %555, %554 : vector<8x64xf32>
    %557 = arith.addf %556, %514 : vector<8x64xf32>
    %cst_360 = arith.constant dense<0.000000e+00> : vector<8xf32>
    %558 = vector.multi_reduction <add>, %557, %cst_360 [1] : vector<8x64xf32> to vector<8xf32>
    %559 = vector.shape_cast %558 : vector<8xf32> to vector<8x1xf32>
    %cst_361 = arith.constant 6.400000e+01 : f32
    %560 = vector.broadcast %cst_361 : f32 to vector<8x1xf32>
    %561 = arith.divf %559, %560 : vector<8x1xf32>
    %562 = vector.broadcast %561 : vector<8x1xf32> to vector<8x64xf32>
    %563 = arith.subf %557, %562 : vector<8x64xf32>
    %564 = arith.mulf %563, %563 : vector<8x64xf32>
    %cst_362 = arith.constant dense<0.000000e+00> : vector<8xf32>
    %565 = vector.multi_reduction <add>, %564, %cst_362 [1] : vector<8x64xf32> to vector<8xf32>
    %566 = vector.shape_cast %565 : vector<8xf32> to vector<8x1xf32>
    %cst_363 = arith.constant 6.400000e+01 : f32
    %567 = vector.broadcast %cst_363 : f32 to vector<8x1xf32>
    %568 = arith.divf %566, %567 : vector<8x1xf32>
    %cst_364 = arith.constant 9.99999974E-6 : f32
    %569 = vector.broadcast %cst_364 : f32 to vector<8x1xf32>
    %570 = arith.addf %568, %569 : vector<8x1xf32>
    %571 = math.rsqrt %570 : vector<8x1xf32>
    %572 = vector.broadcast %571 : vector<8x1xf32> to vector<8x64xf32>
    %573 = arith.mulf %563, %572 : vector<8x64xf32>
    %c0_365 = arith.constant 0 : index
    %c0_366 = arith.constant 0 : index
    %574 = vector.load %arg37[%c0_365, %c0_366] : memref<1x64xf32, #tpu.memory_space<vmem>>, vector<1x64xf32>
    %575 = vector.broadcast %574 : vector<1x64xf32> to vector<8x64xf32>
    %576 = arith.mulf %573, %575 : vector<8x64xf32>
    %c0_367 = arith.constant 0 : index
    %c0_368 = arith.constant 0 : index
    %577 = vector.load %arg38[%c0_367, %c0_368] : memref<1x64xf32, #tpu.memory_space<vmem>>, vector<1x64xf32>
    %578 = vector.broadcast %577 : vector<1x64xf32> to vector<8x64xf32>
    %579 = arith.addf %576, %578 : vector<8x64xf32>
    %580 = arith.truncf %579 : vector<8x64xf32> to vector<8x64xbf16>
    %c0_369 = arith.constant 0 : index
    %c0_370 = arith.constant 0 : index
    %c0_371 = arith.constant 0 : index
    %581 = vector.load %arg39[%c0_369, %c0_370, %c0_371] : memref<1x8x64xbf16, #tpu.memory_space<vmem>>, vector<1x8x64xbf16>
    %582 = vector.shape_cast %581 : vector<1x8x64xbf16> to vector<8x64xbf16>
    %583 = vector.shape_cast %580 : vector<8x64xbf16> to vector<1x8x64xbf16>
    tpu.vector_store %arg39[%c0_369, %c0_370, %c0_371], %583 {strides = array<i32>} : memref<1x8x64xbf16, #tpu.memory_space<vmem>>, vector<1x8x64xbf16>,
    return
  }
  func.func @transform_0(%arg0: i32) -> (i32, i32, i32) {
    %c0_i32 = arith.constant 0 : i32
    %c0_i32_0 = arith.constant 0 : i32
    %c0_i32_1 = arith.constant 0 : i32
    return %arg0, %c0_i32, %c0_i32_0 : i32, i32, i32
  }
  func.func @transform_1(%arg0: i32) -> (i32, i32, i32) {
    %c0_i32 = arith.constant 0 : i32
    %c0_i32_0 = arith.constant 0 : i32
    %c0_i32_1 = arith.constant 0 : i32
    return %arg0, %c0_i32, %c0_i32_0 : i32, i32, i32
  }
  func.func @transform_2(%arg0: i32) -> (i32, i32) {
    %c0_i32 = arith.constant 0 : i32
    %c0_i32_0 = arith.constant 0 : i32
    %c0_i32_1 = arith.constant 0 : i32
    return %c0_i32, %c0_i32_0 : i32, i32
  }
  func.func @transform_3(%arg0: i32) -> (i32, i32) {
    %c0_i32 = arith.constant 0 : i32
    %c0_i32_0 = arith.constant 0 : i32
    %c0_i32_1 = arith.constant 0 : i32
    return %c0_i32, %c0_i32_0 : i32, i32
  }
  func.func @transform_4(%arg0: i32) -> (i32, i32) {
    %c0_i32 = arith.constant 0 : i32
    %c0_i32_0 = arith.constant 0 : i32
    %c0_i32_1 = arith.constant 0 : i32
    return %c0_i32, %c0_i32_0 : i32, i32
  }
  func.func @transform_5(%arg0: i32) -> (i32, i32) {
    %c0_i32 = arith.constant 0 : i32
    %c0_i32_0 = arith.constant 0 : i32
    %c0_i32_1 = arith.constant 0 : i32
    return %c0_i32, %c0_i32_0 : i32, i32
  }
  func.func @transform_6(%arg0: i32) -> (i32, i32) {
    %c0_i32 = arith.constant 0 : i32
    %c0_i32_0 = arith.constant 0 : i32
    %c0_i32_1 = arith.constant 0 : i32
    return %c0_i32, %c0_i32_0 : i32, i32
  }
  func.func @transform_7(%arg0: i32) -> (i32, i32) {
    %c0_i32 = arith.constant 0 : i32
    %c0_i32_0 = arith.constant 0 : i32
    %c0_i32_1 = arith.constant 0 : i32
    return %c0_i32, %c0_i32_0 : i32, i32
  }
  func.func @transform_8(%arg0: i32) -> (i32, i32) {
    %c0_i32 = arith.constant 0 : i32
    %c0_i32_0 = arith.constant 0 : i32
    %c0_i32_1 = arith.constant 0 : i32
    return %c0_i32, %c0_i32_0 : i32, i32
  }
  func.func @transform_9(%arg0: i32) -> (i32, i32) {
    %c0_i32 = arith.constant 0 : i32
    %c0_i32_0 = arith.constant 0 : i32
    %c0_i32_1 = arith.constant 0 : i32
    return %c0_i32, %c0_i32_0 : i32, i32
  }
  func.func @transform_10(%arg0: i32) -> (i32, i32) {
    %c0_i32 = arith.constant 0 : i32
    %c0_i32_0 = arith.constant 0 : i32
    %c0_i32_1 = arith.constant 0 : i32
    return %c0_i32, %c0_i32_0 : i32, i32
  }
  func.func @transform_11(%arg0: i32) -> (i32, i32) {
    %c0_i32 = arith.constant 0 : i32
    %c0_i32_0 = arith.constant 0 : i32
    %c0_i32_1 = arith.constant 0 : i32
    return %c0_i32, %c0_i32_0 : i32, i32
  }
  func.func @transform_12(%arg0: i32) -> (i32, i32) {
    %c0_i32 = arith.constant 0 : i32
    %c0_i32_0 = arith.constant 0 : i32
    %c0_i32_1 = arith.constant 0 : i32
    return %c0_i32, %c0_i32_0 : i32, i32
  }
  func.func @transform_13(%arg0: i32) -> (i32, i32) {
    %c0_i32 = arith.constant 0 : i32
    %c0_i32_0 = arith.constant 0 : i32
    %c0_i32_1 = arith.constant 0 : i32
    return %c0_i32, %c0_i32_0 : i32, i32
  }
  func.func @transform_14(%arg0: i32) -> (i32, i32) {
    %c0_i32 = arith.constant 0 : i32
    %c0_i32_0 = arith.constant 0 : i32
    %c0_i32_1 = arith.constant 0 : i32
    return %c0_i32, %c0_i32_0 : i32, i32
  }
  func.func @transform_15(%arg0: i32) -> (i32, i32) {
    %c0_i32 = arith.constant 0 : i32
    %c0_i32_0 = arith.constant 0 : i32
    %c0_i32_1 = arith.constant 0 : i32
    return %c0_i32, %c0_i32_0 : i32, i32
  }
  func.func @transform_16(%arg0: i32) -> (i32, i32) {
    %c0_i32 = arith.constant 0 : i32
    %c0_i32_0 = arith.constant 0 : i32
    %c0_i32_1 = arith.constant 0 : i32
    return %c0_i32, %c0_i32_0 : i32, i32
  }
  func.func @transform_17(%arg0: i32) -> (i32, i32) {
    %c0_i32 = arith.constant 0 : i32
    %c0_i32_0 = arith.constant 0 : i32
    %c0_i32_1 = arith.constant 0 : i32
    return %c0_i32, %c0_i32_0 : i32, i32
  }
  func.func @transform_18(%arg0: i32) -> (i32, i32) {
    %c0_i32 = arith.constant 0 : i32
    %c0_i32_0 = arith.constant 0 : i32
    %c0_i32_1 = arith.constant 0 : i32
    return %c0_i32, %c0_i32_0 : i32, i32
  }
  func.func @transform_19(%arg0: i32) -> (i32, i32) {
    %c0_i32 = arith.constant 0 : i32
    %c0_i32_0 = arith.constant 0 : i32
    %c0_i32_1 = arith.constant 0 : i32
    return %c0_i32, %c0_i32_0 : i32, i32
  }
  func.func @transform_20(%arg0: i32) -> (i32, i32) {
    %c0_i32 = arith.constant 0 : i32
    %c0_i32_0 = arith.constant 0 : i32
    %c0_i32_1 = arith.constant 0 : i32
    return %c0_i32, %c0_i32_0 : i32, i32
  }
  func.func @transform_21(%arg0: i32) -> (i32, i32) {
    %c0_i32 = arith.constant 0 : i32
    %c0_i32_0 = arith.constant 0 : i32
    %c0_i32_1 = arith.constant 0 : i32
    return %c0_i32, %c0_i32_0 : i32, i32
  }
  func.func @transform_22(%arg0: i32) -> (i32, i32, i32) {
    %c0_i32 = arith.constant 0 : i32
    %c0_i32_0 = arith.constant 0 : i32
    %c0_i32_1 = arith.constant 0 : i32
    %c0_i32_2 = arith.constant 0 : i32
    return %c0_i32, %c0_i32_0, %c0_i32_1 : i32, i32, i32
  }
  func.func @transform_23(%arg0: i32) -> (i32, i32, i32) {
    %c0_i32 = arith.constant 0 : i32
    %c0_i32_0 = arith.constant 0 : i32
    %c0_i32_1 = arith.constant 0 : i32
    %c0_i32_2 = arith.constant 0 : i32
    return %c0_i32, %c0_i32_0, %c0_i32_1 : i32, i32, i32
  }
  func.func @transform_24(%arg0: i32) -> (i32, i32, i32) {
    %c0_i32 = arith.constant 0 : i32
    %c0_i32_0 = arith.constant 0 : i32
    %c0_i32_1 = arith.constant 0 : i32
    %c0_i32_2 = arith.constant 0 : i32
    return %c0_i32, %c0_i32_0, %c0_i32_1 : i32, i32, i32
  }
  func.func @transform_25(%arg0: i32) -> (i32, i32, i32) {
    %c0_i32 = arith.constant 0 : i32
    %c0_i32_0 = arith.constant 0 : i32
    %c0_i32_1 = arith.constant 0 : i32
    %c0_i32_2 = arith.constant 0 : i32
    return %c0_i32, %c0_i32_0, %c0_i32_1 : i32, i32, i32
  }
  func.func @transform_26(%arg0: i32) -> (i32, i32, i32) {
    %c0_i32 = arith.constant 0 : i32
    %c0_i32_0 = arith.constant 0 : i32
    %c0_i32_1 = arith.constant 0 : i32
    %c0_i32_2 = arith.constant 0 : i32
    return %c0_i32, %c0_i32_0, %c0_i32_1 : i32, i32, i32
  }
  func.func @transform_27(%arg0: i32) -> (i32, i32, i32) {
    %c0_i32 = arith.constant 0 : i32
    %c0_i32_0 = arith.constant 0 : i32
    %c0_i32_1 = arith.constant 0 : i32
    %c0_i32_2 = arith.constant 0 : i32
    return %c0_i32, %c0_i32_0, %c0_i32_1 : i32, i32, i32
  }
  func.func @transform_28(%arg0: i32) -> (i32, i32, i32) {
    %c0_i32 = arith.constant 0 : i32
    %c0_i32_0 = arith.constant 0 : i32
    %c0_i32_1 = arith.constant 0 : i32
    %c0_i32_2 = arith.constant 0 : i32
    return %c0_i32, %c0_i32_0, %c0_i32_1 : i32, i32, i32
  }
  func.func @transform_29(%arg0: i32) -> (i32, i32) {
    %c0_i32 = arith.constant 0 : i32
    %c0_i32_0 = arith.constant 0 : i32
    %c0_i32_1 = arith.constant 0 : i32
    return %c0_i32, %c0_i32_0 : i32, i32
  }
  func.func @transform_30(%arg0: i32) -> (i32, i32) {
    %c0_i32 = arith.constant 0 : i32
    %c0_i32_0 = arith.constant 0 : i32
    %c0_i32_1 = arith.constant 0 : i32
    return %c0_i32, %c0_i32_0 : i32, i32
  }
  func.func @transform_31(%arg0: i32) -> (i32, i32) {
    %c0_i32 = arith.constant 0 : i32
    %c0_i32_0 = arith.constant 0 : i32
    %c0_i32_1 = arith.constant 0 : i32
    return %c0_i32, %c0_i32_0 : i32, i32
  }
  func.func @transform_32(%arg0: i32) -> (i32, i32) {
    %c0_i32 = arith.constant 0 : i32
    %c0_i32_0 = arith.constant 0 : i32
    %c0_i32_1 = arith.constant 0 : i32
    return %c0_i32, %c0_i32_0 : i32, i32
  }
  func.func @transform_33(%arg0: i32) -> (i32, i32) {
    %c0_i32 = arith.constant 0 : i32
    %c0_i32_0 = arith.constant 0 : i32
    %c0_i32_1 = arith.constant 0 : i32
    return %c0_i32, %c0_i32_0 : i32, i32
  }
  func.func @transform_34(%arg0: i32) -> (i32, i32) {
    %c0_i32 = arith.constant 0 : i32
    %c0_i32_0 = arith.constant 0 : i32
    %c0_i32_1 = arith.constant 0 : i32
    return %c0_i32, %c0_i32_0 : i32, i32
  }
  func.func @transform_35(%arg0: i32) -> (i32, i32) {
    %c0_i32 = arith.constant 0 : i32
    %c0_i32_0 = arith.constant 0 : i32
    %c0_i32_1 = arith.constant 0 : i32
    return %c0_i32, %c0_i32_0 : i32, i32
  }
  func.func @transform_36(%arg0: i32) -> (i32, i32) {
    %c0_i32 = arith.constant 0 : i32
    %c0_i32_0 = arith.constant 0 : i32
    %c0_i32_1 = arith.constant 0 : i32
    return %c0_i32, %c0_i32_0 : i32, i32
  }
  func.func @transform_37(%arg0: i32) -> (i32, i32) {
    %c0_i32 = arith.constant 0 : i32
    %c0_i32_0 = arith.constant 0 : i32
    %c0_i32_1 = arith.constant 0 : i32
    return %c0_i32, %c0_i32_0 : i32, i32
  }
  func.func @transform_38(%arg0: i32) -> (i32, i32, i32) {
    %c0_i32 = arith.constant 0 : i32
    %c0_i32_0 = arith.constant 0 : i32
    %c0_i32_1 = arith.constant 0 : i32
    return %arg0, %c0_i32, %c0_i32_0 : i32, i32, i32
  }
}

module attributes {stable_mosaic.version = 11 : i64} {
  func.func @_classifier_ce_kernel(%arg0: i32, %arg1: i32, %arg2: i32, %arg3: memref<1x16x64xbf16, #tpu.memory_space<vmem>>, %arg4: memref<128x64xbf16, #tpu.memory_space<vmem>>, %arg5: memref<128x1xf32, #tpu.memory_space<vmem>>, %arg6: memref<1x128x16xf32, #tpu.memory_space<vmem>>, %arg7: memref<1x1x16xf32, #tpu.memory_space<vmem>>, %arg8: memref<1x16xf32, #tpu.memory_space<vmem>>, %arg9: memref<1x16xf32, #tpu.memory_space<vmem>>) attributes {dimension_semantics = [#tpu.dimension_semantics<parallel>, #tpu.dimension_semantics<parallel>, #tpu.dimension_semantics<arbitrary>], iteration_bounds = array<i64: 2, 1, 1>, scalar_prefetch = 0 : i64, scratch_operands = 2 : i64, tpu.core_type = #tpu.core_type<tc>, window_params = [{transform_indices = @transform_0, window_bounds = array<i64: 1, 16, 64>}, {transform_indices = @transform_1, window_bounds = array<i64: 128, 64>}, {transform_indices = @transform_2, window_bounds = array<i64: 128, 1>}, {transform_indices = @transform_3, window_bounds = array<i64: 1, 128, 16>}, {transform_indices = @transform_4, window_bounds = array<i64: 1, 1, 16>}]} {
    %c0_i32 = arith.constant 0 : i32
    %0 = arith.cmpi eq, %arg2, %c0_i32 : i32
    %1 = arith.extui %0 : i1 to i32
    %c0_i32_0 = arith.constant 0 : i32
    %2 = arith.cmpi ne, %1, %c0_i32_0 : i32
    scf.if %2 {
      %cst_24 = arith.constant -1.000000e+30 : f32
      %42 = vector.broadcast %cst_24 : f32 to vector<1x16xf32>
      %c0_25 = arith.constant 0 : index
      %c0_26 = arith.constant 0 : index
      %43 = vector.load %arg8[%c0_25, %c0_26] : memref<1x16xf32, #tpu.memory_space<vmem>>, vector<1x16xf32>
      tpu.vector_store %arg8[%c0_25, %c0_26], %42 {strides = array<i32>} : memref<1x16xf32, #tpu.memory_space<vmem>>, vector<1x16xf32>,
      %cst_27 = arith.constant 0.000000e+00 : f32
      %44 = vector.broadcast %cst_27 : f32 to vector<1x16xf32>
      %c0_28 = arith.constant 0 : index
      %c0_29 = arith.constant 0 : index
      %45 = vector.load %arg9[%c0_28, %c0_29] : memref<1x16xf32, #tpu.memory_space<vmem>>, vector<1x16xf32>
      tpu.vector_store %arg9[%c0_28, %c0_29], %44 {strides = array<i32>} : memref<1x16xf32, #tpu.memory_space<vmem>>, vector<1x16xf32>,
    } else {
    }
    %c0 = arith.constant 0 : index
    %c0_1 = arith.constant 0 : index
    %3 = vector.load %arg4[%c0, %c0_1] : memref<128x64xbf16, #tpu.memory_space<vmem>>, vector<128x64xbf16>
    %c0_2 = arith.constant 0 : index
    %c0_3 = arith.constant 0 : index
    %c0_4 = arith.constant 0 : index
    %4 = vector.load %arg3[%c0_2, %c0_3, %c0_4] : memref<1x16x64xbf16, #tpu.memory_space<vmem>>, vector<1x16x64xbf16>
    %5 = vector.shape_cast %4 : vector<1x16x64xbf16> to vector<16x64xbf16>
    %cst = arith.constant dense<0.000000e+00> : vector<128x16xf32>
    %6 = tpu.matmul %3, %5, %cst {dimension_numbers = #tpu.dot_dimension_numbers<[1], [1], [0], [0], [0, 0, 1, 0], [], []>} : vector<128x64xbf16>, vector<16x64xbf16>, vector<128x16xf32> -> vector<128x16xf32>
    %c0_5 = arith.constant 0 : index
    %c0_6 = arith.constant 0 : index
    %7 = vector.load %arg5[%c0_5, %c0_6] : memref<128x1xf32, #tpu.memory_space<vmem>>, vector<128x1xf32>
    %8 = vector.broadcast %7 : vector<128x1xf32> to vector<128x16xf32>
    %9 = arith.addf %6, %8 : vector<128x16xf32>
    %c0_7 = arith.constant 0 : index
    %c0_8 = arith.constant 0 : index
    %c0_9 = arith.constant 0 : index
    %10 = vector.load %arg6[%c0_7, %c0_8, %c0_9] : memref<1x128x16xf32, #tpu.memory_space<vmem>>, vector<1x128x16xf32>
    %11 = vector.shape_cast %10 : vector<1x128x16xf32> to vector<128x16xf32>
    %12 = vector.shape_cast %9 : vector<128x16xf32> to vector<1x128x16xf32>
    tpu.vector_store %arg6[%c0_7, %c0_8, %c0_9], %12 {strides = array<i32>} : memref<1x128x16xf32, #tpu.memory_space<vmem>>, vector<1x128x16xf32>,
    %c128_i32 = arith.constant 128 : i32
    %13 = arith.muli %arg2, %c128_i32 : i32
    %14 = tpu.iota {dimensions = array<i32: 0>} : vector<128x1xi32>
    %15 = vector.broadcast %13 : i32 to vector<128x1xi32>
    %16 = arith.addi %15, %14 : vector<128x1xi32>
    %c128_i32_10 = arith.constant 128 : i32
    %17 = vector.broadcast %c128_i32_10 : i32 to vector<128x1xi32>
    %18 = arith.cmpi slt, %16, %17 : vector<128x1xi32>
    %cst_11 = arith.constant -1.000000e+30 : f32
    %19 = vector.shape_cast %18 : vector<128x1xi1> to vector<128x1xi1>
    %20 = vector.broadcast %19 : vector<128x1xi1> to vector<128x16xi1>
    %21 = vector.broadcast %cst_11 : f32 to vector<128x16xf32>
    %22 = arith.select %20, %9, %21 : vector<128x16xi1>, vector<128x16xf32>
    %c0_12 = arith.constant 0 : index
    %c0_13 = arith.constant 0 : index
    %23 = vector.load %arg8[%c0_12, %c0_13] : memref<1x16xf32, #tpu.memory_space<vmem>>, vector<1x16xf32>
    %cst_14 = arith.constant dense<0xFF800000> : vector<16xf32>
    %24 = vector.multi_reduction <maximumf>, %22, %cst_14 [0] : vector<128x16xf32> to vector<16xf32>
    %25 = vector.shape_cast %24 : vector<16xf32> to vector<1x16xf32>
    %26 = arith.maximumf %23, %25 : vector<1x16xf32>
    %c0_15 = arith.constant 0 : index
    %c0_16 = arith.constant 0 : index
    %27 = vector.load %arg9[%c0_15, %c0_16] : memref<1x16xf32, #tpu.memory_space<vmem>>, vector<1x16xf32>
    %28 = arith.subf %23, %26 : vector<1x16xf32>
    %29 = math.exp %28 : vector<1x16xf32>
    %30 = arith.mulf %27, %29 : vector<1x16xf32>
    %31 = vector.broadcast %26 : vector<1x16xf32> to vector<128x16xf32>
    %32 = arith.subf %22, %31 : vector<128x16xf32>
    %33 = math.exp %32 : vector<128x16xf32>
    %cst_17 = arith.constant dense<0.000000e+00> : vector<16xf32>
    %34 = vector.multi_reduction <add>, %33, %cst_17 [0] : vector<128x16xf32> to vector<16xf32>
    %35 = vector.shape_cast %34 : vector<16xf32> to vector<1x16xf32>
    %36 = arith.addf %30, %35 : vector<1x16xf32>
    %c0_18 = arith.constant 0 : index
    %c0_19 = arith.constant 0 : index
    %37 = vector.load %arg9[%c0_18, %c0_19] : memref<1x16xf32, #tpu.memory_space<vmem>>, vector<1x16xf32>
    tpu.vector_store %arg9[%c0_18, %c0_19], %36 {strides = array<i32>} : memref<1x16xf32, #tpu.memory_space<vmem>>, vector<1x16xf32>,
    %c0_20 = arith.constant 0 : index
    %c0_21 = arith.constant 0 : index
    %38 = vector.load %arg8[%c0_20, %c0_21] : memref<1x16xf32, #tpu.memory_space<vmem>>, vector<1x16xf32>
    tpu.vector_store %arg8[%c0_20, %c0_21], %26 {strides = array<i32>} : memref<1x16xf32, #tpu.memory_space<vmem>>, vector<1x16xf32>,
    %c0_i32_22 = arith.constant 0 : i32
    %39 = arith.cmpi eq, %arg2, %c0_i32_22 : i32
    %40 = arith.extui %39 : i1 to i32
    %c0_i32_23 = arith.constant 0 : i32
    %41 = arith.cmpi ne, %40, %c0_i32_23 : i32
    scf.if %41 {
      %c0_24 = arith.constant 0 : index
      %c0_25 = arith.constant 0 : index
      %42 = vector.load %arg8[%c0_24, %c0_25] : memref<1x16xf32, #tpu.memory_space<vmem>>, vector<1x16xf32>
      %c0_26 = arith.constant 0 : index
      %c0_27 = arith.constant 0 : index
      %43 = vector.load %arg9[%c0_26, %c0_27] : memref<1x16xf32, #tpu.memory_space<vmem>>, vector<1x16xf32>
      %44 = math.log %43 : vector<1x16xf32>
      %45 = arith.addf %42, %44 : vector<1x16xf32>
      %c0_28 = arith.constant 0 : index
      %c0_29 = arith.constant 0 : index
      %c0_30 = arith.constant 0 : index
      %46 = vector.load %arg7[%c0_28, %c0_29, %c0_30] : memref<1x1x16xf32, #tpu.memory_space<vmem>>, vector<1x1x16xf32>
      %47 = vector.shape_cast %46 : vector<1x1x16xf32> to vector<1x16xf32>
      %48 = vector.shape_cast %45 : vector<1x16xf32> to vector<1x1x16xf32>
      tpu.vector_store %arg7[%c0_28, %c0_29, %c0_30], %48 {strides = array<i32>} : memref<1x1x16xf32, #tpu.memory_space<vmem>>, vector<1x1x16xf32>,
    } else {
    }
    return
  }
  func.func @transform_0(%arg0: i32, %arg1: i32, %arg2: i32) -> (i32, i32, i32) {
    %c0_i32 = arith.constant 0 : i32
    %c0_i32_0 = arith.constant 0 : i32
    return %arg0, %arg1, %c0_i32 : i32, i32, i32
  }
  func.func @transform_1(%arg0: i32, %arg1: i32, %arg2: i32) -> (i32, i32) {
    %c0_i32 = arith.constant 0 : i32
    %c0_i32_0 = arith.constant 0 : i32
    return %arg2, %c0_i32 : i32, i32
  }
  func.func @transform_2(%arg0: i32, %arg1: i32, %arg2: i32) -> (i32, i32) {
    %c0_i32 = arith.constant 0 : i32
    %c0_i32_0 = arith.constant 0 : i32
    return %arg2, %c0_i32 : i32, i32
  }
  func.func @transform_3(%arg0: i32, %arg1: i32, %arg2: i32) -> (i32, i32, i32) {
    %c0_i32 = arith.constant 0 : i32
    return %arg0, %arg2, %arg1 : i32, i32, i32
  }
  func.func @transform_4(%arg0: i32, %arg1: i32, %arg2: i32) -> (i32, i32, i32) {
    %c0_i32 = arith.constant 0 : i32
    %c0_i32_0 = arith.constant 0 : i32
    return %arg0, %c0_i32, %arg1 : i32, i32, i32
  }
}

module attributes {stable_mosaic.version = 11 : i64} {
  func.func @_classifier_lp_kernel(%arg0: i32, %arg1: i32, %arg2: i32, %arg3: memref<1x16x64xbf16, #tpu.memory_space<vmem>>, %arg4: memref<64x128xbf16, #tpu.memory_space<vmem>>, %arg5: memref<1x128xf32, #tpu.memory_space<vmem>>, %arg6: memref<1x16x1xf32, #tpu.memory_space<vmem>>, %arg7: memref<1x16x128xf32, #tpu.memory_space<vmem>>) attributes {dimension_semantics = [#tpu.dimension_semantics<parallel>, #tpu.dimension_semantics<parallel>, #tpu.dimension_semantics<parallel>], iteration_bounds = array<i64: 2, 1, 1>, scalar_prefetch = 0 : i64, scratch_operands = 0 : i64, tpu.core_type = #tpu.core_type<tc>, window_params = [{transform_indices = @transform_0, window_bounds = array<i64: 1, 16, 64>}, {transform_indices = @transform_1, window_bounds = array<i64: 64, 128>}, {transform_indices = @transform_2, window_bounds = array<i64: 1, 128>}, {transform_indices = @transform_3, window_bounds = array<i64: 1, 16, 1>}, {transform_indices = @transform_4, window_bounds = array<i64: 1, 16, 128>}]} {
    %c0 = arith.constant 0 : index
    %c0_0 = arith.constant 0 : index
    %c0_1 = arith.constant 0 : index
    %0 = vector.load %arg3[%c0, %c0_0, %c0_1] : memref<1x16x64xbf16, #tpu.memory_space<vmem>>, vector<1x16x64xbf16>
    %1 = vector.shape_cast %0 : vector<1x16x64xbf16> to vector<16x64xbf16>
    %c0_2 = arith.constant 0 : index
    %c0_3 = arith.constant 0 : index
    %2 = vector.load %arg4[%c0_2, %c0_3] : memref<64x128xbf16, #tpu.memory_space<vmem>>, vector<64x128xbf16>
    %cst = arith.constant dense<0.000000e+00> : vector<16x128xf32>
    %3 = tpu.matmul %1, %2, %cst {dimension_numbers = #tpu.dot_dimension_numbers<[1], [0], [0], [1], [0, 0, 1, 1], [], []>} : vector<16x64xbf16>, vector<64x128xbf16>, vector<16x128xf32> -> vector<16x128xf32>
    %c0_4 = arith.constant 0 : index
    %c0_5 = arith.constant 0 : index
    %4 = vector.load %arg5[%c0_4, %c0_5] : memref<1x128xf32, #tpu.memory_space<vmem>>, vector<1x128xf32>
    %5 = vector.broadcast %4 : vector<1x128xf32> to vector<16x128xf32>
    %6 = arith.addf %3, %5 : vector<16x128xf32>
    %c0_6 = arith.constant 0 : index
    %c0_7 = arith.constant 0 : index
    %c0_8 = arith.constant 0 : index
    %7 = vector.load %arg6[%c0_6, %c0_7, %c0_8] : memref<1x16x1xf32, #tpu.memory_space<vmem>>, vector<1x16x1xf32>
    %8 = vector.shape_cast %7 : vector<1x16x1xf32> to vector<16x1xf32>
    %9 = vector.broadcast %8 : vector<16x1xf32> to vector<16x128xf32>
    %10 = arith.subf %6, %9 : vector<16x128xf32>
    %c0_9 = arith.constant 0 : index
    %c0_10 = arith.constant 0 : index
    %c0_11 = arith.constant 0 : index
    %11 = vector.load %arg7[%c0_9, %c0_10, %c0_11] : memref<1x16x128xf32, #tpu.memory_space<vmem>>, vector<1x16x128xf32>
    %12 = vector.shape_cast %11 : vector<1x16x128xf32> to vector<16x128xf32>
    %13 = vector.shape_cast %10 : vector<16x128xf32> to vector<1x16x128xf32>
    tpu.vector_store %arg7[%c0_9, %c0_10, %c0_11], %13 {strides = array<i32>} : memref<1x16x128xf32, #tpu.memory_space<vmem>>, vector<1x16x128xf32>,
    return
  }
  func.func @transform_0(%arg0: i32, %arg1: i32, %arg2: i32) -> (i32, i32, i32) {
    %c0_i32 = arith.constant 0 : i32
    %c0_i32_0 = arith.constant 0 : i32
    return %arg0, %arg1, %c0_i32 : i32, i32, i32
  }
  func.func @transform_1(%arg0: i32, %arg1: i32, %arg2: i32) -> (i32, i32) {
    %c0_i32 = arith.constant 0 : i32
    %c0_i32_0 = arith.constant 0 : i32
    return %c0_i32, %arg2 : i32, i32
  }
  func.func @transform_2(%arg0: i32, %arg1: i32, %arg2: i32) -> (i32, i32) {
    %c0_i32 = arith.constant 0 : i32
    %c0_i32_0 = arith.constant 0 : i32
    return %c0_i32, %arg2 : i32, i32
  }
  func.func @transform_3(%arg0: i32, %arg1: i32, %arg2: i32) -> (i32, i32, i32) {
    %c0_i32 = arith.constant 0 : i32
    %c0_i32_0 = arith.constant 0 : i32
    return %arg0, %arg1, %c0_i32 : i32, i32, i32
  }
  func.func @transform_4(%arg0: i32, %arg1: i32, %arg2: i32) -> (i32, i32, i32) {
    %c0_i32 = arith.constant 0 : i32
    return %arg0, %arg1, %arg2 : i32, i32, i32
  }
}

</mosaic_0001>

<bundles_post_ra>
// kernel: tpu_custom_call.1
= control target key start
LH: loop header
LB: loop body
LE: loop exit
PB: predicated region body
PF: predicated region fallthrough
CT: control target
= control target key end

     0   :  { %6 = vsyncpa [#allocation3], 0  ;;  %s125_s0 = inlined_call_operand.hbm [shape: f32[8,128], index: 0, kind: input, shape index: {}]   ;;  %s126_s1 = inlined_call_operand.hbm [shape: f32[8,128], index: 1, kind: output, shape index: {}]  }
   0x1   :  { %7 = vsyncpa [#allocation4], 0  ;;  %s89_s6 = smov [#allocation2]   ;;  %s41_s10 = scalar_lea.hbm %s125_s0, 128 }
   0x2   :  { %s14_s7 = sshll.u32 %s89_s6, 4  ;;  %p42_p0 = scmp.ne.s32.totalorder %s125_s0, %s41_s10  ;;  %s15_s7 = int_to_ptr.vmem [resolvable:$true] %s14_s7 }
   0x3   :  { %p45_p1 = scmp.lt.u32.totalorder %s41_s10, %s125_s0 }
   0x5   :  { %p47_p2 = pnand %p45_p1, %p42_p0 }
   0x7   :  { %50 = shalt.err (!%p47_p2)
}
   0x8   :  { %s51_s15 = scalar_lea.vmem %s15_s7, 128  ;;  %p56_p4 = scmp.lt.s32.totalorder %s15_s7, %s15_s7 }
   0x9   :  { %p52_p3 = scmp.ne.s32.totalorder %s15_s7, %s51_s15  ;;  %p57_p5 = scmp.lt.s32.totalorder %s51_s15, %s51_s15 }
   0xb   :  { %p58_p6 = por %p57_p5, %p56_p4 }
   0xd   :  { %p59_p7 = pnand %p58_p6, %p52_p3 }
   0xf   :  { %62 = shalt.err (!%p59_p7)
}
  0x10   :  { %17 = dma.hbm_to_vmem [thread:$0]  %s125_s0, 128, %s15_s7, [#allocation3]  }
  0x11   :  { %85 = dma.done.wait [#allocation3], 128  }
  0x12   :  { %86 = vsyncadd [#allocation3], 4294967168  ;;  %s90_s18 = smov [#allocation5]   ;;  %v21_v0 = vld [vmem:[#allocation2] sm:$0xff] }
  0x13   :  { %s30_s19 = sshll.u32 %s90_s18, 4  ;;  %v22_v1 = vrot.slane %v21_v0, 7  ;;  %s31_s19 = int_to_ptr.vmem [resolvable:$true] %s30_s19 }
  0x14   :  { %s63_s20 = scalar_lea.vmem %s31_s19, 128  ;;  %p68_p9 = scmp.lt.s32.totalorder %s31_s19, %s31_s19 }
  0x15   :  { %23 = vst [vmem:[#allocation5] sm:$0xff] %v22_v1  ;;  %p64_p8 = scmp.ne.s32.totalorder %s31_s19, %s63_s20  ;;  %p69_p10 = scmp.lt.s32.totalorder %s63_s20, %s63_s20 }
  0x17   :  { %p70_p11 = por %p69_p10, %p68_p9 }
  0x19   :  { %p71_p12 = pnand %p70_p11, %p64_p8 }
  0x1b   :  { %74 = shalt.err (!%p71_p12)
}
  0x1c   :  { %s75_s23 = scalar_lea.hbm %s126_s1, 128 }
  0x1d   :  { %p76_p13 = scmp.ne.s32.totalorder %s126_s1, %s75_s23  ;;  %p79_p0 = scmp.lt.u32.totalorder %s75_s23, %s126_s1 }
  0x1f   :  { %p81_p1 = pnand %p79_p0, %p76_p13 }
  0x21   :  { %84 = shalt.err (!%p81_p1)
}
  0x22   :  { %33 = dma.vmem_to_hbm [thread:$0]  %s31_s19, 128, %s126_s1, [#allocation4]  }
  0x23   :  { %87 = dma.done.wait [#allocation4], 128  }
  0x24   :  { %88 = vsyncadd [#allocation4], 4294967168 }
  0x25   :  { %37 = vsyncpa [#allocation3], 1 }
  0x26   :  { %38 = vsyncpa [#allocation4], 1 }

// kernel: tpu_custom_call.1
= control target key start
LH: loop header
LB: loop body
LE: loop exit
PB: predicated region body
PF: predicated region fallthrough
CT: control target
= control target key end

     0   :  { %7 = vsyncpa [#allocation3], 0  ;;  %s690_s0 = inlined_call_operand.hbm [shape: f32[16,128], index: 0, kind: input, shape index: {}]   ;;  %s691_s1 = inlined_call_operand.hbm [shape: f32[8,128], index: 1, kind: input, shape index: {}]   ;;  %s692_s2 = inlined_call_operand.hbm [shape: f32[16,128], index: 2, kind: output, shape index: {}]  }
   0x1   :  { %9 = vsyncpa [#allocation3 + $0x1], 0 }
   0x2   :  { %10 = vsyncpa [#allocation6], 0 }
   0x3   :  { %11 = vsyncpa [#allocation4], 0 }
   0x4   :  { %13 = vsyncpa [#allocation4 + $0x1], 0  ;;  %s489_s9 = smov 0   ;;  %s491_s10 = smov 0  }
   0x5   :  { %s493_s11 = smov 0   ;;  %s495_s12 = smov 0  }
   0x6 LB: > { %s510_s13 = sadd.s32 4294967295, %s469_s12   ;;  %s270_s14 = sadd.s32 4294967294, %s469_s12   ;;  %s469_s12 = sphi %s495_s12, %s716_s12   ;;  %s465_s11 = sphi %s493_s11, %s715_s11   ;;  %s461_s10 = sphi %s491_s10, %s714_s10   ;;  %s457_s9 = sphi %s489_s9, %s713_s9  }
   0x7   : > { %p39_p0 = scmp.ne.s32.totalorder %s461_s10, %s457_s9  ;;  %p693_p1 = scmp.eq.s32.totalorder %s510_s13, 0 }
   0x8   : > { %p90_p3 = scmp.eq.s32.totalorder %s270_s14, 1  ;;  %p271_p5 = scmp.ge.s32.totalorder %s469_s12, 1 }
   0x9   : > { %p519_p4 = por %p693_p1, %p39_p0  ;;  %p97_p7 = scmp.lt.s32.totalorder %s469_s12, 3 }
   0xa   : > { %p524_p6 = por %p90_p3, %p39_p0  ;;  %s471_s18 = smov [#allocation5]  }
   0xb   : > { %s696_s15 = scalar_select %p519_p4, 1, 0 }
   0xc   : > { %s697_s16 = scalar_select %p524_p6, 1, 0 }
   0xd   : > { %p529_p8 = pnand %p271_p5, %p97_p7  ;;  %s110_s19 = sshll.u32 %s471_s18, 4  ;;  %s111_s19 = int_to_ptr.vmem [resolvable:$true] %s110_s19 }
   0xe   : > { %s537_s20 = sadd.s32 1, %s469_s12   ;;  %s26_s24 = sadd.s32 1, %s465_s11 }
   0xf   : > { %s698_s17 = scalar_select %p529_p8, 1, 0 }
  0x10   : > { %p292_p10 = pneg %p529_p8  ;;  %s23_s22 = ssub.s32 %s469_s12, %s537_s20 }
  0x11   : > { %p547_p12 = scmp.eq.s32.totalorder %s23_s22, 0  ;;  %s341_s27 = scalar_lea.hbm %s691_s1, 128 }
  0x12   : > { %p541_p11 = pnand %p292_p10, %p693_p1  ;;  %p342_p0 = scmp.ne.s32.totalorder %s691_s1, %s341_s27 }
  0x13   : > { %s700_s23 = scalar_select %p547_p12, 1, 0 }
  0x14   : > { %p343_p3 = pneg %p541_p11  ;;  %p348_p10 = scmp.lt.u32.totalorder %s341_s27, %s691_s1 }
  0x16   : > { %p344_p5 = pnand %p343_p3, %p342_p0 }
  0x18   : > { %p345_p7 = pneg %p344_p5 }
  0x1a   : > { %p350_p9 = pnand %p348_p10, %p345_p7 }
  0x1c   : > { %353 = shalt.err (!%p350_p9)
}
  0x1d   : > { %s354_s4 = scalar_lea.vmem %s111_s19, 128  ;;  %p362_p6 = scmp.lt.s32.totalorder %s111_s19, %s111_s19 }
  0x1e   : > { %p355_p1 = scmp.ne.s32.totalorder %s111_s19, %s354_s4  ;;  %p363_p4 = scmp.lt.s32.totalorder %s354_s4, %s354_s4 }
  0x20   : > { %p357_p2 = pnand %p355_p1, %p343_p3  ;;  %p364_p8 = por %p363_p4, %p362_p6 }
  0x22   : > { %p358_p13 = pneg %p357_p2 }
  0x24   : > { %p365_p12 = pnand %p364_p8, %p358_p13 }
  0x26   : > { %368 = shalt.err (!%p365_p12)
}
  0x27   : > { %295 = dma.hbm_to_vmem [thread:$0]  (!%p541_p11), %s691_s1, 128, %s111_s19, [#allocation6]  }
  0x28   : > { %p701_p1 = scmp.ne.s32.totalorder %s700_s23, 0  ;;  %p34_p2 = scmp.eq.s32.totalorder %s469_s12, 0 }
  0x29   : > { %p702_p4 = scmp.ne.s32.totalorder %s465_s11, %s461_s10  ;;  %p703_p6 = scmp.eq.s32.totalorder %s510_s13, 1 }
  0x2a   : > { %s573_s7 = scalar_select %p701_p1, %s465_s11, %s26_s24  }
  0x2b   : > { %p581_p8 = por %p703_p6, %p702_p4  ;;  %p305_p9 = scmp.lt.s32.totalorder %s469_s12, 2 }
  0x2c   : > { %s121_s14 = sand.u32 1, %s465_s11   ;;  %p705_p12 = pmov %p702_p4 }
  0x2d   : > { %s274_s18 = sshll.u32 %s121_s14, 3  ;;  %s275_s21 = sshll.u32 %s469_s12, 7 }
  0x2e   : > { %p35_p13 = por %p34_p2, %p705_p12  ;;  %s594_s19 = scalar_lea.hbm %s690_s0, %s275_s21 }
  0x2f   : > { %s125_s23 = scalar_lea.vmem [#allocation2], %s274_s18  ;;  %s122_s27 = scalar_lea.sflag [#allocation3], %s121_s14 }
  0x30   : > { %s132_s24 = sshll.u32 %s125_s23, 4  ;;  %p596_p11 = pnand %p305_p9, %p35_p13  ;;  %s600_s24 = int_to_ptr.vmem [resolvable:$true] %s132_s24 }
  0x31   : > { %s369_s28 = scalar_lea.hbm %s594_s19, 128  ;;  %s374_s3 = scalar_lea.hbm %s690_s0, 256 }
  0x32   : > { %p370_p0 = scmp.ne.s32.totalorder %s594_s19, %s369_s28  ;;  %p371_p3 = pneg %p596_p11 }
  0x33   : > { %p375_p10 = scmp.lt.u32.totalorder %s594_s19, %s690_s0  ;;  %p376_p1 = scmp.lt.u32.totalorder %s374_s3, %s369_s28 }
  0x34   : > { %p372_p5 = pnand %p371_p3, %p370_p0  ;;  %p378_p4 = scmp.lt.u32.totalorder %s369_s28, %s594_s19 }
  0x35   : > { %p377_p2 = por %p376_p1, %p375_p10 }
  0x36   : > { %p373_p7 = pneg %p372_p5 }
  0x37   : > { %p379_p6 = por %p378_p4, %p377_p2 }
  0x39   : > { %p380_p9 = pnand %p379_p6, %p373_p7 }
  0x3b   : > { %383 = shalt.err (!%p380_p9)
}
  0x3c   : > { %s384_s6 = scalar_lea.vmem %s600_s24, 128  ;;  %s472_s14 = smov [#allocation2]  }
  0x3d   : > { %p385_p12 = scmp.ne.s32.totalorder %s600_s24, %s384_s6  ;;  %s389_s18 = sshll.u32 %s472_s14, 4  ;;  %s390_s18 = int_to_ptr.vmem [resolvable:$false] %s389_s18 }
  0x3e   : > { %s391_s21 = scalar_lea.vmem %s390_s18, 256  ;;  %p392_p5 = scmp.lt.s32.totalorder %s600_s24, %s390_s18 }
  0x3f   : > { %p387_p13 = pnand %p385_p12, %p371_p3  ;;  %p393_p10 = scmp.lt.s32.totalorder %s391_s21, %s384_s6 }
  0x41   : > { %p388_p0 = pneg %p387_p13  ;;  %p394_p1 = por %p393_p10, %p392_p5 }
  0x43   : > { %p395_p2 = pnand %p394_p1, %p388_p0 }
  0x45   : > { %398 = shalt.err (!%p395_p2)
}
  0x46   : > { %299 = dma.hbm_to_vmem [thread:$0]  (!%p596_p11), %s594_s19, 128, %s600_s24, %s122_s27  }
  0x47   : > { %p707_p7 = scmp.ne.s32.totalorder %s698_s17, 0 }
  0x48   : > { %s630_s22 = sand.u32 (!%p707_p7), 1, %s461_s10   ;;  %p708_p3 = scmp.ne.s32.totalorder (!%p707_p7), %s696_s15, 0 }
  0x49   : > { %141 = sbr.rel (%p707_p7) target bundleno = 109 (0x6d), region = 28  ;;  %s277_s25 = sshll.u32 (!%p707_p7), %s630_s22, 3 }
  0x4a   : > { %s144_s23 = scalar_lea.sflag (!%p707_p7), [#allocation3], %s630_s22  ;;  %s147_s28 = scalar_lea.vmem (!%p707_p7), [#allocation2], %s277_s25 }
  0x50   : > { %444 = dma.done.wait (%p708_p3), %s144_s23, 128  }
  0x51   : > { %446 = vsyncadd (%p708_p3), %s144_s23, 4294967168  ;;  %p709_p4 = scmp.eq.s32.totalorder %s510_s13, 0 }
  0x53   : > { %448 = dma.done.wait (%p709_p4), [#allocation6], 128   ;;  %p710_p11 = pmov %p709_p4 }
  0x54   : > { %s171_s17 = scalar_lea.vmem [#allocation7], %s277_s25  ;;  %s281_s24 = sshll.u32 %s510_s13, 7  ;;  %v172_v0 = vld [vmem:[%s147_s28] sm:$0xff]  ;;  %v173_v1 = vld [vmem:[#allocation5] sm:$0xff] }
  0x55   : > { %450 = vsyncadd (%p710_p11), [#allocation6], 4294967168  ;;  %s190_s19 = sshll.u32 %s171_s17, 4  ;;  %v174_v2 = vadd.f32 %v173_v1, %v172_v0  ;;  %s648_s27 = scalar_lea.hbm %s692_s2, %s281_s24  ;;  %s643_s19 = int_to_ptr.vmem [resolvable:$true] %s190_s19 }
  0x56   : > { %s177_s29 = scalar_lea.sflag [#allocation4], %s630_s22  ;;  %s399_s30 = scalar_lea.vmem %s643_s19, 128 }
  0x57   : > { %175 = vst [vmem:[%s171_s17] sm:$0xff] %v174_v2  ;;  %p400_p6 = scmp.ne.s32.totalorder %s643_s19, %s399_s30  ;;  %s473_s13 = smov [#allocation7]  }
  0x58   : > { %s403_s3 = sshll.u32 %s473_s13, 4  ;;  %s404_s3 = int_to_ptr.vmem [resolvable:$false] %s403_s3 }
  0x59   : > { %p401_p9 = pnand %p400_p6, %p581_p8  ;;  %s405_s4 = scalar_lea.vmem %s404_s3, 256 }
  0x5a   : > { %p406_p13 = scmp.lt.s32.totalorder %s643_s19, %s404_s3  ;;  %p407_p0 = scmp.lt.s32.totalorder %s405_s4, %s399_s30 }
  0x5b   : > { %p402_p12 = pneg %p401_p9 }
  0x5c   : > { %p408_p5 = por %p407_p0, %p406_p13 }
  0x5e   : > { %p409_p10 = pnand %p408_p5, %p402_p12 }
  0x60   : > { %412 = shalt.err (!%p409_p10)
}
  0x61   : > { %s413_s5 = scalar_lea.hbm %s648_s27, 128  ;;  %s417_s18 = scalar_lea.hbm %s692_s2, 256 }
  0x62   : > { %p414_p1 = scmp.ne.s32.totalorder %s648_s27, %s413_s5  ;;  %p418_p3 = scmp.lt.u32.totalorder %s648_s27, %s692_s2 }
  0x63   : > { %p419_p4 = scmp.lt.u32.totalorder %s417_s18, %s413_s5  ;;  %p421_p6 = scmp.lt.u32.totalorder %s413_s5, %s648_s27 }
  0x64   : > { %p415_p2 = pnand %p414_p1, %p581_p8 }
  0x65   : > { %p420_p11 = por %p419_p4, %p418_p3 }
  0x66   : > { %p416_p7 = pneg %p415_p2 }
  0x67   : > { %p422_p9 = por %p421_p6, %p420_p11 }
  0x69   : > { %p423_p12 = pnand %p422_p9, %p416_p7 }
  0x6b   : > { %426 = shalt.err (!%p423_p12)
}
  0x6c   : > { %290 = dma.vmem_to_hbm [thread:$0]  (%p581_p8), %s643_s19, 128, %s648_s27, %s177_s29  }
  0x6d PF: > { %s202_s25 = sand.u32 1, %s457_s9   ;;  %p711_p13 = scmp.ne.s32.totalorder %s697_s16, 0 }
  0x6e   : > { %p712_p0 = scmp.ge.s32.totalorder %s469_s12, 2  ;;  %s203_s23 = scalar_lea.sflag [#allocation4], %s202_s25 }
  0x70   : > { %p301_p5 = pnand %p712_p0, %p711_p13 }
  0x72   : > { %452 = dma.done.wait (!%p301_p5), %s203_s23, 128  }
  0x73   : > { %454 = vsyncadd (!%p301_p5), %s203_s23, 4294967168  ;;  %p16_p10 = scmp.ge.s32.totalorder %s537_s20, 4   ;;  %s713_s9 = smov %s461_s10 }
  0x74   : > { %s714_s10 = smov %s465_s11  ;;  %s715_s11 = smov %s573_s7 }
  0x75   : > { %s716_s12 = smov %s537_s20  ;;  %18 = sbr.rel (!%p16_p10) target bundleno = 6 (0x6), region = 77 }
  0x7c   :  { %208 = vsyncpa [#allocation3], 1 }
  0x7d   :  { %210 = vsyncpa [#allocation3 + $0x1], 1 }
  0x7e   :  { %211 = vsyncpa [#allocation6], 1 }
  0x7f   :  { %212 = vsyncpa [#allocation4], 1 }
  0x80   :  { %214 = vsyncpa [#allocation4 + $0x1], 1 }

// kernel: model_forward.7
= control target key start
LH: loop header
LB: loop body
LE: loop exit
PB: predicated region body
PF: predicated region fallthrough
CT: control target
= control target key end

     0   :  { %vm56_vm0 = vcmask 408576   ;;  %vm63_vm1 = vcmask 1040384   ;;  %vm132_vm2 = vcmask 519168   ;;  %s238_s1 = inlined_call_operand.vmem [shape: bf16[50,64], index: 1, kind: input, shape index: {}]   ;;  %s239_s0 = inlined_call_operand.vmem [shape: f32[32,50], index: 0, kind: input, shape index: {}]   ;;  %s240_s2 = inlined_call_operand.vmem [shape: f32[1,64], index: 2, kind: input, shape index: {}]   ;;  %s241_s3 = inlined_call_operand.vmem [shape: bf16[32,64], index: 3, kind: output, shape index: {}]  }
   0x1   :  { %v175_v0 = vld [vmem:[%s238_s1] sm:$0xff]   ;;  %v176_v1 = vld [vmem:[%s238_s1 + $0x8] sm:$0xff]   ;;  %v177_v3 = vld [vmem:[%s238_s1 + $0x10] sm:$0xff]  }
   0x2   :  { %162 = vmatprep.subr.bf16.mxu0 %v175_v0  ;;  %v15_v2 = vld [vmem:[%s239_s0] sm:$0xff]  ;;  %v16_v4 = vld [vmem:[%s239_s0 + $0x8] sm:$0xff]  ;;  %v178_v6 = vld [vmem:[%s238_s1 + $0x18] ss:$0 sps:$4 sm:$0x11]  }
   0x3   :  { %163 = vmatpush3.bf16.msra.mxu0 %v175_v0  ;;  %v19_v5 = vpack.c.bf16 %v16_v4, %v15_v2  ;;  %v17_v7 = vld [vmem:[%s239_s0 + $0x10] sm:$0xff]  ;;  %v18_v8 = vld [vmem:[%s239_s0 + $0x18] sm:$0xff]  ;;  %v65_v9 = vsel %vm63_vm1, %v178_v6, 0  ;;  %v141_v11 = vld [vmem:[%s240_s2] ss:$0 sm:$0xff] }
   0x4   :  { %164 = vmatprep.subr.bf16.mxu0 %v176_v1  ;;  %v20_v10 = vpack.c.bf16 %v18_v8, %v17_v7 }
   0x5   :  { %170 = vmatprep.mubr.msk.bf16.mxu0 %vm56_vm0, %v19_v5 }
   0x7   :  { %165 = vmatpush3.bf16.msra.mxu0 %v176_v1 }
   0x8   :  { %166 = vmatprep.subr.bf16.mxu0 %v177_v3 }
   0xb   :  { %167 = vmatpush3.bf16.msra.mxu0 %v177_v3 }
   0xc   :  { %174 = vmatprep.subr.msk.bf16.mxu0 %vm63_vm1, %v178_v6 }
   0xf   :  { %169 = vmatpush3.bf16.msra.mxu0 %v65_v9 }
  0x12   :  { %171 = vmatmul.mubr.msk.bf16.vlgmr.msra.gmra.mrb[0].mxu0 %vm56_vm0, %v20_v10 }
  0xe5   :  { %v172_v12 = vpop.f32.mrb[0].mxu0 }
  0xe6   :  { %v110_v13 = vadd.f32 %v172_v12, %v141_v11  ;;  %v101_v14 = vpop.f32.mrb[1].mxu0 }
  0xe7   :  { %v102_v15 = vadd.f32 %v141_v11, %v101_v14  ;;  %v173_v16 = vpop.f32.mrb[2].mxu0 }
  0xe8   :  { %v154_v17 = vpack.c.bf16 %v110_v13, %v110_v13  ;;  %v113_v18 = vadd.f32 %v173_v16, %v141_v11  ;;  %v104_v19 = vpop.f32.mrb[3].mxu0 }
  0xe9   :  { %v152_v20 = vpack.c.bf16 %v102_v15, %v102_v15  ;;  %v105_v21 = vadd.f32 %v141_v11, %v104_v19 }
  0xea   :  { %135 = vst.msk [vmem:[%s241_s3 + $0x8] sm:$0xf] %vm132_vm2, %v154_v17  ;;  %v155_v22 = vpack.c.bf16 %v113_v18, %v113_v18 }
  0xeb   :  { %133 = vst.msk [vmem:[%s241_s3] sm:$0xf] %vm132_vm2, %v152_v20  ;;  %v153_v23 = vpack.c.bf16 %v105_v21, %v105_v21 }
  0xec   :  { %136 = vst.msk [vmem:[%s241_s3 + $0xc] sm:$0xf] %vm132_vm2, %v155_v22 }
  0xed   :  { %134 = vst.msk [vmem:[%s241_s3 + $0x4] sm:$0xf] %vm132_vm2, %v153_v23 }

// kernel: model_forward.8
= control target key start
LH: loop header
LB: loop body
LE: loop exit
PB: predicated region body
PF: predicated region fallthrough
CT: control target
= control target key end

     0   :  { %s896_s15 = smov 0   ;;  %s1019_s0 = inlined_call_operand.vmem [shape: bf16[2,8,64], index: 0, kind: input, shape index: {}]   ;;  %s1020_s1 = inlined_call_operand.vmem [shape: bf16[2,8,64], index: 1, kind: input, shape index: {}]   ;;  %s1021_s2 = inlined_call_operand.vmem [shape: bf16[5,64,64], index: 2, kind: input, shape index: {}]   ;;  %s1022_s3 = inlined_call_operand.vmem [shape: f32[1,64], index: 3, kind: input, shape index: {}]   ;;  %s1023_s4 = inlined_call_operand.vmem [shape: bf16[2,8,64], index: 4, kind: output, shape index: {}]  }
   0x1 LB: > { %s678_s16 = sadd.s32 4294967295, %s867_s15   ;;  %p682_p0 = scmp.ge.s32.totalorder %s867_s15, 1  ;;  %s867_s15 = sphi %s896_s15, %s14_s15  }
   0x2   : > { %p170_p1 = scmp.lt.s32.totalorder %s867_s15, 3 }
   0x4   : > { %p171_p2 = pnand %p682_p0, %p170_p1 }
   0x5   : > { %v841_v0 = vld [vmem:[%s1021_s2] sm:$0xff] (!%p171_p2)   ;;  %v869_v1 = vmov (!%p171_p2), 0.0   ;;  %v843_v3 = vld [vmem:[%s1021_s2 + $0x8] sm:$0xff] (!%p171_p2)   ;;  %vm870_vm0 = vmmov (!%p171_p2), 0   ;;  %p198_p3 = scmp.lt.s32.totalorder (!%p171_p2), %s678_s16, 1  ;;  %v845_v5 = vld [vmem:[%s1021_s2 + $0x10] sm:$0xff] (!%p171_p2)  }
   0x6   : > { %174 = sbr.rel (%p171_p2) target bundleno = 276 (0x114), region = 36  ;;  %771 = vmatprep.subr.bf16.mxu0 (!%p171_p2), %v869_v1  ;;  %783 = vmatprep.subr.bf16.mxu1 (!%p171_p2), %v869_v1  ;;  %v842_v2 = vld [vmem:[%s1021_s2 + $0x20] sm:$0xff] (!%p171_p2)   ;;  %v844_v4 = vld [vmem:[%s1021_s2 + $0x28] sm:$0xff] (!%p171_p2)   ;;  %v846_v6 = vld [vmem:[%s1021_s2 + $0x30] sm:$0xff] (!%p171_p2)   ;;  %vm245_vm1 = vcmask (!%p171_p2), 523264   ;;  %vm587_vm2 = vcmask (!%p171_p2), 1040384  }
   0x7   : > { %772 = vmatpush3.bf16.msra.mxu0 (!%p171_p2), %v841_v0  ;;  %779 = vmatprep.mubr.msk.bf16.mxu0 (!%p171_p2), %vm870_vm0, %v869_v1  ;;  %v847_v7 = vld [vmem:[%s1021_s2 + $0x18] sm:$0xff] (!%p171_p2)   ;;  %v849_v11 = vld [vmem:[%s1021_s2 + $0x40] sm:$0xff] (!%p171_p2)   ;;  %v851_v13 = vld [vmem:[%s1021_s2 + $0x48] sm:$0xff] (!%p171_p2)   ;;  %vm599_vm3 = vcmask (!%p171_p2), 1046528   ;;  %vm611_vm4 = vcmask (!%p171_p2), 519168  }
   0x8   : > { %784 = vmatpush3.bf16.msra.mxu1 (!%p171_p2), %v842_v2  ;;  %773 = vmatprep.subr.bf16.mxu0 (!%p171_p2), %v869_v1  ;;  %v848_v8 = vld [vmem:[%s1021_s2 + $0x38] sm:$0xff] (!%p171_p2)   ;;  %v850_v12 = vld [vmem:[%s1021_s2 + $0x60] sm:$0xff] (!%p171_p2)   ;;  %v852_v14 = vld [vmem:[%s1021_s2 + $0x68] sm:$0xff] (!%p171_p2)  }
   0x9   : > { %785 = vmatprep.subr.bf16.mxu1 (!%p171_p2), %v869_v1  ;;  %791 = vmatprep.mubr.msk.bf16.mxu1 (!%p171_p2), %vm870_vm0, %v869_v1  ;;  %v853_v15 = vld [vmem:[%s1021_s2 + $0x50] sm:$0xff] (!%p171_p2)   ;;  %v855_v17 = vld [vmem:[%s1021_s2 + $0x58] sm:$0xff] (!%p171_p2)   ;;  %v857_v19 = vld [vmem:[%s1021_s2 + $0x80] sm:$0xff] (!%p171_p2)  }
   0xa   : > { %v854_v16 = vld [vmem:[%s1021_s2 + $0x70] sm:$0xff] (!%p171_p2)   ;;  %v856_v18 = vld [vmem:[%s1021_s2 + $0x78] sm:$0xff] (!%p171_p2)   ;;  %v858_v20 = vld [vmem:[%s1021_s2 + $0x88] sm:$0xff] (!%p171_p2)  }
   0xb   : > { %774 = vmatpush3.bf16.msra.mxu0 (!%p171_p2), %v843_v3  ;;  %v859_v21 = vld [vmem:[%s1021_s2 + $0x90] sm:$0xff] (!%p171_p2)   ;;  %v860_v22 = vld [vmem:[%s1021_s2 + $0x98] sm:$0xff] (!%p171_p2)   ;;  %v743_v51 = vld [vmem:[%s1022_s3] ss:$0 sm:$0xff] (!%p171_p2) }
   0xc   : > { %786 = vmatpush3.bf16.msra.mxu1 (!%p171_p2), %v844_v4  ;;  %775 = vmatprep.subr.bf16.mxu0 (!%p171_p2), %v869_v1 }
   0xd   : > { %s1025_s16 = smov (!%p198_p3, %s678_s16), 1  ;;  %787 = vmatprep.subr.bf16.mxu1 %v869_v1 }
   0xe   : > { %s927_s27 = sshll.u32 %s1025_s16, 2 }
   0xf   : > { %s201_s6 = scalar_lea.vmem %s1019_s0, %s927_s27  ;;  %776 = vmatpush3.bf16.msra.mxu0 %v845_v5  ;;  %s205_s11 = scalar_lea.vmem %s1020_s1, %s927_s27 }
  0x10   : > { %788 = vmatpush3.bf16.msra.mxu1 %v846_v6  ;;  %777 = vmatprep.subr.bf16.mxu0 %v869_v1  ;;  %v211_v9 = vld [vmem:[%s201_s6] sm:$0xf]  ;;  %s209_s19 = scalar_lea.vmem %s1023_s4, %s927_s27 }
  0x11   : > { %789 = vmatprep.subr.bf16.mxu1 %v869_v1  ;;  %v212_v10 = vld [vmem:[%s205_s11] sm:$0xf] }
  0x13   : > { %778 = vmatpush3.bf16.msra.mxu0 %v847_v7 }
  0x14   : > { %790 = vmatpush3.bf16.msra.mxu1 %v848_v8  ;;  %795 = vmatprep.subr.bf16.mxu0 %v869_v1 }
  0x15   : > { %807 = vmatprep.subr.bf16.mxu1 %v869_v1 }
  0x16   : > { %780 = vmatmul.mubr.msk.bf16.vlgmr.msra.gmra.mrb[0].mxu0 %vm245_vm1, %v211_v9 }
  0x17   : > { %792 = vmatmul.mubr.msk.bf16.vlgmr.msra.gmra.mrb[0].mxu1 %vm245_vm1, %v212_v10  ;;  %796 = vmatpush3.bf16.msra.mxu0 %v849_v11 }
  0x18   : > { %808 = vmatpush3.bf16.msra.mxu1 %v850_v12  ;;  %797 = vmatprep.subr.bf16.mxu0 %v869_v1 }
  0x19   : > { %809 = vmatprep.subr.bf16.mxu1 %v869_v1  ;;  %803 = vmatprep.mubr.msk.bf16.mxu0 %vm870_vm0, %v869_v1 }
  0x1a   : > { %815 = vmatprep.mubr.msk.bf16.mxu1 %vm870_vm0, %v869_v1 }
  0x1b   : > { %798 = vmatpush3.bf16.msra.mxu0 %v851_v13 }
  0x1c   : > { %810 = vmatpush3.bf16.msra.mxu1 %v852_v14  ;;  %799 = vmatprep.subr.bf16.mxu0 %v869_v1 }
  0x1d   : > { %811 = vmatprep.subr.bf16.mxu1 %v869_v1 }
  0x1f   : > { %800 = vmatpush3.bf16.msra.mxu0 %v853_v15 }
  0x20   : > { %812 = vmatpush3.bf16.msra.mxu1 %v854_v16  ;;  %801 = vmatprep.subr.bf16.mxu0 %v869_v1 }
  0x21   : > { %813 = vmatprep.subr.bf16.mxu1 %v869_v1 }
  0x23   : > { %802 = vmatpush3.bf16.msra.mxu0 %v855_v17 }
  0x24   : > { %814 = vmatpush3.bf16.msra.mxu1 %v856_v18  ;;  %819 = vmatprep.subr.bf16.mxu0 %v869_v1 }
  0x26   : > { %804 = vmatmul.mubr.msk.bf16.vlgmr.msra.gmra.mrb[4].mxu0 %vm245_vm1, %v211_v9 }
  0x27   : > { %820 = vmatpush3.bf16.msra.mxu0 %v857_v19  ;;  %816 = vmatmul.mubr.msk.bf16.vlgmr.msra.gmra.mrb[4].mxu1 %vm245_vm1, %v212_v10 }
  0x28   : > { %821 = vmatprep.subr.bf16.mxu0 %v869_v1  ;;  %827 = vmatprep.mubr.msk.bf16.mxu0 %vm870_vm0, %v869_v1 }
  0x2b   : > { %822 = vmatpush3.bf16.msra.mxu0 %v858_v20 }
  0x2c   : > { %823 = vmatprep.subr.bf16.mxu0 %v869_v1 }
  0x2f   : > { %824 = vmatpush3.bf16.msra.mxu0 %v859_v21 }
  0x30   : > { %825 = vmatprep.subr.bf16.mxu0 %v869_v1 }
  0x33   : > { %826 = vmatpush3.bf16.msra.mxu0 %v860_v22 }
  0x36   : > { %828 = vmatmul.mubr.msk.bf16.vlgmr.msra.gmra.mrb[8].mxu0 %vm245_vm1, %v211_v9 }
  0xe9   : > { %v283_v23 = vpop.f32.mrb[0].mxu0 }
  0xea   : > { %v585_v24 = vrot.slane %v283_v23, 7  ;;  %v781_v25 = vpop.f32.mrb[1].mxu0  ;;  %v359_v26 = vpop.f32.mrb[0].mxu1 }
  0xeb   : > { %v590_v27 = vrot.slane %v359_v26, 7  ;;  %v286_v28 = vpop.f32.mrb[2].mxu0  ;;  %v793_v29 = vpop.f32.mrb[1].mxu1 }
  0xec   : > { %v588_v30 = vsel %vm587_vm2, 0.0, %v585_v24  ;;  %v782_v31 = vpop.f32.mrb[3].mxu0  ;;  %v362_v32 = vpop.f32.mrb[2].mxu1 }
  0xed   : > { %v592_v33 = vsel %vm587_vm2, 0.0, %v590_v27  ;;  %v794_v34 = vpop.f32.mrb[3].mxu1 }
  0xee   : > { %v593_v35 = vadd.f32 %v592_v33, %v588_v30 }
  0xf9   : > { %v432_v36 = vpop.f32.mrb[4].mxu0 }
  0xfa   : > { %v594_v37 = vadd.f32 %v593_v35, %v432_v36  ;;  %v805_v38 = vpop.f32.mrb[5].mxu0  ;;  %v505_v39 = vpop.f32.mrb[4].mxu1 }
  0xfb   : > { %v435_v40 = vpop.f32.mrb[6].mxu0  ;;  %v817_v41 = vpop.f32.mrb[5].mxu1 }
  0xfc   : > { %v595_v42 = vadd.f32 %v594_v37, %v505_v39  ;;  %v806_v43 = vpop.f32.mrb[7].mxu0  ;;  %v508_v44 = vpop.f32.mrb[6].mxu1 }
  0xfd   : > { %v818_v45 = vpop.f32.mrb[7].mxu1 }
 0x109   : > { %v578_v46 = vpop.f32.mrb[8].mxu0 }
 0x10a   : > { %v597_v47 = vrot.slane %v578_v46, 1  ;;  %v829_v48 = vpop.f32.mrb[9].mxu0 }
 0x10b   : > { %v581_v49 = vpop.f32.mrb[10].mxu0 }
 0x10c   : > { %v600_v50 = vsel %vm599_vm3, %v597_v47, 0.0  ;;  %v830_v52 = vpop.f32.mrb[11].mxu0 }
 0x10d   : > { %v601_v53 = vadd.f32 %v600_v50, %v595_v42 }
 0x10f   : > { %v609_v54 = vadd.f32 %v743_v51, %v601_v53 }
 0x111   : > { %v610_v55 = vpack.c.bf16 %v609_v54, %v609_v54 }
 0x113   : > { %612 = vst.msk [vmem:[%s209_s19] sm:$0xf] %vm611_vm4, %v610_v55 }
 0x114 PF: > { %s14_s15 = sadd.s32 1, %s867_s15  }
 0x115   : > { %p11_p4 = scmp.ge.s32.totalorder %s14_s15, 4  }
 0x117   :  { %13 = sbr.rel (!%p11_p4) target bundleno = 1 (0x1), region = 73 }

// kernel: model_forward.11
= control target key start
LH: loop header
LB: loop body
LE: loop exit
PB: predicated region body
PF: predicated region fallthrough
CT: control target
= control target key end

     0   :  { %s906_s15 = smov 0   ;;  %s1031_s0 = inlined_call_operand.vmem [shape: bf16[2,8,64], index: 0, kind: input, shape index: {}]   ;;  %s1032_s1 = inlined_call_operand.vmem [shape: bf16[5,64,64], index: 1, kind: input, shape index: {}]   ;;  %s1033_s2 = inlined_call_operand.vmem [shape: f32[1,64], index: 2, kind: input, shape index: {}]   ;;  %s1034_s3 = inlined_call_operand.vmem [shape: bf16[2,8,64], index: 3, kind: output, shape index: {0}]   ;;  %s1035_s4 = inlined_call_operand.vmem [shape: bf16[2,8,64], index: 4, kind: output, shape index: {1}]  }
   0x1 LB: > { %s688_s16 = sadd.s32 4294967295, %s877_s15   ;;  %p692_p0 = scmp.ge.s32.totalorder %s877_s15, 1  ;;  %s877_s15 = sphi %s906_s15, %s15_s15  }
   0x2   : > { %p164_p1 = scmp.lt.s32.totalorder %s877_s15, 3 }
   0x4   : > { %p165_p2 = pnand %p692_p0, %p164_p1 }
   0x5   : > { %v851_v0 = vld [vmem:[%s1032_s1] sm:$0xff] (!%p165_p2)   ;;  %v879_v1 = vmov (!%p165_p2), 0.0   ;;  %v853_v3 = vld [vmem:[%s1032_s1 + $0x8] sm:$0xff] (!%p165_p2)   ;;  %vm880_vm0 = vmmov (!%p165_p2), 0   ;;  %p192_p3 = scmp.lt.s32.totalorder (!%p165_p2), %s688_s16, 1  ;;  %v855_v5 = vld [vmem:[%s1032_s1 + $0x10] sm:$0xff] (!%p165_p2)  }
   0x6   : > { %168 = sbr.rel (%p165_p2) target bundleno = 273 (0x111), region = 32  ;;  %781 = vmatprep.subr.bf16.mxu0 (!%p165_p2), %v879_v1  ;;  %793 = vmatprep.subr.bf16.mxu1 (!%p165_p2), %v879_v1  ;;  %v852_v2 = vld [vmem:[%s1032_s1 + $0x40] sm:$0xff] (!%p165_p2)   ;;  %v854_v4 = vld [vmem:[%s1032_s1 + $0x48] sm:$0xff] (!%p165_p2)   ;;  %v856_v6 = vld [vmem:[%s1032_s1 + $0x50] sm:$0xff] (!%p165_p2)   ;;  %vm238_vm1 = vcmask (!%p165_p2), 523264   ;;  %vm593_vm2 = vcmask (!%p165_p2), 1046528  }
   0x7   : > { %782 = vmatpush3.bf16.msra.mxu0 (!%p165_p2), %v851_v0  ;;  %789 = vmatprep.mubr.msk.bf16.mxu0 (!%p165_p2), %vm880_vm0, %v879_v1  ;;  %v857_v7 = vld [vmem:[%s1032_s1 + $0x18] sm:$0xff] (!%p165_p2)   ;;  %v859_v10 = vld [vmem:[%s1032_s1 + $0x60] sm:$0xff] (!%p165_p2)   ;;  %v861_v12 = vld [vmem:[%s1032_s1 + $0x68] sm:$0xff] (!%p165_p2)   ;;  %vm514_vm3 = vcmask (!%p165_p2), 1040384   ;;  %vm588_vm4 = vcmask (!%p165_p2), 519168  }
   0x8   : > { %794 = vmatpush3.bf16.msra.mxu1 (!%p165_p2), %v852_v2  ;;  %783 = vmatprep.subr.bf16.mxu0 (!%p165_p2), %v879_v1  ;;  %v858_v8 = vld [vmem:[%s1032_s1 + $0x58] sm:$0xff] (!%p165_p2)   ;;  %v860_v11 = vld [vmem:[%s1032_s1 + $0x80] sm:$0xff] (!%p165_p2)   ;;  %v862_v13 = vld [vmem:[%s1032_s1 + $0x88] sm:$0xff] (!%p165_p2)  }
   0x9   : > { %795 = vmatprep.subr.bf16.mxu1 (!%p165_p2), %v879_v1  ;;  %801 = vmatprep.mubr.msk.bf16.mxu1 (!%p165_p2), %vm880_vm0, %v879_v1  ;;  %v863_v14 = vld [vmem:[%s1032_s1 + $0x70] sm:$0xff] (!%p165_p2)   ;;  %v865_v16 = vld [vmem:[%s1032_s1 + $0x78] sm:$0xff] (!%p165_p2)   ;;  %v867_v18 = vld [vmem:[%s1032_s1 + $0x20] sm:$0xff] (!%p165_p2)  }
   0xa   : > { %v864_v15 = vld [vmem:[%s1032_s1 + $0x90] sm:$0xff] (!%p165_p2)   ;;  %v866_v17 = vld [vmem:[%s1032_s1 + $0x98] sm:$0xff] (!%p165_p2)   ;;  %v868_v19 = vld [vmem:[%s1032_s1 + $0x28] sm:$0xff] (!%p165_p2)  }
   0xb   : > { %784 = vmatpush3.bf16.msra.mxu0 (!%p165_p2), %v853_v3  ;;  %v869_v20 = vld [vmem:[%s1032_s1 + $0x30] sm:$0xff] (!%p165_p2)   ;;  %v870_v21 = vld [vmem:[%s1032_s1 + $0x38] sm:$0xff] (!%p165_p2)   ;;  %v753_v43 = vld [vmem:[%s1033_s2] ss:$0 sm:$0xff] (!%p165_p2) }
   0xc   : > { %796 = vmatpush3.bf16.msra.mxu1 (!%p165_p2), %v854_v4  ;;  %785 = vmatprep.subr.bf16.mxu0 (!%p165_p2), %v879_v1 }
   0xd   : > { %s1037_s16 = smov (!%p192_p3, %s688_s16), 1  ;;  %797 = vmatprep.subr.bf16.mxu1 %v879_v1 }
   0xe   : > { %s941_s29 = sshll.u32 %s1037_s16, 2 }
   0xf   : > { %786 = vmatpush3.bf16.msra.mxu0 %v855_v5  ;;  %s195_s8 = scalar_lea.vmem %s1031_s0, %s941_s29  ;;  %s203_s16 = scalar_lea.vmem %s1035_s4, %s941_s29 }
  0x10   : > { %798 = vmatpush3.bf16.msra.mxu1 %v856_v6  ;;  %787 = vmatprep.subr.bf16.mxu0 %v879_v1  ;;  %v205_v9 = vld [vmem:[%s195_s8] sm:$0xf]  ;;  %s199_s19 = scalar_lea.vmem %s1034_s3, %s941_s29 }
  0x11   : > { %799 = vmatprep.subr.bf16.mxu1 %v879_v1 }
  0x13   : > { %788 = vmatpush3.bf16.msra.mxu0 %v857_v7 }
  0x14   : > { %800 = vmatpush3.bf16.msra.mxu1 %v858_v8  ;;  %805 = vmatprep.subr.bf16.mxu0 %v879_v1 }
  0x15   : > { %817 = vmatprep.subr.bf16.mxu1 %v879_v1 }
  0x16   : > { %790 = vmatmul.mubr.msk.bf16.vlgmr.msra.gmra.mrb[0].mxu0 %vm238_vm1, %v205_v9 }
  0x17   : > { %802 = vmatmul.mubr.msk.bf16.vlgmr.msra.gmra.mrb[0].mxu1 %vm238_vm1, %v205_v9  ;;  %806 = vmatpush3.bf16.msra.mxu0 %v859_v10 }
  0x18   : > { %818 = vmatpush3.bf16.msra.mxu1 %v860_v11  ;;  %807 = vmatprep.subr.bf16.mxu0 %v879_v1 }
  0x19   : > { %819 = vmatprep.subr.bf16.mxu1 %v879_v1  ;;  %813 = vmatprep.mubr.msk.bf16.mxu0 %vm880_vm0, %v879_v1 }
  0x1a   : > { %825 = vmatprep.mubr.msk.bf16.mxu1 %vm880_vm0, %v879_v1 }
  0x1b   : > { %808 = vmatpush3.bf16.msra.mxu0 %v861_v12 }
  0x1c   : > { %820 = vmatpush3.bf16.msra.mxu1 %v862_v13  ;;  %809 = vmatprep.subr.bf16.mxu0 %v879_v1 }
  0x1d   : > { %821 = vmatprep.subr.bf16.mxu1 %v879_v1 }
  0x1f   : > { %810 = vmatpush3.bf16.msra.mxu0 %v863_v14 }
  0x20   : > { %822 = vmatpush3.bf16.msra.mxu1 %v864_v15  ;;  %811 = vmatprep.subr.bf16.mxu0 %v879_v1 }
  0x21   : > { %823 = vmatprep.subr.bf16.mxu1 %v879_v1 }
  0x23   : > { %812 = vmatpush3.bf16.msra.mxu0 %v865_v16 }
  0x24   : > { %824 = vmatpush3.bf16.msra.mxu1 %v866_v17  ;;  %829 = vmatprep.subr.bf16.mxu0 %v879_v1 }
  0x26   : > { %814 = vmatmul.mubr.msk.bf16.vlgmr.msra.gmra.mrb[4].mxu0 %vm238_vm1, %v205_v9 }
  0x27   : > { %826 = vmatmul.mubr.msk.bf16.vlgmr.msra.gmra.mrb[4].mxu1 %vm238_vm1, %v205_v9  ;;  %830 = vmatpush3.bf16.msra.mxu0 %v867_v18 }
  0x28   : > { %831 = vmatprep.subr.bf16.mxu0 %v879_v1  ;;  %837 = vmatprep.mubr.msk.bf16.mxu0 %vm880_vm0, %v879_v1 }
  0x2b   : > { %832 = vmatpush3.bf16.msra.mxu0 %v868_v19 }
  0x2c   : > { %833 = vmatprep.subr.bf16.mxu0 %v879_v1 }
  0x2f   : > { %834 = vmatpush3.bf16.msra.mxu0 %v869_v20 }
  0x30   : > { %835 = vmatprep.subr.bf16.mxu0 %v879_v1 }
  0x33   : > { %836 = vmatpush3.bf16.msra.mxu0 %v870_v21 }
  0x36   : > { %838 = vmatmul.mubr.msk.bf16.vlgmr.msra.gmra.mrb[8].mxu0 %vm238_vm1, %v205_v9 }
  0xe9   : > { %v276_v22 = vpop.f32.mrb[0].mxu0 }
  0xea   : > { %v591_v23 = vrot.slane %v276_v22, 1  ;;  %v791_v24 = vpop.f32.mrb[1].mxu0  ;;  %v358_v25 = vpop.f32.mrb[0].mxu1 }
  0xeb   : > { %v279_v26 = vpop.f32.mrb[2].mxu0  ;;  %v803_v27 = vpop.f32.mrb[1].mxu1 }
  0xec   : > { %v792_v28 = vpop.f32.mrb[3].mxu0  ;;  %v594_v29 = vsel %vm593_vm2, %v591_v23, 0.0  ;;  %v361_v30 = vpop.f32.mrb[2].mxu1 }
  0xed   : > { %v595_v31 = vadd.f32 %v594_v29, %v358_v25  ;;  %v804_v32 = vpop.f32.mrb[3].mxu1 }
  0xf9   : > { %v431_v33 = vpop.f32.mrb[4].mxu0 }
  0xfa   : > { %v504_v34 = vpop.f32.mrb[4].mxu1  ;;  %v815_v35 = vpop.f32.mrb[5].mxu0  ;;  %v512_v47 = vrot.slane %v431_v33, 7 }
  0xfb   : > { %v597_v36 = vrot.slane %v504_v34, 7  ;;  %v434_v37 = vpop.f32.mrb[6].mxu0  ;;  %v827_v38 = vpop.f32.mrb[5].mxu1 }
  0xfc   : > { %v816_v39 = vpop.f32.mrb[7].mxu0  ;;  %v507_v40 = vpop.f32.mrb[6].mxu1  ;;  %v515_v48 = vsel %vm514_vm3, 0.0, %v512_v47 }
  0xfd   : > { %v599_v41 = vsel %vm514_vm3, 0.0, %v597_v36  ;;  %v828_v42 = vpop.f32.mrb[7].mxu1 }
  0xfe   : > { %v600_v44 = vadd.f32 %v599_v41, %v595_v31 }
 0x100   : > { %v601_v45 = vadd.f32 %v753_v43, %v600_v44 }
 0x102   : > { %v602_v46 = vpack.c.bf16 %v601_v45, %v601_v45 }
 0x104   : > { %603 = vst.msk [vmem:[%s203_s16] sm:$0xf] %vm588_vm4, %v602_v46 }
 0x109   : > { %v574_v49 = vpop.f32.mrb[8].mxu0 }
 0x10a   : > { %v575_v50 = vadd.f32 %v574_v49, %v515_v48  ;;  %v839_v51 = vpop.f32.mrb[9].mxu0 }
 0x10b   : > { %v577_v52 = vpop.f32.mrb[10].mxu0 }
 0x10c   : > { %v586_v53 = vadd.f32 %v753_v43, %v575_v50  ;;  %v840_v54 = vpop.f32.mrb[11].mxu0 }
 0x10e   : > { %v587_v55 = vpack.c.bf16 %v586_v53, %v586_v53 }
 0x110   : > { %589 = vst.msk [vmem:[%s199_s19] sm:$0xf] %vm588_vm4, %v587_v55 }
 0x111 PF: > { %s15_s15 = sadd.s32 1, %s877_s15  }
 0x112   : > { %p12_p4 = scmp.ge.s32.totalorder %s15_s15, 4  }
 0x114   :  { %14 = sbr.rel (!%p12_p4) target bundleno = 1 (0x1), region = 78 }

// kernel: model_forward.13
= control target key start
LH: loop header
LB: loop body
LE: loop exit
PB: predicated region body
PF: predicated region fallthrough
CT: control target
= control target key end

     0   :  { %9 = vsyncpa [#allocation3], 0  ;;  %s910_s0 = inlined_call_operand.vmem [shape: bf16[2,16,64], index: 0, kind: input, shape index: {}]   ;;  %s911_s1 = inlined_call_operand.vmem [shape: bf16[64,128], index: 1, kind: input, shape index: {}]   ;;  %s912_s2 = inlined_call_operand.vmem [shape: f32[1,128], index: 2, kind: input, shape index: {}]   ;;  %s913_s3 = inlined_call_operand.vmem [shape: f32[2,16,1], index: 3, kind: input, shape index: {}]   ;;  %s914_s4 = inlined_call_operand.hbm [shape: f32[2,16,128], index: 4, kind: output, shape index: {}]  }
   0x1   :  { %11 = vsyncpa [#allocation3 + $0x1], 0  ;;  %s777_s15 = smov 0   ;;  %s779_s16 = smov 0  }
   0x2   :  { %s781_s17 = smov 0   ;;  %s783_s18 = smov 0  }
   0x3   :  { %s785_s19 = smov 0   ;;  %s787_s20 = smov 0  }
   0x4 LB: > { %s556_s21 = sadd.s32 4294967295, %s744_s20   ;;  %s557_s22 = sadd.s32 4294967294, %s744_s20   ;;  %s744_s20 = sphi %s787_s20, %s17_s20   ;;  %s740_s19 = sphi %s785_s19, %s921_s19   ;;  %s736_s18 = sphi %s783_s18, %s920_s18   ;;  %s732_s17 = sphi %s781_s17, %s919_s17   ;;  %s728_s16 = sphi %s779_s16, %s918_s16   ;;  %s724_s15 = sphi %s777_s15, %s917_s15  }
   0x5   : > { %s36_s23 = sadd.s32 1, %s740_s19  ;;  %s155_s24 = sadd.s32 1, %s732_s17 }
   0x6   : > { %p38_p0 = scmp.ge.s32.totalorder %s36_s23, 2  ;;  %p165_p1 = scmp.ne.s32.totalorder %s732_s17, %s728_s16 }
   0x7   : > { %p166_p2 = scmp.eq.s32.totalorder %s556_s21, 1  ;;  %p171_p3 = scmp.ne.s32.totalorder %s728_s16, %s724_s15 }
   0x8   : > { %s923_s23 = smov (%p38_p0, %s36_s23), 0  ;;  %p172_p5 = scmp.eq.s32.totalorder %s557_s22, 1 }
   0x9   : > { %p817_p4 = por %p166_p2, %p165_p1  ;;  %s148_s26 = ssub.s32 %s740_s19, %s923_s23 }
   0xa   : > { %p562_p6 = scmp.ge.s32.totalorder %s744_s20, 1  ;;  %p153_p7 = scmp.eq.s32.totalorder %s148_s26, 0 }
   0xb   : > { %p824_p8 = por %p172_p5, %p171_p3  ;;  %p229_p9 = scmp.lt.s32.totalorder %s744_s20, 3 }
   0xc   : > { %s830_s28 = scalar_select %p153_p7, %s732_s17, %s155_s24  }
   0xd   : > { %p230_p10 = pnand %p562_p6, %p229_p9 }
   0xe   : > { %v661_v0 = vld [vmem:[%s911_s1] sm:$0xff] (!%p230_p10)   ;;  %v746_v1 = vmov (!%p230_p10), 0.0   ;;  %v662_v2 = vld [vmem:[%s911_s1 + $0x8] sm:$0xff] (!%p230_p10)   ;;  %vm747_vm0 = vmmov (!%p230_p10), 0   ;;  %p276_p11 = scmp.lt.s32.totalorder (!%p230_p10), %s736_s18, 1  ;;  %v748_v3 = vmov (!%p230_p10), 0  }
   0xf   : > { %233 = sbr.rel (%p230_p10) target bundleno = 264 (0x108), region = 36  ;;  %588 = vmatprep.subr.bf16.mxu0 (!%p230_p10), %v746_v1  ;;  %596 = vmatprep.mubr.msk.bf16.mxu0 (!%p230_p10), %vm747_vm0, %v746_v1  ;;  %v663_v4 = vld [vmem:[%s911_s1 + $0x10] sm:$0xff] (!%p230_p10)   ;;  %v664_v6 = vld [vmem:[%s911_s1 + $0x18] sm:$0xff] (!%p230_p10)   ;;  %vm350_vm1 = vcmask (!%p230_p10), 523264   ;;  %s272_s30 = sand.u32 (!%p230_p10), 1, %s728_s16  }
  0x10   : > { %589 = vmatpush3.bf16.msra.mxu0 (!%p230_p10), %v661_v0  ;;  %660 = vset.pattern.permute.xlu0 (!%p230_p10), %v748_v3  ;;  %s563_s5 = sshll.u32 (!%p230_p10), %s272_s30, 4  ;;  %v568_v10 = vld [vmem:[%s912_s2] ss:$0 sm:$0xff] (!%p230_p10)  ;;  %s749_s21 = smov (!%p230_p10), [#allocation2]  }
  0x11   : > { %590 = vmatprep.subr.bf16.mxu0 (!%p230_p10), %v746_v1  ;;  %s274_s8 = scalar_lea.vmem (!%p230_p10), [#allocation2], %s563_s5  ;;  %s670_s22 = sshll.u32 (!%p230_p10), %s749_s21, 4  ;;  %s671_s22 = int_to_ptr.vmem [resolvable:$false] %s670_s22 }
  0x12   : > { %s428_s9 = sshll.u32 (!%p230_p10), %s274_s8, 4  ;;  %s857_s9 = int_to_ptr.vmem [resolvable:$true] %s428_s9 }
  0x13   : > { %p673_p1 = scmp.lt.s32.totalorder (!%p230_p10), %s857_s9, %s671_s22 }
  0x14   : > { %591 = vmatpush3.bf16.msra.mxu0 (!%p230_p10), %v662_v2 }
  0x15   : > { %592 = vmatprep.subr.bf16.mxu0 (!%p230_p10), %v746_v1 }
  0x16   : > { %s277_s7 = scalar_select %p276_p11, %s736_s18, 1 }
  0x18   : > { %s580_s10 = sshll.u32 %s277_s7, 3  ;;  %s581_s11 = sshll.u32 %s277_s7, 4  ;;  %593 = vmatpush3.bf16.msra.mxu0 %v663_v4 }
  0x19   : > { %s283_s14 = scalar_lea.vmem %s910_s0, %s580_s10  ;;  %s300_s24 = scalar_lea.vmem %s913_s3, %s581_s11  ;;  %594 = vmatprep.subr.bf16.mxu0 %v746_v1 }
  0x1a   : > { %v395_v5 = vld [vmem:[%s300_s24] sm:$0xff]  ;;  %v396_v7 = vld [vmem:[%s300_s24 + $0x8] sm:$0xff]  ;;  %s582_s10 = sshll.u32 %s736_s18, 8  ;;  %s666_s18 = scalar_lea.vmem %s857_s9, 256 }
  0x1b   : > { %399 = vperm.xlu0 %660, %v395_v5   ;;  %v665_v8 = vld [vmem:[%s283_s14] sm:$0xff]   ;;  %s862_s13 = scalar_lea.hbm %s914_s4, %s582_s10  ;;  %s864_s14 = scalar_lea.sflag [#allocation3], %s272_s30 }
  0x1c   : > { %595 = vmatpush3.bf16.msra.mxu0 %v664_v6  ;;  %p667_p12 = scmp.ne.s32.totalorder %s857_s9, %s666_s18  ;;  %s672_s24 = scalar_lea.vmem %s671_s22, 512 }
  0x1d   : > { %p674_p2 = scmp.lt.s32.totalorder %s672_s24, %s666_s18 }
  0x1e   : > { %p668_p13 = pnand %p667_p12, %p817_p4 }
  0x1f   : > { %404 = vperm.xlu0 %660, %v396_v7   ;;  %597 = vmatmul.mubr.msk.bf16.vlgmr.msra.gmra.mrb[0].mxu0 %vm350_vm1, %v665_v8  ;;  %p675_p3 = por %p674_p2, %p673_p1 }
  0x20   : > { %p669_p0 = pneg %p668_p13 }
  0x22   : > { %p676_p5 = pnand %p675_p3, %p669_p0 }
  0x9a   : > { %v400_v9 = vpop.permute.xlu0 %399 }
  0x9e   : > { %v405_v18 = vpop.permute.xlu0 %404 }
  0xf2   : > { %v388_v11 = vpop.f32.mrb[0].mxu0 }
  0xf3   : > { %v389_v12 = vadd.f32 %v568_v10, %v388_v11  ;;  %v598_v13 = vpop.f32.mrb[1].mxu0 }
  0xf4   : > { %v391_v14 = vpop.f32.mrb[2].mxu0 }
  0xf5   : > { %v407_v15 = vsub.f32 %v389_v12, %v400_v9  ;;  %v392_v16 = vadd.f32 %v568_v10, %v391_v14  ;;  %v599_v17 = vpop.f32.mrb[3].mxu0 }
  0xf7   : > { %409 = vst [vmem:[%s274_s8] sm:$0xff] %v407_v15  ;;  %v408_v19 = vsub.f32 %v392_v16, %v405_v18 }
  0xf9   : > { %410 = vst [vmem:[%s274_s8 + $0x8] sm:$0xff] %v408_v19 }
  0xfa   : > { %679 = shalt.err (!%p676_p5)
}
  0xfb   : > { %s680_s26 = scalar_lea.hbm %s862_s13, 256  ;;  %s684_s5 = scalar_lea.hbm %s914_s4, 512 }
  0xfc   : > { %p681_p6 = scmp.ne.s32.totalorder %s862_s13, %s680_s26  ;;  %p685_p10 = scmp.lt.u32.totalorder %s862_s13, %s914_s4 }
  0xfd   : > { %p686_p11 = scmp.lt.u32.totalorder %s684_s5, %s680_s26  ;;  %p688_p13 = scmp.lt.u32.totalorder %s680_s26, %s862_s13 }
  0xfe   : > { %p682_p7 = pnand %p681_p6, %p817_p4 }
  0xff   : > { %p687_p12 = por %p686_p11, %p685_p10 }
 0x100   : > { %p683_p9 = pneg %p682_p7 }
 0x101   : > { %p689_p0 = por %p688_p13, %p687_p12 }
 0x103   : > { %p690_p1 = pnand %p689_p0, %p683_p9 }
 0x105   : > { %693 = shalt.err (!%p690_p1)
}
 0x106   : > { %s750_s8 = smov 128   ;;  %s751_s10 = smov 8  }
 0x107   : > { %600 = dma.vmem_to_hbm [thread:$0]  (%p817_p4), %s857_s9, 256, %s862_s13, %s864_s14, %s750_s8, %s750_s8, %s751_s10  }
 0x108 PF: > { %p606_p2 = scmp.ge.s32.totalorder %s744_s20, 2  ;;  %s443_s11 = sand.u32 1, %s724_s15  }
 0x109   : > { %s444_s12 = scalar_lea.sflag [#allocation3], %s443_s11 }
 0x10a   : > { %p603_p3 = pnand %p606_p2, %p824_p8 }
 0x10c   : > { %719 = dma.done.wait (!%p603_p3), %s444_s12, 256  }
 0x10d   : > { %721 = vsyncadd (!%p603_p3), %s444_s12, 4294967040  ;;  %s17_s20 = sadd.s32 1, %s744_s20   ;;  %s917_s15 = smov %s728_s16 }
 0x10e   : > { %p14_p5 = scmp.ge.s32.totalorder %s17_s20, 4   ;;  %s918_s16 = smov %s732_s17 }
 0x10f   : > { %s919_s17 = smov %s830_s28  ;;  %s920_s18 = smov %s740_s19 }
 0x110   : > { %s921_s19 = smov %s923_s23  ;;  %16 = sbr.rel (!%p14_p5) target bundleno = 4 (0x4), region = 80 }
 0x117   :  { %449 = vsyncpa [#allocation3], 1 }
 0x118   :  { %451 = vsyncpa [#allocation3 + $0x1], 1 }

// kernel: model_forward.12
= control target key start
LH: loop header
LB: loop body
LE: loop exit
PB: predicated region body
PF: predicated region fallthrough
CT: control target
= control target key end

     0   :  { %s1223_s15 = smov 0   ;;  %s1225_s16 = smov 0   ;;  %s1528_s0 = inlined_call_operand.vmem [shape: bf16[2,16,64], index: 0, kind: input, shape index: {}]   ;;  %s1529_s1 = inlined_call_operand.vmem [shape: bf16[128,64], index: 1, kind: input, shape index: {}]   ;;  %s1530_s2 = inlined_call_operand.vmem [shape: f32[128,1], index: 2, kind: input, shape index: {}]   ;;  %s1531_s3 = inlined_call_operand.vmem [shape: f32[2,128,16], index: 3, kind: output, shape index: {0}]   ;;  %s1532_s4 = inlined_call_operand.vmem [shape: f32[2,1,16], index: 4, kind: output, shape index: {1}]  }
   0x1   :  { %s1227_s17 = smov 0  }
   0x2 LB: > { %s34_s18 = sadd.s32 1, %s1189_s16  ;;  %p1040_p0 = scmp.ge.s32.totalorder %s1193_s17, 1  ;;  %s1193_s17 = sphi %s1227_s17, %s15_s17   ;;  %s1189_s16 = sphi %s1225_s16, %s1534_s16   ;;  %s1185_s15 = sphi %s1223_s15, %s1533_s15  }
   0x3   : > { %p36_p1 = scmp.ge.s32.totalorder %s34_s18, 2  ;;  %p219_p2 = scmp.lt.s32.totalorder %s1193_s17, 3 }
   0x5   : > { %s1536_s18 = smov (%p36_p1, %s34_s18), 0  ;;  %p220_p3 = pnand %p1040_p0, %p219_p2 }
   0x6   : > { %p273_p4 = scmp.lt.s32.totalorder (!%p220_p3), %s1185_s15, 1  ;;  %vm480_vm0 = vcmask (!%p220_p3), 523264   ;;  %v1127_v0 = vld [vmem:[%s1529_s1] sm:$0xff] (!%p220_p3)   ;;  %v1195_v2 = vmov (!%p220_p3), 0   ;;  %v341_v5 = vld [vmem:[%s1530_s2 + $0x10] sm:$0xff] (!%p220_p3)  ;;  %v342_v7 = vld [vmem:[%s1530_s2 + $0x18] sm:$0xff] (!%p220_p3) }
   0x7   : > { %223 = sbr.rel (%p220_p3) target bundleno = 365 (0x16d), region = 32  ;;  %v1128_v1 = vld [vmem:[%s1529_s1 + $0x20] sm:$0xff] (!%p220_p3)   ;;  %1125 = vset.pattern.permute.xlu1 (!%p220_p3), %v1195_v2  ;;  %1124 = vset.pattern.permute.xlu0 (!%p220_p3), %v1195_v2  ;;  %v340_v8 = vld [vmem:[%s1530_s2 + $0x8] sm:$0xff] (!%p220_p3)  ;;  %v1131_v11 = vld [vmem:[%s1529_s1 + $0x10] sm:$0xff] (!%p220_p3)   ;;  %vm318_vm1 = vcmask (!%p220_p3), 122880   ;;  %v1197_v28 = vmov (!%p220_p3), 0.0  }
   0x8   : > { %1077 = vmatprep.mubr.msk.bf16.mxu0 (!%p220_p3), %vm480_vm0, %v1127_v0  ;;  %1085 = vmatprep.mubr.msk.bf16.mxu1 (!%p220_p3), %vm480_vm0, %v1128_v1  ;;  %v339_v6 = vld [vmem:[%s1530_s2] sm:$0xff] (!%p220_p3)  ;;  %v1129_v9 = vld [vmem:[%s1529_s1 + $0x8] sm:$0xff] (!%p220_p3)   ;;  %v1132_v12 = vld [vmem:[%s1529_s1 + $0x30] sm:$0xff] (!%p220_p3)   ;;  %v1196_v27 = vmov (!%p220_p3), -1e+30   ;;  %vm605_vm2 = vcmask (!%p220_p3), 130048  }
   0x9   : > { %367 = vperm.xlu1 (!%p220_p3), %1125, %v341_v5   ;;  %357 = vperm.xlu0 (!%p220_p3), %1124, %v339_v6   ;;  %v1130_v10 = vld [vmem:[%s1529_s1 + $0x28] sm:$0xff] (!%p220_p3)   ;;  %v343_v14 = vld [vmem:[%s1530_s2 + $0x20] sm:$0xff] (!%p220_p3)  ;;  %v346_v15 = vld [vmem:[%s1530_s2 + $0x38] sm:$0xff] (!%p220_p3)  ;;  %319 = vst.msk [vmem:[#allocation2] sm:$0x1] (!%p220_p3), %vm318_vm1, %v1196_v27 }
   0xa   : > { %v344_v13 = vld [vmem:[%s1530_s2 + $0x28] sm:$0xff] (!%p220_p3)  ;;  %v345_v16 = vld [vmem:[%s1530_s2 + $0x30] sm:$0xff] (!%p220_p3)  ;;  %v1133_v17 = vld [vmem:[%s1529_s1 + $0x18] sm:$0xff] (!%p220_p3)   ;;  %320 = vst.msk [vmem:[#allocation3] sm:$0x1] (!%p220_p3), %vm318_vm1, %v1197_v28 }
   0xb   : > { %v1134_v18 = vld [vmem:[%s1529_s1 + $0x38] sm:$0xff] (!%p220_p3)   ;;  %v348_v19 = vld [vmem:[%s1530_s2 + $0x48] sm:$0xff] (!%p220_p3)  ;;  %v347_v20 = vld [vmem:[%s1530_s2 + $0x40] sm:$0xff] (!%p220_p3) }
   0xc   : > { %v350_v21 = vld [vmem:[%s1530_s2 + $0x58] sm:$0xff] (!%p220_p3)  ;;  %v349_v22 = vld [vmem:[%s1530_s2 + $0x50] sm:$0xff] (!%p220_p3)  ;;  %v352_v23 = vld [vmem:[%s1530_s2 + $0x68] sm:$0xff] (!%p220_p3) }
   0xd   : > { %372 = vperm.xlu1 (!%p220_p3), %1125, %v342_v7   ;;  %362 = vperm.xlu0 (!%p220_p3), %1124, %v340_v8   ;;  %v351_v24 = vld [vmem:[%s1530_s2 + $0x60] sm:$0xff] (!%p220_p3)  ;;  %v354_v25 = vld [vmem:[%s1530_s2 + $0x78] sm:$0xff] (!%p220_p3)  ;;  %v353_v26 = vld [vmem:[%s1530_s2 + $0x70] sm:$0xff] (!%p220_p3) }
   0xe   : > { %s1538_s15 = smov (!%p273_p4, %s1185_s15), 1 }
   0xf   : > { %s1064_s23 = sshll.u32 %s1538_s15, 3  ;;  %s1065_s27 = sshll.u32 %s1538_s15, 7 }
  0x10   : > { %s280_s26 = scalar_lea.vmem %s1528_s0, %s1064_s23  ;;  %s1338_s30 = scalar_lea.vmem %s1531_s3, %s1065_s27 }
  0x11   : > { %v1126_v3 = vld [vmem:[%s280_s26] sm:$0xff]   ;;  %382 = vperm.xlu1 %1125, %v344_v13   ;;  %377 = vperm.xlu0 %1124, %v343_v14   ;;  %s312_s7 = scalar_lea.vmem %s1532_s4, %s1538_s15 }
  0x12   : > { %1095 = vmatprep.subr.msk.bf16.mxu0 %vm480_vm0, %v1126_v3  ;;  %1096 = vmatprep.subr.msk.bf16.mxu1 %vm480_vm0, %v1126_v3  ;;  %v506_v4 = vsel %vm480_vm0, %v1126_v3, 0 }
  0x13   : > { %1076 = vmatpush3.bf16.xpose.msra.mxu0 %v506_v4  ;;  %1094 = vmatpush3.bf16.xpose.msra.mxu1 %v506_v4 }
  0x15   : > { %392 = vperm.xlu1 %1125, %v346_v15   ;;  %387 = vperm.xlu0 %1124, %v345_v16  }
  0x19   : > { %402 = vperm.xlu1 %1125, %v348_v19   ;;  %397 = vperm.xlu0 %1124, %v347_v20  }
  0x1a   : > { %1078 = vmatmul.mubr.msk.bf16.vlgmr.msra.gmra.mrb[0].mxu0 %vm480_vm0, %v1129_v9  ;;  %1086 = vmatmul.mubr.msk.bf16.vlgmr.msra.gmra.mrb[0].mxu1 %vm480_vm0, %v1130_v10 }
  0x1b   : > { %1081 = vmatprep.mubr.msk.bf16.mxu0 %vm480_vm0, %v1131_v11  ;;  %1089 = vmatprep.mubr.msk.bf16.mxu1 %vm480_vm0, %v1132_v12 }
  0x1d   : > { %412 = vperm.xlu1 %1125, %v350_v21   ;;  %407 = vperm.xlu0 %1124, %v349_v22  }
  0x21   : > { %422 = vperm.xlu1 %1125, %v352_v23   ;;  %417 = vperm.xlu0 %1124, %v351_v24  }
  0x22   : > { %1082 = vmatmul.mubr.msk.bf16.gmra.mrb[4].mxu0 %vm480_vm0, %v1133_v17  ;;  %1090 = vmatmul.mubr.msk.bf16.gmra.mrb[4].mxu1 %vm480_vm0, %v1134_v18 }
  0x25   : > { %432 = vperm.xlu1 %1125, %v354_v25   ;;  %427 = vperm.xlu0 %1124, %v353_v26  }
  0x88   : > { %v368_v29 = vpop.permute.xlu1 %367  ;;  %v358_v30 = vpop.permute.xlu0 %357 }
  0x8c   : > { %v373_v31 = vpop.permute.xlu1 %372  ;;  %v363_v32 = vpop.permute.xlu0 %362 }
  0x90   : > { %v1332_v33 = vpop.permute.xlu1 %382  ;;  %v378_v34 = vpop.permute.xlu0 %377 }
  0x94   : > { %v393_v35 = vpop.permute.xlu1 %392  ;;  %v388_v36 = vpop.permute.xlu0 %387 }
  0x98   : > { %v403_v37 = vpop.permute.xlu1 %402  ;;  %v398_v38 = vpop.permute.xlu0 %397 }
  0x9c   : > { %v413_v39 = vpop.permute.xlu1 %412  ;;  %v408_v40 = vpop.permute.xlu0 %407 }
  0xa0   : > { %v423_v41 = vpop.permute.xlu1 %422  ;;  %v418_v42 = vpop.permute.xlu0 %417 }
  0xa4   : > { %v433_v59 = vpop.permute.xlu1 %432  ;;  %v428_v60 = vpop.permute.xlu0 %427 }
  0xed   : > { %v1079_v43 = vpop.f32.mrb[0].mxu0  ;;  %v1087_v44 = vpop.f32.mrb[0].mxu1 }
  0xee   : > { %v1340_v45 = vadd.f32 %v1079_v43, %v368_v29  ;;  %v1342_v46 = vadd.f32 %v1087_v44, %v408_v40  ;;  %v542_v47 = vpop.f32.mrb[1].mxu0  ;;  %v574_v48 = vpop.f32.mrb[1].mxu1 }
  0xef   : > { %v1344_v49 = vadd.f32 %v542_v47, %v358_v30  ;;  %v1346_v50 = vadd.f32 %v574_v48, %v398_v38  ;;  %v1080_v51 = vpop.f32.mrb[2].mxu0  ;;  %v1088_v52 = vpop.f32.mrb[2].mxu1  ;;  %v766_v48 = vlaneseq }
  0xf0   : > { %608 = vst.msk [vmem:[%s1338_s30 + $0x10] sm:$0xff] %vm605_vm2, %v1340_v45  ;;  %616 = vst.msk [vmem:[%s1338_s30 + $0x50] sm:$0xff] %vm605_vm2, %v1342_v46  ;;  %v1354_v53 = vadd.f32 %v1080_v51, %v373_v31  ;;  %v1356_v54 = vadd.f32 %v1088_v52, %v413_v39  ;;  %v545_v55 = vpop.f32.mrb[3].mxu0  ;;  %v577_v56 = vpop.f32.mrb[3].mxu1  ;;  %v724_v3 = vsel %vm605_vm2, %v1340_v45, -inf  ;;  %v738_v4 = vsel %vm605_vm2, %v1342_v46, -inf }
  0xf1   : > { %606 = vst.msk [vmem:[%s1338_s30] sm:$0xff] %vm605_vm2, %v1344_v49  ;;  %614 = vst.msk [vmem:[%s1338_s30 + $0x40] sm:$0xff] %vm605_vm2, %v1346_v50  ;;  %v1364_v57 = vadd.f32 %v545_v55, %v363_v32  ;;  %v1366_v58 = vadd.f32 %v577_v56, %v403_v37  ;;  %v722_v9 = vsel %vm605_vm2, %v1344_v49, -inf  ;;  %v734_v15 = vsel %vm605_vm2, %v1346_v50, -inf }
  0xf2   : > { %609 = vst.msk [vmem:[%s1338_s30 + $0x18] sm:$0xff] %vm605_vm2, %v1354_v53  ;;  %617 = vst.msk [vmem:[%s1338_s30 + $0x58] sm:$0xff] %vm605_vm2, %v1356_v54  ;;  %v725_v19 = vsel %vm605_vm2, %v1354_v53, -inf  ;;  %v740_v27 = vsel %vm605_vm2, %v1356_v54, -inf  ;;  %v767_v55 = vshrl.u32 %v766_v48, 7 }
  0xf3   : > { %607 = vst.msk [vmem:[%s1338_s30 + $0x8] sm:$0xff] %vm605_vm2, %v1364_v57  ;;  %615 = vst.msk [vmem:[%s1338_s30 + $0x48] sm:$0xff] %vm605_vm2, %v1366_v58  ;;  %v723_v23 = vsel %vm605_vm2, %v1364_v57, -inf  ;;  %v736_v31 = vsel %vm605_vm2, %v1366_v58, -inf }
  0xf5   : > { %v1083_v61 = vpop.f32.mrb[4].mxu0  ;;  %v1091_v62 = vpop.f32.mrb[4].mxu1 }
  0xf6   : > { %v1380_v63 = vadd.f32 %v1083_v61, %v388_v36  ;;  %v1382_v0 = vadd.f32 %v1091_v62, %v428_v60  ;;  %v558_v1 = vpop.f32.mrb[5].mxu0  ;;  %v590_v2 = vpop.f32.mrb[5].mxu1  ;;  %v768_v61 = vsub.s32 0, %v767_v55 }
  0xf7   : > { %v1388_v5 = vadd.f32 %v558_v1, %v378_v34  ;;  %v1390_v6 = vadd.f32 %v590_v2, %v418_v42  ;;  %v1084_v7 = vpop.f32.mrb[6].mxu0  ;;  %v1092_v8 = vpop.f32.mrb[6].mxu1 }
  0xf8   : > { %612 = vst.msk [vmem:[%s1338_s30 + $0x30] sm:$0xff] %vm605_vm2, %v1380_v63  ;;  %v730_v10 = vsel %vm605_vm2, %v1380_v63, -inf  ;;  %620 = vst.msk [vmem:[%s1338_s30 + $0x70] sm:$0xff] %vm605_vm2, %v1382_v0  ;;  %v1402_v11 = vadd.f32 %v1084_v7, %v393_v35  ;;  %v1404_v12 = vadd.f32 %v1092_v8, %v433_v59  ;;  %v561_v13 = vpop.f32.mrb[7].mxu0  ;;  %v593_v14 = vpop.f32.mrb[7].mxu1  ;;  %v746_v28 = vsel %vm605_vm2, %v1382_v0, -inf }
  0xf9   : > { %v731_v16 = vmax.f32 %v724_v3, %v730_v10  ;;  %610 = vst.msk [vmem:[%s1338_s30 + $0x20] sm:$0xff] %vm605_vm2, %v1388_v5  ;;  %v726_v17 = vsel %vm605_vm2, %v1388_v5, -inf  ;;  %618 = vst.msk [vmem:[%s1338_s30 + $0x60] sm:$0xff] %vm605_vm2, %v1390_v6  ;;  %v1417_v18 = vadd.f32 %v561_v13, %v1332_v33  ;;  %v1429_v22 = vadd.f32 %v593_v14, %v423_v41  ;;  %v1453_v59 = vld [vmem:[#allocation2] sm:$0x1] }
  0xfa   : > { %v727_v20 = vmax.f32 %v722_v9, %v726_v17  ;;  %613 = vst.msk [vmem:[%s1338_s30 + $0x38] sm:$0xff] %vm605_vm2, %v1402_v11  ;;  %v732_v21 = vsel %vm605_vm2, %v1402_v11, -inf  ;;  %621 = vst.msk [vmem:[%s1338_s30 + $0x78] sm:$0xff] %vm605_vm2, %v1404_v12  ;;  %v742_v33 = vsel %vm605_vm2, %v1390_v6, -inf  ;;  %v748_v36 = vsel %vm605_vm2, %v1404_v12, -inf }
  0xfb   : > { %v739_v24 = vmax.f32 %v731_v16, %v738_v4  ;;  %v733_v25 = vmax.f32 %v725_v19, %v732_v21  ;;  %611 = vst.msk [vmem:[%s1338_s30 + $0x28] sm:$0xff] %vm605_vm2, %v1417_v18  ;;  %v728_v26 = vsel %vm605_vm2, %v1417_v18, -inf  ;;  %619 = vst.msk [vmem:[%s1338_s30 + $0x68] sm:$0xff] %vm605_vm2, %v1429_v22  ;;  %v744_v39 = vsel %vm605_vm2, %v1429_v22, -inf }
  0xfc   : > { %v735_v29 = vmax.f32 %v727_v20, %v734_v15  ;;  %v729_v30 = vmax.f32 %v723_v23, %v728_v26 }
  0xfd   : > { %v747_v32 = vmax.f32 %v739_v24, %v746_v28  ;;  %v741_v34 = vmax.f32 %v733_v25, %v740_v27 }
  0xfe   : > { %v743_v35 = vmax.f32 %v735_v29, %v742_v33  ;;  %v737_v37 = vmax.f32 %v729_v30, %v736_v31 }
  0xff   : > { %v749_v38 = vmax.f32 %v741_v34, %v748_v36 }
 0x100   : > { %v745_v40 = vmax.f32 %v737_v37, %v744_v39 }
 0x101   : > { %v751_v41 = vmax.f32 %v747_v32, %v749_v38 }
 0x102   : > { %v750_v42 = vmax.f32 %v743_v35, %v745_v40 }
 0x104   : > { %v752_v43 = vmax.f32 %v750_v42, %v751_v41 }
 0x106   : > { %v753_v44 = vrot.slane %v752_v43, 4 }
 0x108   : > { %v754_v47 = vmax.f32 %v752_v43, %v753_v44 }
 0x10a   : > { %v755_v51 = vrot.slane %v754_v47, 2 }
 0x10c   : > { %v756_v52 = vmax.f32 %v754_v47, %v755_v51 }
 0x10e   : > { %v757_v56 = vrot.slane %v756_v52, 1 }
 0x110   : > { %v758_v60 = vmax.f32 %v756_v52, %v757_v56 }
 0x112   : > { %v1456_v62 = vmax.f32 %v1453_v59, %v758_v60 }
 0x114   : > { %v1459_v1 = vrot.slane %v1456_v62, %v768_v61  ;;  %859 = vst.msk [vmem:[#allocation2] sm:$0x1] %vm318_vm1, %v1456_v62 }
 0x116   : > { %v771_v2 = vsub.f32 %v1344_v49, %v1459_v1  ;;  %v772_v3 = vsub.f32 %v1364_v57, %v1459_v1  ;;  %v773_v4 = vsub.f32 %v1340_v45, %v1459_v1  ;;  %v774_v7 = vsub.f32 %v1354_v53, %v1459_v1 }
 0x117   : > { %v775_v8 = vsub.f32 %v1388_v5, %v1459_v1  ;;  %v776_v9 = vsub.f32 %v1417_v18, %v1459_v1  ;;  %v777_v10 = vsub.f32 %v1380_v63, %v1459_v1  ;;  %v778_v49 = vsub.f32 %v1402_v11, %v1459_v1 }
 0x118   : > { %v779_v57 = vsub.f32 %v1346_v50, %v1459_v1  ;;  %v780_v45 = vsub.f32 %v1366_v58, %v1459_v1  ;;  %v781_v53 = vsub.f32 %v1342_v46, %v1459_v1  ;;  %v782_v5 = vsub.f32 %v1356_v54, %v1459_v1 }
 0x119   : > { %v783_v13 = vsub.f32 %v1390_v6, %v1459_v1  ;;  %v784_v63 = vsub.f32 %v1429_v22, %v1459_v1  ;;  %v785_v11 = vsub.f32 %v1382_v0, %v1459_v1  ;;  %v786_v50 = vsub.f32 %v1404_v12, %v1459_v1 }
 0x11a   : > { %v787_v14 = vmul.f32 1.442695, %v771_v2  ;;  %v789_v58 = vmul.f32 1.442695, %v772_v3  ;;  %v791_v15 = vmul.f32 1.442695, %v773_v4 }
 0x11b   : > { %v793_v16 = vmul.f32 1.442695, %v774_v7  ;;  %v795_v46 = vmul.f32 1.442695, %v775_v8  ;;  %v797_v54 = vmul.f32 1.442695, %v776_v9  ;;  %v761_v8 = vsub.f32 %v1453_v59, %v1456_v62 }
 0x11c   : > { %1135 = vpow2.f32 %v787_v14  ;;  %v799_v6 = vmul.f32 1.442695, %v777_v10  ;;  %v801_v17 = vmul.f32 1.442695, %v778_v49  ;;  %v803_v18 = vmul.f32 1.442695, %v779_v57 }
 0x11d   : > { %1137 = vpow2.f32 %v789_v58  ;;  %v805_v12 = vmul.f32 1.442695, %v780_v45  ;;  %v807_v24 = vmul.f32 1.442695, %v781_v53  ;;  %v809_v28 = vmul.f32 1.442695, %v782_v5 }
 0x11e   : > { %1139 = vpow2.f32 %v791_v15  ;;  %v811_v32 = vmul.f32 1.442695, %v783_v13  ;;  %v813_v36 = vmul.f32 1.442695, %v784_v63  ;;  %v815_v40 = vmul.f32 1.442695, %v785_v11 }
 0x11f   : > { %1141 = vpow2.f32 %v793_v16  ;;  %v817_v44 = vmul.f32 1.442695, %v786_v50  ;;  %v762_v5 = vmul.f32 1.442695, %v761_v8 }
 0x120   : > { %1143 = vpow2.f32 %v795_v46 }
 0x121   : > { %1145 = vpow2.f32 %v797_v54 }
 0x122   : > { %1147 = vpow2.f32 %v799_v6  ;;  %v760_v6 = vld [vmem:[#allocation3] sm:$0x1] }
 0x123   : > { %1149 = vpow2.f32 %v801_v17 }
 0x124   : > { %1151 = vpow2.f32 %v803_v18 }
 0x125   : > { %1153 = vpow2.f32 %v805_v12 }
 0x126   : > { %v1136_v0 = vpop.eup %1135  ;;  %1155 = vpow2.f32 %v807_v24 }
 0x127   : > { %v1138_v19 = vpop.eup %1137  ;;  %v819_v20 = vsel %vm605_vm2, %v1136_v0, 0.0  ;;  %1157 = vpow2.f32 %v809_v28 }
 0x128   : > { %v1140_v21 = vpop.eup %1139  ;;  %v820_v22 = vsel %vm605_vm2, %v1138_v19, 0.0  ;;  %1159 = vpow2.f32 %v811_v32 }
 0x129   : > { %v1142_v23 = vpop.eup %1141  ;;  %v821_v25 = vadd.f32 %v820_v22, %v819_v20  ;;  %v822_v26 = vsel %vm605_vm2, %v1140_v21, 0.0  ;;  %1161 = vpow2.f32 %v813_v36  ;;  %v863_v22 = vld [vmem:[#allocation2] sm:$0x1] }
 0x12a   : > { %v1144_v27 = vpop.eup %1143  ;;  %v824_v30 = vsel %vm605_vm2, %v1142_v23, 0.0  ;;  %1163 = vpow2.f32 %v815_v40 }
 0x12b   : > { %v823_v29 = vadd.f32 %v822_v26, %v821_v25  ;;  %v1146_v31 = vpop.eup %1145  ;;  %v826_v34 = vsel %vm605_vm2, %v1144_v27, 0.0  ;;  %1165 = vpow2.f32 %v817_v44 }
 0x12c   : > { %v1148_v35 = vpop.eup %1147  ;;  %v828_v38 = vsel %vm605_vm2, %v1146_v31, 0.0  ;;  %1167 = vpow2.f32 %v762_v5 }
 0x12d   : > { %v825_v33 = vadd.f32 %v824_v30, %v823_v29  ;;  %v1150_v39 = vpop.eup %1149  ;;  %v830_v42 = vsel %vm605_vm2, %v1148_v35, 0.0 }
 0x12e   : > { %v1152_v43 = vpop.eup %1151  ;;  %v832_v48 = vsel %vm605_vm2, %v1150_v39, 0.0 }
 0x12f   : > { %v827_v37 = vadd.f32 %v826_v34, %v825_v33  ;;  %v1154_v51 = vpop.eup %1153  ;;  %v834_v55 = vsel %vm605_vm2, %v1152_v43, 0.0 }
 0x130   : > { %v1156_v56 = vpop.eup %1155  ;;  %v836_v61 = vsel %vm605_vm2, %v1154_v51, 0.0 }
 0x131   : > { %v829_v41 = vadd.f32 %v828_v38, %v827_v37  ;;  %v1158_v1 = vpop.eup %1157  ;;  %v838_v3 = vsel %vm605_vm2, %v1156_v56, 0.0 }
 0x132   : > { %v1160_v4 = vpop.eup %1159  ;;  %v840_v9 = vsel %vm605_vm2, %v1158_v1, 0.0 }
 0x133   : > { %v831_v47 = vadd.f32 %v830_v42, %v829_v41  ;;  %v1162_v10 = vpop.eup %1161  ;;  %v842_v57 = vsel %vm605_vm2, %v1160_v4, 0.0 }
 0x134   : > { %v1164_v45 = vpop.eup %1163  ;;  %v844_v13 = vsel %vm605_vm2, %v1162_v10, 0.0 }
 0x135   : > { %v833_v52 = vadd.f32 %v832_v48, %v831_v47  ;;  %v1166_v63 = vpop.eup %1165  ;;  %v846_v50 = vsel %vm605_vm2, %v1164_v45, 0.0 }
 0x136   : > { %v848_v58 = vsel %vm605_vm2, %v1166_v63, 0.0  ;;  %v1168_v54 = vpop.eup %1167 }
 0x137   : > { %v835_v60 = vadd.f32 %v834_v55, %v833_v52  ;;  %v764_v18 = vmul.f32 %v1168_v54, %v760_v6 }
 0x139   : > { %v837_v2 = vadd.f32 %v836_v61, %v835_v60 }
 0x13b   : > { %v839_v7 = vadd.f32 %v838_v3, %v837_v2 }
 0x13d   : > { %v841_v49 = vadd.f32 %v840_v9, %v839_v7 }
 0x13f   : > { %v843_v53 = vadd.f32 %v842_v57, %v841_v49 }
 0x141   : > { %v845_v11 = vadd.f32 %v844_v13, %v843_v53 }
 0x143   : > { %v847_v14 = vadd.f32 %v846_v50, %v845_v11 }
 0x145   : > { %v849_v59 = vadd.f32 %v848_v58, %v847_v14 }
 0x147   : > { %v850_v62 = vrot.slane %v849_v59, 4 }
 0x149   : > { %v851_v15 = vadd.f32 %v850_v62, %v849_v59 }
 0x14b   : > { %v852_v16 = vrot.slane %v851_v15, 2 }
 0x14d   : > { %v853_v46 = vadd.f32 %v852_v16, %v851_v15 }
 0x14f   : > { %v854_v17 = vrot.slane %v853_v46, 1 }
 0x151   : > { %v855_v0 = vadd.f32 %v854_v17, %v853_v46 }
 0x153   : > { %v856_v19 = vadd.f32 %v855_v0, %v764_v18 }
 0x155   : > { %858 = vst.msk [vmem:[#allocation3] sm:$0x1] %vm318_vm1, %v856_v19 }
 0x15c   : > { %v864_v12 = vld [vmem:[#allocation3] sm:$0x1] }
 0x15d   : > { %1169 = vlog2.f32 %v864_v12 }
 0x167   : > { %v1170_v20 = vpop.eup %1169 }
 0x168   : > { %v866_v21 = vmul.f32 0.6931472, %v1170_v20 }
 0x16a   : > { %v867_v23 = vadd.f32 %v866_v21, %v863_v22 }
 0x16c   : > { %868 = vst.msk [vmem:[%s312_s7] sm:$0x1] %vm318_vm1, %v867_v23 }
 0x16d PF: > { %s15_s17 = sadd.s32 1, %s1193_s17   ;;  %s1533_s15 = smov %s1189_s16 }
 0x16e   : > { %p12_p5 = scmp.ge.s32.totalorder %s15_s17, 4   ;;  %s1534_s16 = smov %s1536_s18 }
 0x170   :  { %14 = sbr.rel (!%p12_p5) target bundleno = 2 (0x2), region = 88 }

// kernel: model_forward.9
= control target key start
LH: loop header
LB: loop body
LE: loop exit
PB: predicated region body
PF: predicated region fallthrough
CT: control target
= control target key end

     0   :  { %s4858_s6 = smov 1   ;;  %s4859_s10 = smov 2   ;;  %s5578_s0 = inlined_call_operand.smem [shape: u32[39], index: -1, kind: input, shape index: {}] }
   0x1   :  { %s4908_s5 = sld [smem:[%s5578_s0]]   ;;  %s4860_s14 = smov 3  }
   0x2   :  { %s4913_s9 = sld [smem:[%s5578_s0 + %s4858_s6]]   ;;  %s4861_s18 = smov 4  }
   0x3   :  { %s4918_s13 = sld [smem:[%s5578_s0 + %s4859_s10]]   ;;  %s4862_s22 = smov 5  }
   0x4   :  { %s4923_s17 = sld [smem:[%s5578_s0 + %s4860_s14]]   ;;  %s4863_s26 = smov 6  }
   0x5   :  { %s4928_s21 = sld [smem:[%s5578_s0 + %s4861_s18]]   ;;  %s4864_s30 = smov 7  }
   0x6   :  { %s4933_s25 = sld [smem:[%s5578_s0 + %s4862_s22]]   ;;  %s4865_s4 = smov 8  }
   0x7   :  { %s4938_s29 = sld [smem:[%s5578_s0 + %s4863_s26]]   ;;  %s4866_s10 = smov 9  }
   0x8   :  { %5589 = sst [smem:[#allocation7_spill]] %s4913_s9  ;;  %s4867_s15 = smov 10  }
   0x9   :  { %s4943_s3 = sld [smem:[%s5578_s0 + %s4864_s30]]   ;;  %s4868_s20 = smov 11  }
   0xa   :  { %s4948_s8 = sld [smem:[%s5578_s0 + %s4865_s4]]   ;;  %s4869_s26 = smov 12  }
   0xb   :  { %s4953_s14 = sld [smem:[%s5578_s0 + %s4866_s10]]   ;;  %s4870_s1 = smov 13  }
   0xc   :  { %s4958_s19 = sld [smem:[%s5578_s0 + %s4867_s15]]   ;;  %s4871_s7 = smov 14  }
   0xd   :  { %s4963_s24 = sld [smem:[%s5578_s0 + %s4868_s20]]   ;;  %s4872_s15 = smov 15  }
   0xe   :  { %s4968_s30 = sld [smem:[%s5578_s0 + %s4869_s26]]   ;;  %s4873_s22 = smov 16  }
   0xf   :  { %s4973_s6 = sld [smem:[%s5578_s0 + %s4870_s1]]   ;;  %s4874_s28 = smov 17  }
  0x10   :  { %s4978_s12 = sld [smem:[%s5578_s0 + %s4871_s7]]   ;;  %s4875_s7 = smov 18  }
  0x11   :  { %s4983_s20 = sld [smem:[%s5578_s0 + %s4872_s15]]   ;;  %s4876_s15 = smov 19  }
  0x12   :  { %s4988_s27 = sld [smem:[%s5578_s0 + %s4873_s22]]   ;;  %s4877_s22 = smov 20  }
  0x13   :  { %s4993_s4 = sld [smem:[%s5578_s0 + %s4874_s28]]   ;;  %s4878_s28 = smov 21  }
  0x14   :  { %s4998_s9 = sld [smem:[%s5578_s0 + %s4875_s7]]   ;;  %s4879_s7 = smov 22  }
  0x16   :  { %5590 = sst [smem:[#allocation8_spill]] %s4978_s12 }
  0x17   :  { %5591 = sst [smem:[#allocation9_spill]] %s4983_s20 }
  0x18   :  { %5592 = sst [smem:[#allocation10_spill]] %s4988_s27 }
  0x19   :  { %5593 = sst [smem:[#allocation11_spill]] %s4993_s4 }
  0x1a   :  { %s5003_s20 = sld [smem:[%s5578_s0 + %s4876_s15]]   ;;  %s4880_s15 = smov 23  }
  0x1b   :  { %s5008_s27 = sld [smem:[%s5578_s0 + %s4877_s22]]   ;;  %s4881_s22 = smov 24  }
  0x1c   :  { %s5013_s4 = sld [smem:[%s5578_s0 + %s4878_s28]]   ;;  %s4882_s28 = smov 25  }
  0x1d   :  { %s5018_s12 = sld [smem:[%s5578_s0 + %s4879_s7]]   ;;  %s4883_s7 = smov 26  }
  0x20   :  { %5594 = sst [smem:[#allocation12_spill]] %s5003_s20 }
  0x21   :  { %5595 = sst [smem:[#allocation13_spill]] %s5008_s27 }
  0x22   :  { %5596 = sst [smem:[#allocation14_spill]] %s5013_s4 }
  0x23   :  { %5597 = sst [smem:[#allocation15_spill]] %s5018_s12 }
  0x24   :  { %s5023_s20 = sld [smem:[%s5578_s0 + %s4880_s15]]   ;;  %s4884_s15 = smov 27  }
  0x25   :  { %s5028_s27 = sld [smem:[%s5578_s0 + %s4881_s22]]   ;;  %s4885_s22 = smov 28  }
  0x26   :  { %s5033_s4 = sld [smem:[%s5578_s0 + %s4882_s28]]   ;;  %s4886_s28 = smov 29  }
  0x27   :  { %s5038_s12 = sld [smem:[%s5578_s0 + %s4883_s7]]   ;;  %s4887_s7 = smov 30  }
  0x2a   :  { %5598 = sst [smem:[#allocation16_spill]] %s5023_s20 }
  0x2b   :  { %5599 = sst [smem:[#allocation17_spill]] %s5028_s27 }
  0x2c   :  { %5600 = sst [smem:[#allocation18_spill]] %s5033_s4 }
  0x2d   :  { %5601 = sst [smem:[#allocation19_spill]] %s5038_s12 }
  0x2e   :  { %s5043_s20 = sld [smem:[%s5578_s0 + %s4884_s15]]   ;;  %s4888_s15 = smov 31  }
  0x2f   :  { %s5048_s27 = sld [smem:[%s5578_s0 + %s4885_s22]]   ;;  %s4889_s22 = smov 32  }
  0x30   :  { %s5053_s4 = sld [smem:[%s5578_s0 + %s4886_s28]]   ;;  %s4890_s28 = smov 33  }
  0x31   :  { %s5058_s12 = sld [smem:[%s5578_s0 + %s4887_s7]]   ;;  %s4891_s7 = smov 34  }
  0x34   :  { %5602 = sst [smem:[#allocation20_spill]] %s5043_s20 }
  0x35   :  { %5603 = sst [smem:[#allocation21_spill]] %s5048_s27 }
  0x36   :  { %5604 = sst [smem:[#allocation22_spill]] %s5053_s4 }
  0x37   :  { %5605 = sst [smem:[#allocation23_spill]] %s5058_s12 }
  0x38   :  { %s5063_s20 = sld [smem:[%s5578_s0 + %s4888_s15]]   ;;  %s4892_s15 = smov 35  }
  0x39   :  { %s5068_s27 = sld [smem:[%s5578_s0 + %s4889_s22]]   ;;  %s4893_s22 = smov 36  }
  0x3a   :  { %s5073_s4 = sld [smem:[%s5578_s0 + %s4890_s28]]   ;;  %s4894_s28 = smov 37  }
  0x3b   :  { %s5078_s12 = sld [smem:[%s5578_s0 + %s4891_s7]]   ;;  %s4895_s7 = smov 38  }
  0x3e   :  { %5606 = sst [smem:[#allocation24_spill]] %s5063_s20 }
  0x3f   :  { %5607 = sst [smem:[#allocation25_spill]] %s5068_s27 }
  0x40   :  { %5608 = sst [smem:[#allocation26_spill]] %s5073_s4 }
  0x41   :  { %5609 = sst [smem:[#allocation27_spill]] %s5078_s12 }
  0x42   :  { %s5083_s20 = sld [smem:[%s5578_s0 + %s4892_s15]]   ;;  %s5100_s15 = smov 0  }
  0x43   :  { %s5088_s27 = sld [smem:[%s5578_s0 + %s4893_s22]]  }
  0x44   :  { %s5093_s4 = sld [smem:[%s5578_s0 + %s4894_s28]]  }
  0x45   :  { %s5098_s12 = sld [smem:[%s5578_s0 + %s4895_s7]]  }
  0x46 LB: > { %s3967_s16 = sadd.s32 4294967295, %s4856_s15   ;;  %p3971_p0 = scmp.ge.s32.totalorder %s4856_s15, 1  ;;  %s4856_s15 = sphi %s5100_s15, %s87_s15  }
  0x47   : > { %p1058_p1 = scmp.lt.s32.totalorder %s4856_s15, 3 }
  0x49   : > { %p1059_p2 = pnand %p3971_p0, %p1058_p1 }
  0x4a   : > { %p1153_p3 = scmp.lt.s32.totalorder (!%p1059_p2), %s3967_s16, 1  ;;  %vm1167_vm0 = vcmask (!%p1059_p2), 523264   ;;  %v4712_v8 = vld [vmem:[%s4928_s21] sm:$0xff] (!%p1059_p2)   ;;  %v4896_v9 = vmov (!%p1059_p2), 0.0   ;;  %vm4897_vm1 = vmmov (!%p1059_p2), 0   ;;  %v4713_v10 = vld [vmem:[%s4928_s21 + $0x8] sm:$0xff] (!%p1059_p2)  }
  0x4b   : > { %1062 = sbr.rel (%p1059_p2) target bundleno = 7191 (0x1c17), region = 172  ;;  %4344 = vmatprep.subr.bf16.mxu0 (!%p1059_p2), %v4896_v9  ;;  %4352 = vmatprep.mubr.msk.bf16.mxu0 (!%p1059_p2), %vm4897_vm1, %v4896_v9  ;;  %v4714_v11 = vld [vmem:[%s4928_s21 + $0x10] sm:$0xff] (!%p1059_p2)   ;;  %v4715_v12 = vld [vmem:[%s4928_s21 + $0x18] sm:$0xff] (!%p1059_p2)   ;;  %v3974_v17 = vld [vmem:[%s4918_s13] ss:$0 sm:$0xff] (!%p1059_p2)  ;;  %s5610_s22 = sld [smem:[#allocation8_spill]] (!%p1059_p2) }
  0x4c   : > { %4345 = vmatpush3.bf16.msra.mxu0 (!%p1059_p2), %v4712_v8  ;;  %4356 = vmatprep.subr.bf16.mxu1 (!%p1059_p2), %v4896_v9  ;;  %v3975_v19 = vld [vmem:[%s4923_s17] ss:$0 sm:$0xff] (!%p1059_p2)  ;;  %v4717_v24 = vld [vmem:[%s4938_s29 + $0x8] sm:$0xff] (!%p1059_p2)   ;;  %v4718_v25 = vld [vmem:[%s4938_s29 + $0x10] sm:$0xff] (!%p1059_p2)   ;;  %vm1609_vm2 = vcmask (!%p1059_p2), 1042432   ;;  %vm1619_vm3 = vcmask (!%p1059_p2), 1041408  }
  0x4d   : > { %4346 = vmatprep.subr.bf16.mxu0 (!%p1059_p2), %v4896_v9  ;;  %4372 = vmatprep.mubr.msk.bf16.mxu1 (!%p1059_p2), %vm4897_vm1, %v4896_v9  ;;  %v4716_v23 = vld [vmem:[%s4938_s29] sm:$0xff] (!%p1059_p2)   ;;  %v4719_v26 = vld [vmem:[%s4938_s29 + $0x18] sm:$0xff] (!%p1059_p2)   ;;  %v4721_v28 = vld [vmem:[%s4938_s29 + $0x28] sm:$0xff] (!%p1059_p2)   ;;  %vm1629_vm4 = vcmask (!%p1059_p2), 1040384   ;;  %vm1639_vm5 = vcmask (!%p1059_p2), 1046528   ;;  %vm1649_vm6 = vcmask (!%p1059_p2), 1045504  }
  0x4e   : > { %4357 = vmatpush3.bf16.msra.mxu1 (!%p1059_p2), %v4716_v23  ;;  %v4720_v27 = vld [vmem:[%s4938_s29 + $0x20] sm:$0xff] (!%p1059_p2)   ;;  %v4722_v29 = vld [vmem:[%s4938_s29 + $0x30] sm:$0xff] (!%p1059_p2)   ;;  %v4723_v30 = vld [vmem:[%s4938_s29 + $0x38] sm:$0xff] (!%p1059_p2)   ;;  %s5611_s23 = sld [smem:[#allocation9_spill]] (!%p1059_p2)  ;;  %s5612_s26 = sld [smem:[#allocation10_spill]] (!%p1059_p2)  ;;  %vm1659_vm7 = vcmask (!%p1059_p2), 1044480  }
  0x4f   : > { %4358 = vmatprep.subr.bf16.mxu1 (!%p1059_p2), %v4896_v9  ;;  %v3976_v31 = vld [vmem:[%s4933_s25] ss:$0 sm:$0xff] (!%p1059_p2)  ;;  %v4725_v58 = vld [vmem:[%s4958_s19 + $0x8] sm:$0xff] (!%p1059_p2)   ;;  %v4726_v59 = vld [vmem:[%s4958_s19 + $0x10] sm:$0xff] (!%p1059_p2)   ;;  %s5613_s28 = sld [smem:[#allocation11_spill]] (!%p1059_p2)  ;;  %s5614_s1 = sld [smem:[#allocation12_spill]] (!%p1059_p2) }
  0x50   : > { %4347 = vmatpush3.bf16.msra.mxu0 (!%p1059_p2), %v4713_v10  ;;  %v3983_v43 = vld [vmem:[%s4943_s3] ss:$0 sm:$0xff] (!%p1059_p2)  ;;  %v4727_v60 = vld [vmem:[%s4958_s19 + $0x18] sm:$0xff] (!%p1059_p2)   ;;  %v4729_v8 = vld [vmem:[%s4968_s30 + $0x8] sm:$0xff] (!%p1059_p2)   ;;  %s5615_s2 = sld [smem:[#allocation15_spill]] (!%p1059_p2)  ;;  %s5616_s7 = sld [smem:[#allocation17_spill]] (!%p1059_p2) }
  0x51   : > { %4348 = vmatprep.subr.bf16.mxu0 (!%p1059_p2), %v4896_v9  ;;  %v4724_v57 = vld [vmem:[%s4958_s19] sm:$0xff] (!%p1059_p2)   ;;  %v4730_v10 = vld [vmem:[%s4968_s30 + $0x10] sm:$0xff] (!%p1059_p2)   ;;  %s5617_s10 = sld [smem:[#allocation13_spill]] (!%p1059_p2)  ;;  %s5618_s11 = sld [smem:[#allocation14_spill]] (!%p1059_p2)  ;;  %vm2062_vm8 = vcmask (!%p1059_p2), 130048   ;;  %vm2055_vm9 = vcmask (!%p1059_p2), 125952  }
  0x52   : > { %s5633_s16 = smov (!%p1153_p3, %s3967_s16), 1  ;;  %4359 = vmatpush3.bf16.msra.mxu1 %v4717_v24  ;;  %2063 = vst.msk [vmem:[#allocation6] sm:$0xff] %vm2062_vm8, %v4896_v9  ;;  %vm2160_vm10 = vcmask 1043456   ;;  %vm2059_vm11 = vcmask 7168   ;;  %vm2126_vm13 = vcmask 64512   ;;  %vm3865_vm14 = vcmask 519168  }
  0x53   : > { %s5588_s0 = sshll.u32 %s5633_s16, 2  ;;  %4360 = vmatprep.subr.bf16.mxu1 %v4896_v9  ;;  %2061 = vst.msk [vmem:[#allocation5] sm:$0xff] %vm2059_vm11, %v4896_v9 }
  0x54   : > { %s1156_s18 = scalar_lea.vmem %s4908_s5, %s5588_s0  ;;  %4349 = vmatpush3.bf16.msra.mxu0 %v4714_v11  ;;  %v4731_v11 = vld [vmem:[%s4968_s30 + $0x18] sm:$0xff]   ;;  %s5629_s0 = sld [smem:[#allocation27_spill]] }
  0x55   : > { %v1165_v0 = vld [vmem:[%s1156_s18] sm:$0xf]  ;;  %4350 = vmatprep.subr.bf16.mxu0 %v4896_v9  ;;  %s5619_s18 = sld [smem:[#allocation19_spill]] }
  0x56   : > { %v5114_v1 = vunpack.c.l.bf16 %v1165_v0  ;;  %4361 = vmatpush3.bf16.msra.mxu1 %v4718_v25 }
  0x57   : > { %4362 = vmatprep.subr.bf16.mxu1 %v4896_v9 }
  0x58   : > { %v1168_v2 = vsel %vm1167_vm0, %v5114_v1, 0.0  ;;  %4351 = vmatpush3.bf16.msra.mxu0 %v4715_v12  ;;  %v4732_v12 = vld [vmem:[%s4998_s9] sm:$0xff]  }
  0x59   : > { %1169 = vadd.xlane.f32.xlu0 %v1168_v2  ;;  %4376 = vmatprep.subr.bf16.mxu0 %v4896_v9 }
  0x5a   : > { %4363 = vmatpush3.bf16.msra.mxu1 %v4719_v26 }
  0x5b   : > { %4364 = vmatprep.subr.bf16.mxu1 %v4896_v9 }
  0x5e   : > { %4365 = vmatpush3.bf16.msra.mxu1 %v4720_v27 }
  0x5f   : > { %4366 = vmatprep.subr.bf16.mxu1 %v4896_v9 }
  0x62   : > { %4367 = vmatpush3.bf16.msra.mxu1 %v4721_v28 }
  0x63   : > { %4368 = vmatprep.subr.bf16.mxu1 %v4896_v9 }
  0x66   : > { %4369 = vmatpush3.bf16.msra.mxu1 %v4722_v29  ;;  %v1601_v29 = vlaneseq }
  0x67   : > { %4370 = vmatprep.subr.bf16.mxu1 %v4896_v9 }
  0x6a   : > { %4371 = vmatpush3.bf16.msra.mxu1 %v4723_v30  ;;  %v5200_v30 = vshrl.u32 %v1601_v29, 7 }
  0x6b   : > { %4400 = vmatprep.subr.bf16.mxu1 %v4896_v9 }
  0xe6   : > { %v1170_v3 = vpop.xlane.xlu0 %1169 }
  0xe7   : > { %v1172_v4 = vmul.f32 0.015625, %v1170_v3  ;;  %v3993_v3 = vld [vmem:[%s4953_s14] ss:$0 sm:$0xff] }
  0xe9   : > { %v1173_v5 = vsub.f32 %v5114_v1, %v1172_v4 }
  0xeb   : > { %v1174_v6 = vmul.f32 %v1173_v5, %v1173_v5 }
  0xed   : > { %v1175_v7 = vsel %vm1167_vm0, %v1174_v6, 0.0  ;;  %v4728_v6 = vld [vmem:[%s4968_s30] sm:$0xff]  }
  0xee   : > { %1176 = vadd.xlane.f32.xlu0 %v1175_v7 }
 0x17b   : > { %v1177_v13 = vpop.xlane.xlu0 %1176 }
 0x17c   : > { %v1178_v14 = vmul.f32 0.015625, %v1177_v13  ;;  %v4733_v13 = vld [vmem:[%s4998_s9 + $0x8] sm:$0xff]  }
 0x17e   : > { %v1179_v15 = vadd.f32 1e-05, %v1178_v14  ;;  %v4734_v14 = vld [vmem:[%s4998_s9 + $0x10] sm:$0xff]  }
 0x180   : > { %4800 = vrsqrt.f32 %v1179_v15  ;;  %v4735_v15 = vld [vmem:[%s4998_s9 + $0x18] sm:$0xff]  }
 0x18a   : > { %v4801_v16 = vpop.eup %4800 }
 0x18b   : > { %v1181_v18 = vmul.f32 %v4801_v16, %v1173_v5 }
 0x18d   : > { %v1189_v20 = vmul.f32 %v3974_v17, %v1181_v18 }
 0x18f   : > { %v1197_v21 = vadd.f32 %v3975_v19, %v1189_v20  ;;  %v4000_v20 = vld [vmem:[%s4973_s6] ss:$0 sm:$0xff] }
 0x191   : > { %v1198_v22 = vpack.c.bf16 %v1197_v21, %v1197_v21 }
 0x193   : > { %4353 = vmatmul.mubr.msk.bf16.vlgmr.msra.gmra.mrb[0].mxu0 %vm1167_vm0, %v1198_v22 }
 0x194   : > { %4384 = vmatprep.mubr.msk.bf16.mxu0 %vm4897_vm1, %v4896_v9  ;;  %4377 = vmatpush3.bf16.msra.mxu0 %v4724_v57 }
 0x195   : > { %4378 = vmatprep.subr.bf16.mxu0 %v4896_v9 }
 0x198   : > { %4379 = vmatpush3.bf16.msra.mxu0 %v4725_v58 }
 0x199   : > { %4380 = vmatprep.subr.bf16.mxu0 %v4896_v9 }
 0x19c   : > { %4381 = vmatpush3.bf16.msra.mxu0 %v4726_v59 }
 0x19d   : > { %4382 = vmatprep.subr.bf16.mxu0 %v4896_v9 }
 0x1a0   : > { %4383 = vmatpush3.bf16.msra.mxu0 %v4727_v60  ;;  %v1663_v60 = vsub.s32 6, %v5200_v30 }
 0x1a1   : > { %4388 = vmatprep.subr.bf16.mxu0 %v4896_v9 }
 0x266   : > { %v1275_v32 = vpop.f32.mrb[0].mxu0 }
 0x267   : > { %v1276_v33 = vadd.f32 %v3976_v31, %v1275_v32  ;;  %v4354_v34 = vpop.f32.mrb[1].mxu0  ;;  %v3994_v31 = vld [vmem:[%s4963_s24] ss:$0 sm:$0xff]  ;;  %v1603_v32 = vsub.s32 3, %v5200_v30 }
 0x268   : > { %v1278_v35 = vpop.f32.mrb[2].mxu0 }
 0x269   : > { %v3982_v36 = vmul.f32 -1.442695, %v1276_v33  ;;  %v4355_v37 = vpop.f32.mrb[3].mxu0  ;;  %v1600_v35 = vld [vmem:[%s5610_s22] sm:$0x7f]  ;;  %s5620_s22 = sld [smem:[#allocation7_spill]] }
 0x26a   : > { %v1623_v37 = vsub.s32 1, %v5200_v30 }
 0x26b   : > { %4802 = vpow2.f32 %v3982_v36 }
 0x275   : > { %v4803_v38 = vpop.eup %4802 }
 0x276   : > { %v1284_v39 = vadd.f32 1.0, %v4803_v38 }
 0x278   : > { %4804 = vrcp.f32 %v1284_v39  ;;  %v1633_v39 = vsub.s32 2, %v5200_v30 }
 0x282   : > { %v4805_v40 = vpop.eup %4804 }
 0x283   : > { %v1287_v41 = vmul.f32 %v4805_v40, %v1276_v33  ;;  %v1613_v33 = vsub.s32 0, %v5200_v30  ;;  %v1604_v40 = vrot.slane %v1600_v35, %v1603_v32 }
 0x285   : > { %v1288_v42 = vpack.c.bf16 %v1287_v41, %v1287_v41  ;;  %v1614_v41 = vrot.slane %v1600_v35, %v1613_v33 }
 0x287   : > { %4373 = vmatmul.mubr.bf16.vlgmr.msra.gmra.mrb[0].mxu1 %v1288_v42 }
 0x288   : > { %4408 = vmatprep.mubr.msk.bf16.mxu1 %vm4897_vm1, %v4896_v9  ;;  %4401 = vmatpush3.bf16.msra.mxu1 %v4732_v12  ;;  %v4007_v12 = vld [vmem:[%s5611_s23] ss:$0 sm:$0xff]  ;;  %s5621_s23 = sld [smem:[#allocation18_spill]] }
 0x289   : > { %4402 = vmatprep.subr.bf16.mxu1 %v4896_v9 }
 0x28c   : > { %4403 = vmatpush3.bf16.msra.mxu1 %v4733_v13 }
 0x28d   : > { %4404 = vmatprep.subr.bf16.mxu1 %v4896_v9 }
 0x290   : > { %4405 = vmatpush3.bf16.msra.mxu1 %v4734_v14  ;;  %v4008_v14 = vld [vmem:[%s5612_s26] ss:$0 sm:$0xff]  ;;  %s1159_s26 = scalar_lea.vmem %s5620_s22, %s5633_s16  ;;  %s5626_s22 = sld [smem:[#allocation25_spill]] }
 0x291   : > { %4406 = vmatprep.subr.bf16.mxu1 %v4896_v9 }
 0x294   : > { %4407 = vmatpush3.bf16.msra.mxu1 %v4735_v15 }
 0x295   : > { %4424 = vmatprep.subr.bf16.mxu1 %v4896_v9 }
 0x35a   : > { %v1394_v44 = vpop.f32.mrb[0].mxu1 }
 0x35b   : > { %v1395_v45 = vadd.f32 %v3983_v43, %v1394_v44  ;;  %v4374_v46 = vpop.f32.mrb[1].mxu1 }
 0x35c   : > { %v1397_v47 = vpop.f32.mrb[2].mxu1  ;;  %v1624_v46 = vrot.slane %v1600_v35, %v1623_v37 }
 0x35d   : > { %v1400_v48 = vmul.f32 0.5, %v1395_v45  ;;  %v4375_v49 = vpop.f32.mrb[3].mxu1  ;;  %v1643_v45 = vsub.s32 4, %v5200_v30 }
 0x35e   : > { %v1634_v49 = vrot.slane %v1600_v35, %v1633_v39 }
 0x35f   : > { %v5160_v50 = vadd.f32 %v1400_v48, %v5114_v1  ;;  %v3992_v1 = vld [vmem:[%s4948_s8] ss:$0 sm:$0xff] }
 0x361   : > { %v1402_v51 = vsel %vm1167_vm0, %v5160_v50, 0.0 }
 0x362   : > { %1403 = vadd.xlane.f32.xlu1 %v1402_v51 }
 0x3ef   : > { %v1404_v52 = vpop.xlane.xlu1 %1403 }
 0x3f0   : > { %v1405_v53 = vmul.f32 0.015625, %v1404_v52 }
 0x3f2   : > { %v1406_v54 = vsub.f32 %v5160_v50, %v1405_v53 }
 0x3f4   : > { %v1407_v55 = vmul.f32 %v1406_v54, %v1406_v54 }
 0x3f6   : > { %v1408_v56 = vsel %vm1167_vm0, %v1407_v55, 0.0 }
 0x3f7   : > { %1409 = vadd.xlane.f32.xlu1 %v1408_v56  ;;  %v1644_v56 = vrot.slane %v1600_v35, %v1643_v45  ;;  %v4741_v45 = vld [vmem:[%s5616_s7 + $0x10] sm:$0xff]  }
 0x484   : > { %v1410_v61 = vpop.xlane.xlu1 %1409 }
 0x485   : > { %v1411_v62 = vmul.f32 0.015625, %v1410_v61 }
 0x487   : > { %v1412_v63 = vadd.f32 1e-05, %v1411_v62 }
 0x489   : > { %4806 = vrsqrt.f32 %v1412_v63 }
 0x493   : > { %v4807_v0 = vpop.eup %4806 }
 0x494   : > { %v1414_v2 = vmul.f32 %v4807_v0, %v1406_v54  ;;  %v1653_v54 = vsub.s32 5, %v5200_v30 }
 0x496   : > { %v1422_v4 = vmul.f32 %v3992_v1, %v1414_v2  ;;  %v1654_v1 = vrot.slane %v1600_v35, %v1653_v54 }
 0x498   : > { %v1430_v5 = vadd.f32 %v3993_v3, %v1422_v4 }
 0x49a   : > { %v1431_v7 = vpack.c.bf16 %v1430_v5, %v1430_v5  ;;  %v1664_v5 = vrot.slane %v1600_v35, %v1663_v60  ;;  %v4745_v60 = vld [vmem:[%s5619_s18 + $0x8] sm:$0xff]  }
 0x49c   : > { %4385 = vmatmul.mubr.msk.bf16.vlgmr.msra.gmra.mrb[4].mxu0 %vm1167_vm0, %v1431_v7 }
 0x49d   : > { %4389 = vmatpush3.bf16.msra.mxu0 %v4728_v6  ;;  %4396 = vmatprep.mubr.msk.bf16.mxu0 %vm4897_vm1, %v4896_v9 }
 0x49e   : > { %4390 = vmatprep.subr.bf16.mxu0 %v4896_v9 }
 0x4a1   : > { %4391 = vmatpush3.bf16.msra.mxu0 %v4729_v8 }
 0x4a2   : > { %4392 = vmatprep.subr.bf16.mxu0 %v4896_v9 }
 0x4a5   : > { %4393 = vmatpush3.bf16.msra.mxu0 %v4730_v10 }
 0x4a6   : > { %4394 = vmatprep.subr.bf16.mxu0 %v4896_v9 }
 0x4a9   : > { %4395 = vmatpush3.bf16.msra.mxu0 %v4731_v11 }
 0x4aa   : > { %4412 = vmatprep.subr.bf16.mxu0 %v4896_v9 }
 0x4ac   : > { %4397 = vmatmul.mubr.msk.bf16.vlgmr.msra.gmra.mrb[8].mxu0 %vm1167_vm0, %v1431_v7 }
 0x4ad   : > { %4420 = vmatprep.mubr.msk.bf16.mxu0 %vm4897_vm1, %v4896_v9 }
 0x56f   : > { %v1508_v16 = vpop.f32.mrb[4].mxu0 }
 0x570   : > { %v4386_v17 = vpop.f32.mrb[5].mxu0  ;;  %v1509_v34 = vadd.f32 %v3994_v31, %v1508_v16  ;;  %v4009_v16 = vld [vmem:[%s5613_s28] ss:$0 sm:$0xff]  ;;  %s5622_s28 = sld [smem:[#allocation16_spill]] }
 0x571   : > { %v1511_v18 = vpop.f32.mrb[6].mxu0 }
 0x572   : > { %v4387_v19 = vpop.f32.mrb[7].mxu0 }
 0x57f   : > { %v1587_v21 = vpop.f32.mrb[8].mxu0 }
 0x580   : > { %v1588_v22 = vadd.f32 %v4000_v20, %v1587_v21  ;;  %v4398_v23 = vpop.f32.mrb[9].mxu0 }
 0x581   : > { %v1590_v24 = vpop.f32.mrb[10].mxu0 }
 0x582   : > { %v4006_v25 = vmul.f32 -1.442695, %v1588_v22  ;;  %v4399_v26 = vpop.f32.mrb[11].mxu0 }
 0x584   : > { %4808 = vpow2.f32 %v4006_v25  ;;  %v4011_v25 = vld [vmem:[%s5614_s1] ss:$0 sm:$0xff]  ;;  %s5623_s1 = sld [smem:[#allocation20_spill]] }
 0x58e   : > { %v4809_v27 = vpop.eup %4808 }
 0x58f   : > { %v1596_v28 = vadd.f32 1.0, %v4809_v27 }
 0x591   : > { %4810 = vrcp.f32 %v1596_v28 }
 0x59b   : > { %v4811_v36 = vpop.eup %4810 }
 0x59c   : > { %v1599_v38 = vmul.f32 %v4811_v36, %v1509_v34 }
 0x59e   : > { %v1607_v42 = vrot.slane %v1599_v38, 5  ;;  %v1617_v43 = vrot.slane %v1599_v38, 6  ;;  %v1627_v44 = vrot.slane %v1599_v38, 7  ;;  %v1637_v51 = vrot.slane %v1599_v38, 1 }
 0x59f   : > { %v1605_v52 = vmul.f32 %v1604_v40, %v1599_v38  ;;  %v1647_v57 = vrot.slane %v1599_v38, 2  ;;  %v1657_v62 = vrot.slane %v1599_v38, 3 }
 0x5a0   : > { %v1610_v47 = vsel %vm1609_vm2, 0.0, %v1607_v42  ;;  %v1620_v48 = vsel %vm1619_vm3, 0.0, %v1617_v43  ;;  %v1630_v55 = vsel %vm1629_vm4, 0.0, %v1627_v44  ;;  %v1640_v61 = vsel %vm1639_vm5, %v1637_v51, 0.0  ;;  %v4737_v42 = vld [vmem:[%s5616_s7] sm:$0xff]   ;;  %v4739_v43 = vld [vmem:[%s5616_s7 + $0x8] sm:$0xff]  }
 0x5a1   : > { %v1615_v53 = vmul.f32 %v1614_v41, %v1610_v47  ;;  %v1625_v59 = vmul.f32 %v1624_v46, %v1620_v48  ;;  %v1635_v0 = vmul.f32 %v1634_v49, %v1630_v55  ;;  %v1650_v2 = vsel %vm1649_vm6, %v1647_v57, 0.0  ;;  %v4736_v41 = vld [vmem:[%s5615_s2] sm:$0xff]   ;;  %v4740_v44 = vld [vmem:[%s5615_s2 + $0x10] sm:$0xff]   ;;  %v4742_v46 = vld [vmem:[%s5615_s2 + $0x18] sm:$0xff]  }
 0x5a2   : > { %v1645_v4 = vmul.f32 %v1644_v56, %v1640_v61  ;;  %v1660_v6 = vsel %vm1659_vm7, %v1657_v62, 0.0  ;;  %v1655_v8 = vmul.f32 %v1654_v1, %v1650_v2  ;;  %4413 = vmatpush3.bf16.msra.mxu0 %v4736_v41  ;;  %v4743_v47 = vld [vmem:[%s5616_s7 + $0x18] sm:$0xff]   ;;  %v4018_v55 = vld [vmem:[%s5618_s11] ss:$0 sm:$0xff]  ;;  %v4746_v61 = vld [vmem:[%s5619_s18 + $0x10] sm:$0xff]   ;;  %v2067_v41 = vand.u32 127, %v1601_v29 }
 0x5a3   : > { %v1616_v58 = vadd.f32 %v1615_v53, %v1605_v52  ;;  %v1665_v11 = vmul.f32 %v1664_v5, %v1660_v6  ;;  %4414 = vmatprep.subr.bf16.mxu0 %v4896_v9  ;;  %v4017_v53 = vld [vmem:[%s5617_s10] ss:$0 sm:$0xff]  ;;  %v4747_v62 = vld [vmem:[%s5619_s18 + $0x18] sm:$0xff]   ;;  %s5624_s10 = sld [smem:[#allocation21_spill]]  ;;  %s5625_s11 = sld [smem:[#allocation22_spill]] }
 0x5a4   : > { %v4025_v1 = vld [vmem:[%s5621_s23] ss:$0 sm:$0xff] }
 0x5a5   : > { %v1626_v63 = vadd.f32 %v1625_v59, %v1616_v58  ;;  %v4744_v58 = vld [vmem:[%s5619_s18] sm:$0xff]  }
 0x5a7   : > { %v1636_v3 = vadd.f32 %v1635_v0, %v1626_v63  ;;  %v4898_v63 = vmov 0   ;;  %v1812_v0 = vld [vmem:[%s1159_s26] sm:$0x1]  ;;  %s5627_s26 = sld [smem:[#allocation23_spill]] }
 0x5a8   : > { %4710 = vset.pattern.permute.xlu0 %v4898_v63  ;;  %4711 = vset.pattern.permute.xlu1 %v4898_v63 }
 0x5a9   : > { %v1646_v7 = vadd.f32 %v1645_v4, %v1636_v3 }
 0x5ab   : > { %v1656_v10 = vadd.f32 %v1655_v8, %v1646_v7 }
 0x5ad   : > { %v1666_v13 = vadd.f32 %v1665_v11, %v1656_v10 }
 0x5af   : > { %v1674_v15 = vadd.f32 %v4007_v12, %v1666_v13  ;;  %v4019_v13 = vld [vmem:[%s5622_s28] ss:$0 sm:$0xff] }
 0x5b1   : > { %v1682_v17 = vmul.f32 %v4008_v14, %v1674_v15 }
 0x5b3   : > { %v1690_v18 = vadd.f32 %v4009_v16, %v1682_v17  ;;  %v4031_v16 = vld [vmem:[%s5623_s1] ss:$0 sm:$0xff] }
 0x5b5   : > { %v4010_v19 = vmul.f32 -1.442695, %v1690_v18 }
 0x5b7   : > { %4812 = vpow2.f32 %v4010_v19 }
 0x5c1   : > { %v4813_v20 = vpop.eup %4812 }
 0x5c2   : > { %v1694_v21 = vadd.f32 1.0, %v4813_v20 }
 0x5c4   : > { %4814 = vrcp.f32 %v1694_v21 }
 0x5ce   : > { %v4815_v22 = vpop.eup %4814 }
 0x5cf   : > { %v1697_v23 = vmul.f32 %v4815_v22, %v1690_v18  ;;  %v4748_v22 = vld [vmem:[%s5615_s2 + $0x20] sm:$0xff]  }
 0x5d1   : > { %v1698_v24 = vpack.c.bf16 %v1697_v23, %v1697_v23 }
 0x5d3   : > { %4409 = vmatmul.mubr.msk.bf16.vlgmr.msra.gmra.mrb[4].mxu1 %vm1167_vm0, %v1698_v24 }
 0x5d4   : > { %4432 = vmatprep.mubr.msk.bf16.mxu1 %vm4897_vm1, %v4896_v9  ;;  %4425 = vmatpush3.bf16.msra.mxu1 %v4737_v42 }
 0x5d5   : > { %4426 = vmatprep.subr.bf16.mxu1 %v4896_v9 }
 0x5d8   : > { %4427 = vmatpush3.bf16.msra.mxu1 %v4739_v43 }
 0x5d9   : > { %4428 = vmatprep.subr.bf16.mxu1 %v4896_v9 }
 0x5dc   : > { %4429 = vmatpush3.bf16.msra.mxu1 %v4741_v45 }
 0x5dd   : > { %4430 = vmatprep.subr.bf16.mxu1 %v4896_v9 }
 0x5e0   : > { %4431 = vmatpush3.bf16.msra.mxu1 %v4743_v47 }
 0x5e1   : > { %4454 = vmatprep.subr.bf16.mxu1 %v4896_v9 }
 0x6a6   : > { %v1775_v26 = vpop.f32.mrb[4].mxu1 }
 0x6a7   : > { %v1776_v27 = vadd.f32 %v4011_v25, %v1775_v26  ;;  %v4410_v28 = vpop.f32.mrb[5].mxu1  ;;  %v4749_v26 = vld [vmem:[%s5615_s2 + $0x28] sm:$0xff]  }
 0x6a8   : > { %v1778_v31 = vpop.f32.mrb[6].mxu1 }
 0x6a9   : > { %v5221_v32 = vadd.f32 %v1776_v27, %v5160_v50  ;;  %v4411_v34 = vpop.f32.mrb[7].mxu1  ;;  %v4738_v50 = vld [vmem:[%s5615_s2 + $0x8] sm:$0xff]   ;;  %v4750_v27 = vld [vmem:[%s5615_s2 + $0x30] sm:$0xff]  }
 0x6aa   : > { %4415 = vmatpush3.bf16.msra.mxu0 %v4738_v50  ;;  %v4751_v34 = vld [vmem:[%s5615_s2 + $0x38] sm:$0xff]  }
 0x6ab   : > { %v1782_v35 = vsel %vm1167_vm0, %v5221_v32, 0.0  ;;  %4416 = vmatprep.subr.bf16.mxu0 %v4896_v9 }
 0x6ac   : > { %1783 = vadd.xlane.f32.xlu0 %v1782_v35  ;;  %v4752_v35 = vld [vmem:[%s5619_s18 + $0x20] sm:$0xff]  }
 0x6ae   : > { %4417 = vmatpush3.bf16.msra.mxu0 %v4740_v44 }
 0x6af   : > { %4418 = vmatprep.subr.bf16.mxu0 %v4896_v9 }
 0x6b2   : > { %4419 = vmatpush3.bf16.msra.mxu0 %v4742_v46 }
 0x6b3   : > { %4436 = vmatprep.subr.bf16.mxu0 %v4896_v9 }
 0x6c2   : > { %2071 = vperm.xlu0 %4710, %v1812_v0  }
 0x739   : > { %v1784_v36 = vpop.xlane.xlu0 %1783 }
 0x73a   : > { %v1785_v37 = vmul.f32 0.015625, %v1784_v36  ;;  %v4753_v36 = vld [vmem:[%s5619_s18 + $0x28] sm:$0xff]  }
 0x73c   : > { %v1786_v38 = vsub.f32 %v5221_v32, %v1785_v37  ;;  %v4754_v37 = vld [vmem:[%s5619_s18 + $0x30] sm:$0xff]  }
 0x73e   : > { %v1787_v39 = vmul.f32 %v1786_v38, %v1786_v38 }
 0x740   : > { %v1788_v40 = vsel %vm1167_vm0, %v1787_v39, 0.0  ;;  %v4899_v39 = vmov -1e+30  }
 0x741   : > { %1789 = vadd.xlane.f32.xlu1 %v1788_v40  ;;  %2060 = vst.msk [vmem:[#allocation4] sm:$0xff] %vm2059_vm11, %v4899_v39  ;;  %v2072_v40 = vpop.permute.xlu0 %2071 }
 0x742   : > { %v2076_v42 = vrot.slane %v2072_v40, %v1613_v33 }
 0x744   : > { %vm2077_vm12 = vcmp.lt.s32.totalorder %v2067_v41, %v2076_v42 }
 0x745   : > { %v5315_v50 = vsel %vm2077_vm12, 0.0, %v4899_v39 }
 0x7ce   : > { %v1790_v48 = vpop.xlane.xlu1 %1789 }
 0x7cf   : > { %v1791_v49 = vmul.f32 0.015625, %v1790_v48 }
 0x7d1   : > { %v1792_v51 = vadd.f32 1e-05, %v1791_v49 }
 0x7d3   : > { %4816 = vrsqrt.f32 %v1792_v51 }
 0x7dd   : > { %v4817_v52 = vpop.eup %4816 }
 0x7de   : > { %v1794_v54 = vmul.f32 %v4817_v52, %v1786_v38  ;;  %v4755_v38 = vld [vmem:[%s5619_s18 + $0x38] sm:$0xff]   ;;  %v4078_v52 = vld [vmem:[%s5623_s1 + $0x1] ss:$0 sm:$0xff] }
 0x7e0   : > { %v1802_v56 = vmul.f32 %v4017_v53, %v1794_v54 }
 0x7e2   : > { %v1810_v57 = vadd.f32 %v4018_v55, %v1802_v56 }
 0x7e4   : > { %v5246_v59 = vpack.c.bf16 %v1810_v57, %v1810_v57 }
 0x7e6   : > { %4421 = vmatmul.mubr.msk.bf16.vlgmr.msra.gmra.mrb[12].mxu0 %vm1167_vm0, %v5246_v59  ;;  %4433 = vmatmul.mubr.msk.bf16.vlgmr.msra.gmra.mrb[8].mxu1 %vm1167_vm0, %v5246_v59 }
 0x7e7   : > { %4437 = vmatpush3.bf16.msra.mxu0 %v4744_v58  ;;  %4444 = vmatprep.mubr.msk.bf16.mxu0 %vm4897_vm1, %v4896_v9  ;;  %v5321_v58 = vld [vmem:[#allocation4] sm:$0xff] }
 0x7e8   : > { %4438 = vmatprep.subr.bf16.mxu0 %v4896_v9  ;;  %4456 = vmatprep.mubr.msk.bf16.mxu1 %vm4897_vm1, %v4896_v9 }
 0x7eb   : > { %4439 = vmatpush3.bf16.msra.mxu0 %v4745_v60 }
 0x7ec   : > { %4440 = vmatprep.subr.bf16.mxu0 %v4896_v9 }
 0x7ef   : > { %4441 = vmatpush3.bf16.msra.mxu0 %v4746_v61 }
 0x7f0   : > { %4442 = vmatprep.subr.bf16.mxu0 %v4896_v9 }
 0x7f3   : > { %4443 = vmatpush3.bf16.msra.mxu0 %v4747_v62 }
 0x7f4   : > { %4448 = vmatprep.subr.bf16.mxu0 %v4896_v9 }
 0x7f6   : > { %4445 = vmatmul.mubr.msk.bf16.vlgmr.msra.gmra.mrb[16].mxu0 %vm1167_vm0, %v5246_v59 }
 0x7f7   : > { %4450 = vmatprep.mubr.msk.bf16.mxu0 %vm4897_vm1, %v4896_v9 }
 0x8b9   : > { %v1889_v2 = vpop.f32.mrb[12].mxu0  ;;  %v1969_v3 = vpop.f32.mrb[8].mxu1 }
 0x8ba   : > { %v1970_v4 = vadd.f32 %v4025_v1, %v1969_v3  ;;  %v4422_v5 = vpop.f32.mrb[13].mxu0  ;;  %v4434_v6 = vpop.f32.mrb[9].mxu1  ;;  %v1890_v17 = vadd.f32 %v4019_v13, %v1889_v2  ;;  %v4756_v3 = vld [vmem:[%s5616_s7 + $0x20] sm:$0xff]  }
 0x8bb   : > { %v1892_v7 = vpop.f32.mrb[14].mxu0  ;;  %v1972_v8 = vpop.f32.mrb[10].mxu1  ;;  %v4757_v5 = vld [vmem:[%s5616_s7 + $0x28] sm:$0xff]   ;;  %v4758_v6 = vld [vmem:[%s5616_s7 + $0x30] sm:$0xff]   ;;  %v4063_v13 = vld [vmem:[%s5621_s23 + $0x1] ss:$0 sm:$0xff] }
 0x8bc   : > { %v2054_v10 = vpack.c.bf16 %v1970_v4, %v1970_v4  ;;  %v4423_v11 = vpop.f32.mrb[15].mxu0  ;;  %v4435_v12 = vpop.f32.mrb[11].mxu1  ;;  %v1895_v23 = vpack.c.bf16 %v1890_v17, %v1890_v17  ;;  %v4759_v7 = vld [vmem:[%s5616_s7 + $0x38] sm:$0xff]  }
 0x8be   : > { %2056 = vst.msk [vmem:[#allocation2] sm:$0xf] %vm2055_vm9, %v2054_v10 }
 0x8c5   : > { %v2064_v14 = vld [vmem:[#allocation2] sm:$0xf] }
 0x8c6   : > { %v2083_v15 = vsel %vm2062_vm8, %v2064_v14, 0 }
 0x8c7   : > { %4449 = vmatpush3.bf16.xpose.msra.mxu0 %v2083_v15 }
 0x8c8   : > { %4460 = vmatprep.subr.bf16.mxu0 %v4896_v9 }
 0x8c9   : > { %v2048_v18 = vpop.f32.mrb[16].mxu0 }
 0x8ca   : > { %v2049_v19 = vadd.f32 %v4031_v16, %v2048_v18  ;;  %v4446_v20 = vpop.f32.mrb[17].mxu0 }
 0x8cb   : > { %v2051_v21 = vpop.f32.mrb[18].mxu0  ;;  %v4048_v20 = vld [vmem:[%s5622_s28 + $0x1] ss:$0 sm:$0xff] }
 0x8cc   : > { %v2057_v24 = vpack.c.bf16 %v2049_v19, %v2049_v19  ;;  %v4447_v25 = vpop.f32.mrb[19].mxu0 }
 0x8ce   : > { %2058 = vst.msk [vmem:[#allocation3] sm:$0xf] %vm2055_vm9, %v2057_v24  ;;  %4451 = vmatmul.mubr.msk.bf16.vlgmr.msra.gmra.mrb[20].mxu0 %vm2062_vm8, %v1895_v23 }
 0x8cf   : > { %4461 = vmatpush3.bf16.msra.mxu0 %v4748_v22  ;;  %4468 = vmatprep.mubr.msk.bf16.mxu0 %vm4897_vm1, %v4896_v9 }
 0x8d0   : > { %4462 = vmatprep.subr.bf16.mxu0 %v4896_v9 }
 0x8d3   : > { %4463 = vmatpush3.bf16.msra.mxu0 %v4749_v26 }
 0x8d4   : > { %4464 = vmatprep.subr.bf16.mxu0 %v4896_v9 }
 0x8d5   : > { %v2065_v28 = vld [vmem:[#allocation3] sm:$0xf] }
 0x8d6   : > { %v2162_v31 = vsel %vm2160_vm10, %v2065_v28, 0 }
 0x8d7   : > { %4455 = vmatpush3.bf16.msra.mxu1 %v2162_v31  ;;  %4465 = vmatpush3.bf16.msra.mxu0 %v4750_v27 }
 0x8d8   : > { %4466 = vmatprep.subr.bf16.mxu0 %v4896_v9  ;;  %4472 = vmatprep.subr.bf16.mxu1 %v4896_v9 }
 0x8db   : > { %4467 = vmatpush3.bf16.msra.mxu0 %v4751_v34 }
 0x8dc   : > { %4484 = vmatprep.subr.bf16.mxu0 %v4896_v9 }
 0x8de   : > { %4469 = vmatmul.mubr.msk.bf16.vlgmr.msra.gmra.mrb[24].mxu0 %vm1167_vm0, %v5246_v59 }
 0x8df   : > { %4485 = vmatpush3.bf16.msra.mxu0 %v4752_v35  ;;  %4492 = vmatprep.mubr.msk.bf16.mxu0 %vm4897_vm1, %v4896_v9 }
 0x8e0   : > { %4486 = vmatprep.subr.bf16.mxu0 %v4896_v9 }
 0x8e3   : > { %4487 = vmatpush3.bf16.msra.mxu0 %v4753_v36 }
 0x8e4   : > { %4488 = vmatprep.subr.bf16.mxu0 %v4896_v9 }
 0x8e7   : > { %4489 = vmatpush3.bf16.msra.mxu0 %v4754_v37 }
 0x8e8   : > { %4490 = vmatprep.subr.bf16.mxu0 %v4896_v9 }
 0x8eb   : > { %4491 = vmatpush3.bf16.msra.mxu0 %v4755_v38 }
 0x8ec   : > { %4508 = vmatprep.subr.bf16.mxu0 %v4896_v9 }
 0x8ee   : > { %4493 = vmatmul.mubr.msk.bf16.vlgmr.msra.gmra.mrb[28].mxu0 %vm1167_vm0, %v5246_v59 }
 0x8ef   : > { %4510 = vmatprep.mubr.msk.bf16.mxu0 %vm4897_vm1, %v4896_v9 }
 0x9a1   : > { %v2119_v43 = vpop.f32.mrb[20].mxu0 }
 0x9a2   : > { %v2120_v44 = vadd.f32 %v2119_v43, %v5315_v50  ;;  %v4452_v45 = vpop.f32.mrb[21].mxu0 }
 0x9a3   : > { %v2122_v46 = vpop.f32.mrb[22].mxu0 }
 0x9a4   : > { %v4453_v47 = vpop.f32.mrb[23].mxu0  ;;  %v2127_v48 = vsel %vm2126_vm13, %v2120_v44, -inf }
 0x9a5   : > { %2128 = vmax.xlane.f32.xlu1 %v2127_v48 }
 0x9b1   : > { %v2294_v49 = vpop.f32.mrb[24].mxu0 }
 0x9b2   : > { %v4470_v29 = vpop.f32.mrb[25].mxu0  ;;  %v2295_v23 = vadd.f32 %v4048_v20, %v2294_v49 }
 0x9b3   : > { %v2297_v51 = vpop.f32.mrb[26].mxu0 }
 0x9b4   : > { %v4471_v30 = vpop.f32.mrb[27].mxu0  ;;  %v2300_v25 = vpack.c.bf16 %v2295_v23, %v2295_v23 }
 0x9c1   : > { %v2457_v33 = vpop.f32.mrb[28].mxu0 }
 0x9c2   : > { %v2458_v53 = vadd.f32 %v4078_v52, %v2457_v33  ;;  %v4494_v54 = vpop.f32.mrb[29].mxu0  ;;  %v2142_v52 = vld [vmem:[#allocation5] sm:$0xff] }
 0x9c3   : > { %v2460_v55 = vpop.f32.mrb[30].mxu0 }
 0x9c4   : > { %v2465_v56 = vpack.c.bf16 %v2458_v53, %v2458_v53  ;;  %v4495_v57 = vpop.f32.mrb[31].mxu0 }
 0x9c6   : > { %2466 = vst.msk [vmem:[#allocation3] sm:$0xf] %vm2055_vm9, %v2465_v56  ;;  %v4760_v56 = vld [vmem:[%s5624_s10] sm:$0xff]  }
 0x9cd   : > { %v2471_v24 = vld [vmem:[#allocation3] sm:$0xf] }
 0x9ce   : > { %v2553_v26 = vsel %vm2160_vm10, %v2471_v24, 0 }
 0xa32   : > { %v2129_v60 = vpop.xlane.xlu1 %2128 }
 0xa33   : > { %v5324_v61 = vmax.f32 %v5321_v58, %v2129_v60 }
 0xa35   : > { %v2131_v62 = vsub.f32 %v5321_v58, %v5324_v61  ;;  %2206 = vst.msk [vmem:[#allocation4] sm:$0xff] %vm2059_vm11, %v5324_v61  ;;  %2136 = vperm.xlu1 %4711, %v5324_v61  }
 0xa36   : > { %2467 = vst.msk [vmem:[#allocation4] sm:$0xff] %vm2059_vm11, %v4899_v39 }
 0xa37   : > { %v2132_v51 = vmul.f32 1.442695, %v2131_v62  ;;  %v2149_v62 = vld [vmem:[#allocation6] sm:$0xff] }
 0xa3d   : > { %v2518_v37 = vld [vmem:[#allocation4] sm:$0xff] }
 0xab4   : > { %v2137_v63 = vpop.permute.xlu1 %2136 }
 0xab5   : > { %v2139_v0 = vsub.f32 %v2120_v44, %v2137_v63 }
 0xab7   : > { %v2140_v1 = vmul.f32 1.442695, %v2139_v0 }
 0xab9   : > { %4818 = vpow2.f32 %v2140_v1 }
 0xac3   : > { %v4819_v2 = vpop.eup %4818 }
 0xac4   : > { %v2156_v4 = vpack.c.bf16 %v4819_v2, %v4819_v2  ;;  %v2144_v41 = vsel %vm2126_vm13, %v4819_v2, 0.0 }
 0xac6   : > { %4457 = vmatmul.mubr.msk.bf16.vlgmr.msra.gmra.mrb[12].mxu1 %vm2126_vm13, %v2156_v4  ;;  %v4765_v4 = vld [vmem:[%s5624_s10 + $0x8] sm:$0xff]  }
 0xac7   : > { %4473 = vmatpush3.bf16.msra.mxu1 %v4756_v3  ;;  %4480 = vmatprep.mubr.msk.bf16.mxu1 %vm4897_vm1, %v4896_v9 }
 0xac8   : > { %4474 = vmatprep.subr.bf16.mxu1 %v4896_v9  ;;  %4509 = vmatpush3.bf16.msra.mxu0 %v4765_v4 }
 0xac9   : > { %4520 = vmatprep.subr.bf16.mxu0 %v4896_v9 }
 0xacb   : > { %4475 = vmatpush3.bf16.msra.mxu1 %v4757_v5 }
 0xacc   : > { %4476 = vmatprep.subr.bf16.mxu1 %v4896_v9 }
 0xacf   : > { %4477 = vmatpush3.bf16.msra.mxu1 %v4758_v6 }
 0xad0   : > { %4478 = vmatprep.subr.bf16.mxu1 %v4896_v9 }
 0xad3   : > { %4479 = vmatpush3.bf16.msra.mxu1 %v4759_v7 }
 0xad4   : > { %4496 = vmatprep.subr.bf16.mxu1 %v4896_v9 }
 0xad6   : > { %4481 = vmatmul.mubr.msk.bf16.vlgmr.msra.gmra.mrb[16].mxu1 %vm1167_vm0, %v5246_v59 }
 0xad7   : > { %4498 = vmatprep.mubr.msk.bf16.mxu1 %vm4897_vm1, %v4896_v9 }
 0xb99   : > { %v5348_v8 = vpop.f32.mrb[12].mxu1 }
 0xb9a   : > { %v4458_v10 = vpop.f32.mrb[13].mxu1 }
 0xb9b   : > { %v2201_v11 = vpop.f32.mrb[14].mxu1 }
 0xb9c   : > { %v4459_v12 = vpop.f32.mrb[15].mxu1  ;;  %v4762_v11 = vld [vmem:[%s5616_s7 + $0x48] sm:$0xff]  }
 0xb9d   : > { %v4763_v12 = vld [vmem:[%s5616_s7 + $0x50] sm:$0xff]  }
 0xba9   : > { %v2376_v14 = vpop.f32.mrb[16].mxu1 }
 0xbaa   : > { %v2377_v15 = vadd.f32 %v4063_v13, %v2376_v14  ;;  %v4482_v16 = vpop.f32.mrb[17].mxu1  ;;  %v4764_v13 = vld [vmem:[%s5616_s7 + $0x58] sm:$0xff]  }
 0xbab   : > { %v2379_v17 = vpop.f32.mrb[18].mxu1 }
 0xbac   : > { %v2463_v18 = vpack.c.bf16 %v2377_v15, %v2377_v15  ;;  %v4483_v19 = vpop.f32.mrb[19].mxu1 }
 0xbae   : > { %2464 = vst.msk [vmem:[#allocation2] sm:$0xf] %vm2055_vm9, %v2463_v18 }
 0xbb5   : > { %v2470_v21 = vld [vmem:[#allocation2] sm:$0xf] }
 0xbb6   : > { %v2476_v22 = vsel %vm2062_vm8, %v2470_v21, 0 }
 0xbb7   : > { %4497 = vmatpush3.bf16.xpose.msra.mxu1 %v2476_v22 }
 0xbb8   : > { %4502 = vmatprep.subr.bf16.mxu1 %v4896_v9 }
 0xbbe   : > { %4499 = vmatmul.mubr.msk.bf16.vlgmr.msra.gmra.mrb[20].mxu1 %vm2062_vm8, %v2300_v25 }
 0xbbf   : > { %4503 = vmatpush3.bf16.msra.mxu1 %v2553_v26  ;;  %4504 = vmatprep.mubr.msk.bf16.mxu1 %vm4897_vm1, %v4896_v9  ;;  %v4766_v26 = vld [vmem:[%s5615_s2 + $0x40] sm:$0xff]  }
 0xbc0   : > { %4514 = vmatprep.subr.bf16.mxu1 %v4896_v9 }
 0xc91   : > { %v2512_v27 = vpop.f32.mrb[20].mxu1 }
 0xc92   : > { %v2513_v28 = vadd.f32 %v2512_v27, %v5315_v50  ;;  %v4500_v31 = vpop.f32.mrb[21].mxu1 }
 0xc93   : > { %v2515_v34 = vpop.f32.mrb[22].mxu1  ;;  %v4768_v31 = vld [vmem:[%s5615_s2 + $0x50] sm:$0xff]  }
 0xc94   : > { %v4501_v35 = vpop.f32.mrb[23].mxu1  ;;  %v2519_v36 = vsel %vm2126_vm13, %v2513_v28, -inf  ;;  %v4769_v34 = vld [vmem:[%s5615_s2 + $0x58] sm:$0xff]  }
 0xc95   : > { %2520 = vmax.xlane.f32.xlu1 %v2519_v36  ;;  %v4770_v35 = vld [vmem:[%s5619_s18 + $0x40] sm:$0xff]   ;;  %v4771_v36 = vld [vmem:[%s5619_s18 + $0x48] sm:$0xff]  }
 0xd22   : > { %v2521_v38 = vpop.xlane.xlu1 %2520 }
 0xd23   : > { %v2522_v40 = vmax.f32 %v2518_v37, %v2521_v38  ;;  %v4773_v38 = vld [vmem:[%s5619_s18 + $0x58] sm:$0xff]  }
 0xd25   : > { %2597 = vst.msk [vmem:[#allocation4] sm:$0xff] %vm2059_vm11, %v2522_v40  ;;  %2528 = vperm.xlu0 %4710, %v2522_v40   ;;  %v2523_v42 = vsub.f32 %v2518_v37, %v2522_v40  ;;  %v4772_v37 = vld [vmem:[%s5619_s18 + $0x50] sm:$0xff]  }
 0xd26   : > { %2957 = vst.msk [vmem:[#allocation4] sm:$0xff] %vm2059_vm11, %v4899_v39 }
 0xd27   : > { %v2524_v43 = vmul.f32 1.442695, %v2523_v42 }
 0xd29   : > { %4820 = vpow2.f32 %v2524_v43 }
 0xd33   : > { %v4821_v44 = vpop.eup %4820 }
 0xd44   : > { %2145 = vadd.xlane.f32.xlu0 %v2144_v41 }
 0xd5a   : > { %2544 = vperm.xlu0 %4710, %v4821_v44  }
 0xda4   : > { %v2529_v45 = vpop.permute.xlu0 %2528 }
 0xda5   : > { %v2531_v46 = vsub.f32 %v2513_v28, %v2529_v45  ;;  %v4767_v28 = vld [vmem:[%s5615_s2 + $0x48] sm:$0xff]  }
 0xda7   : > { %v2532_v47 = vmul.f32 1.442695, %v2531_v46 }
 0xda9   : > { %4822 = vpow2.f32 %v2532_v47 }
 0xdaa   : > { %4824 = vpow2.f32 %v2132_v51 }
 0xdb3   : > { %v4823_v48 = vpop.eup %4822 }
 0xdb4   : > { %v2536_v49 = vsel %vm2126_vm13, %v4823_v48, 0.0  ;;  %v2548_v29 = vpack.c.bf16 %v4823_v48, %v4823_v48  ;;  %v4825_v30 = vpop.eup %4824 }
 0xdb5   : > { %2537 = vadd.xlane.f32.xlu1 %v2536_v49  ;;  %v2143_v33 = vmul.f32 %v4825_v30, %v2142_v52 }
 0xdb6   : > { %4505 = vmatmul.mubr.msk.bf16.vlgmr.msra.gmra.mrb[24].mxu1 %vm2126_vm13, %v2548_v29 }
 0xdb7   : > { %4516 = vmatprep.mubr.msk.bf16.mxu1 %vm4897_vm1, %v4896_v9  ;;  %4515 = vmatpush3.bf16.msra.mxu1 %v4760_v56  ;;  %v4101_v56 = vld [vmem:[%s5622_s28 + $0x2] ss:$0 sm:$0xff] }
 0xdb8   : > { %4532 = vmatprep.subr.bf16.mxu1 %v4896_v9 }
 0xdc6   : > { %2152 = vperm.xlu1 %4711, %v4825_v30  }
 0xdd1   : > { %v2146_v53 = vpop.xlane.xlu0 %2145 }
 0xdd2   : > { %v2147_v54 = vadd.f32 %v2146_v53, %v2143_v33 }
 0xdd4   : > { %2148 = vst.msk [vmem:[#allocation5] sm:$0xff] %vm2059_vm11, %v2147_v54 }
 0xdd9   : > { %v2545_v15 = vpop.permute.xlu0 %2544 }
 0xddb   : > { %v2208_v55 = vld [vmem:[#allocation5] sm:$0xff] }
 0xddc   : > { %2211 = vperm.xlu1 %4711, %v2208_v55   ;;  %2468 = vst.msk [vmem:[#allocation5] sm:$0xff] %vm2059_vm11, %v4896_v9 }
 0xde3   : > { %v2534_v57 = vld [vmem:[#allocation5] sm:$0xff] }
 0xde4   : > { %v2535_v58 = vmul.f32 %v4821_v44, %v2534_v57  ;;  %v4116_v44 = vld [vmem:[%s5621_s23 + $0x2] ss:$0 sm:$0xff] }
 0xe42   : > { %v2538_v60 = vpop.xlane.xlu1 %2537 }
 0xe43   : > { %v2539_v61 = vadd.f32 %v2538_v60, %v2535_v58 }
 0xe45   : > { %2540 = vst.msk [vmem:[#allocation5] sm:$0xff] %vm2059_vm11, %v2539_v61 }
 0xe46   : > { %v2153_v63 = vpop.permute.xlu1 %2152 }
 0xe47   : > { %v2155_v0 = vmul.f32 %v2153_v63, %v2149_v62 }
 0xe49   : > { %v2204_v1 = vadd.f32 %v5348_v8, %v2155_v0  ;;  %v4761_v8 = vld [vmem:[%s5616_s7 + $0x40] sm:$0xff]  }
 0xe4a   : > { %v4131_v0 = vld [vmem:[%s5623_s1 + $0x2] ss:$0 sm:$0xff] }
 0xe4b   : > { %2205 = vst.msk [vmem:[#allocation6] sm:$0xff] %vm2062_vm8, %v2204_v1 }
 0xe4c   : > { %v2599_v2 = vld [vmem:[#allocation5] sm:$0xff] }
 0xe4d   : > { %2602 = vperm.xlu1 %4711, %v2599_v2   ;;  %2958 = vst.msk [vmem:[#allocation5] sm:$0xff] %vm2059_vm11, %v4896_v9 }
 0xe52   : > { %v2207_v3 = vld [vmem:[#allocation6] sm:$0xff] }
 0xe53   : > { %2469 = vst.msk [vmem:[#allocation6] sm:$0xff] %vm2062_vm8, %v4896_v9 }
 0xe5a   : > { %v2541_v14 = vld [vmem:[#allocation6] sm:$0xff] }
 0xe5b   : > { %v2212_v5 = vpop.permute.xlu1 %2211  ;;  %v2547_v16 = vmul.f32 %v2545_v15, %v2541_v14 }
 0xe5c   : > { %4826 = vrcp.f32 %v2212_v5 }
 0xe66   : > { %v4827_v6 = vpop.eup %4826 }
 0xe67   : > { %v2215_v7 = vmul.f32 %v4827_v6, %v2207_v3 }
 0xe69   : > { %v2216_v10 = vpack.c.bf16 %v2215_v7, %v2215_v7 }
 0xe6b   : > { %4517 = vmatmul.mubr.msk.bf16.vlgmr.msra.gmra.mrb[28].mxu1 %vm2062_vm8, %v2216_v10 }
 0xe6c   : > { %4533 = vmatpush3.bf16.msra.mxu1 %v4761_v8  ;;  %4540 = vmatprep.mubr.msk.bf16.mxu1 %vm4897_vm1, %v4896_v9 }
 0xe6d   : > { %4534 = vmatprep.subr.bf16.mxu1 %v4896_v9 }
 0xe70   : > { %4535 = vmatpush3.bf16.msra.mxu1 %v4762_v11 }
 0xe71   : > { %4536 = vmatprep.subr.bf16.mxu1 %v4896_v9 }
 0xe74   : > { %4537 = vmatpush3.bf16.msra.mxu1 %v4763_v12 }
 0xe75   : > { %4538 = vmatprep.subr.bf16.mxu1 %v4896_v9 }
 0xe78   : > { %4539 = vmatpush3.bf16.msra.mxu1 %v4764_v13 }
 0xe79   : > { %4556 = vmatprep.subr.bf16.mxu1 %v4896_v9 }
 0xe7b   : > { %4541 = vmatmul.mubr.msk.bf16.vlgmr.msra.gmra.mrb[32].mxu1 %vm1167_vm0, %v5246_v59 }
 0xe7c   : > { %4558 = vmatprep.mubr.msk.bf16.mxu1 %vm4897_vm1, %v4896_v9 }
 0xe89   : > { %v2589_v17 = vpop.f32.mrb[24].mxu1 }
 0xe8a   : > { %v2595_v18 = vadd.f32 %v2589_v17, %v2547_v16  ;;  %v4506_v19 = vpop.f32.mrb[25].mxu1  ;;  %v3008_v16 = vld [vmem:[#allocation4] sm:$0xff] }
 0xe8b   : > { %v2592_v20 = vpop.f32.mrb[26].mxu1 }
 0xe8c   : > { %2596 = vst.msk [vmem:[#allocation6] sm:$0xff] %vm2062_vm8, %v2595_v18  ;;  %v4507_v21 = vpop.f32.mrb[27].mxu1 }
 0xe93   : > { %v2598_v22 = vld [vmem:[#allocation6] sm:$0xff] }
 0xe94   : > { %2959 = vst.msk [vmem:[#allocation6] sm:$0xff] %vm2062_vm8, %v4896_v9 }
 0xecc   : > { %v2603_v23 = vpop.permute.xlu1 %2602 }
 0xecd   : > { %4828 = vrcp.f32 %v2603_v23 }
 0xed7   : > { %v4829_v24 = vpop.eup %4828 }
 0xed8   : > { %v2606_v25 = vmul.f32 %v4829_v24, %v2598_v22 }
 0xeda   : > { %v2607_v27 = vpack.c.bf16 %v2606_v25, %v2606_v25 }
 0xedc   : > { %4511 = vmatmul.mubr.msk.bf16.vlgmr.msra.gmra.mrb[32].mxu0 %vm2062_vm8, %v2607_v27 }
 0xedd   : > { %4521 = vmatpush3.bf16.msra.mxu0 %v4766_v26  ;;  %4528 = vmatprep.mubr.msk.bf16.mxu0 %vm4897_vm1, %v4896_v9  ;;  %v4774_v26 = vld [vmem:[%s5615_s2 + $0x60] sm:$0xff]  }
 0xede   : > { %4522 = vmatprep.subr.bf16.mxu0 %v4896_v9 }
 0xee1   : > { %4523 = vmatpush3.bf16.msra.mxu0 %v4767_v28 }
 0xee2   : > { %4524 = vmatprep.subr.bf16.mxu0 %v4896_v9 }
 0xee5   : > { %4525 = vmatpush3.bf16.msra.mxu0 %v4768_v31  ;;  %v4776_v31 = vld [vmem:[%s5615_s2 + $0x70] sm:$0xff]  }
 0xee6   : > { %4526 = vmatprep.subr.bf16.mxu0 %v4896_v9 }
 0xee9   : > { %4527 = vmatpush3.bf16.msra.mxu0 %v4769_v34  ;;  %v4777_v34 = vld [vmem:[%s5615_s2 + $0x78] sm:$0xff]  }
 0xeea   : > { %4544 = vmatprep.subr.bf16.mxu0 %v4896_v9 }
 0xeec   : > { %4529 = vmatmul.mubr.msk.bf16.vlgmr.msra.gmra.mrb[36].mxu0 %vm1167_vm0, %v5246_v59 }
 0xeed   : > { %4545 = vmatpush3.bf16.msra.mxu0 %v4770_v35  ;;  %4552 = vmatprep.mubr.msk.bf16.mxu0 %vm4897_vm1, %v4896_v9  ;;  %v4778_v35 = vld [vmem:[%s5619_s18 + $0x60] sm:$0xff]  }
 0xeee   : > { %4546 = vmatprep.subr.bf16.mxu0 %v4896_v9 }
 0xef1   : > { %4547 = vmatpush3.bf16.msra.mxu0 %v4771_v36  ;;  %v4779_v36 = vld [vmem:[%s5619_s18 + $0x68] sm:$0xff]  }
 0xef2   : > { %4548 = vmatprep.subr.bf16.mxu0 %v4896_v9 }
 0xef5   : > { %4549 = vmatpush3.bf16.msra.mxu0 %v4772_v37  ;;  %v4780_v37 = vld [vmem:[%s5619_s18 + $0x70] sm:$0xff]  }
 0xef6   : > { %4550 = vmatprep.subr.bf16.mxu0 %v4896_v9 }
 0xef9   : > { %4551 = vmatpush3.bf16.msra.mxu0 %v4773_v38  ;;  %v4781_v38 = vld [vmem:[%s5619_s18 + $0x78] sm:$0xff]  }
 0xefa   : > { %4568 = vmatprep.subr.bf16.mxu0 %v4896_v9 }
 0xefc   : > { %4553 = vmatmul.mubr.msk.bf16.vlgmr.msra.gmra.mrb[40].mxu0 %vm1167_vm0, %v5246_v59 }
 0xefd   : > { %4570 = vmatprep.mubr.msk.bf16.mxu0 %vm4897_vm1, %v4896_v9 }
 0xf3e   : > { %v2703_v40 = vpop.f32.mrb[28].mxu1 }
 0xf3f   : > { %v4518_v41 = vpop.f32.mrb[29].mxu1 }
 0xf40   : > { %v2706_v42 = vpop.f32.mrb[30].mxu1 }
 0xf41   : > { %v4519_v43 = vpop.f32.mrb[31].mxu1 }
 0xf4e   : > { %v2866_v45 = vpop.f32.mrb[32].mxu1 }
 0xf4f   : > { %v2867_v46 = vadd.f32 %v4116_v44, %v2866_v45  ;;  %v4542_v47 = vpop.f32.mrb[33].mxu1  ;;  %v4782_v45 = vld [vmem:[%s5624_s10 + $0x10] sm:$0xff]  }
 0xf50   : > { %v2869_v48 = vpop.f32.mrb[34].mxu1  ;;  %4569 = vmatpush3.bf16.msra.mxu0 %v4782_v45 }
 0xf51   : > { %v2953_v49 = vpack.c.bf16 %v2867_v46, %v2867_v46  ;;  %v4543_v29 = vpop.f32.mrb[35].mxu1  ;;  %4586 = vmatprep.subr.bf16.mxu0 %v4896_v9  ;;  %v3031_v46 = vld [vmem:[#allocation6] sm:$0xff] }
 0xf53   : > { %2954 = vst.msk [vmem:[#allocation2] sm:$0xf] %vm2055_vm9, %v2953_v49 }
 0xf5a   : > { %v2960_v51 = vld [vmem:[#allocation2] sm:$0xf] }
 0xf5b   : > { %v2966_v30 = vsel %vm2062_vm8, %v2960_v51, 0 }
 0xf5c   : > { %4557 = vmatpush3.bf16.xpose.msra.mxu1 %v2966_v30 }
 0xf5d   : > { %4562 = vmatprep.subr.bf16.mxu1 %v4896_v9 }
 0xfaf   : > { %v2654_v52 = vpop.f32.mrb[32].mxu0 }
 0xfb0   : > { %v5436_v33 = vadd.f32 %v2703_v40, %v2654_v52  ;;  %v4512_v53 = vpop.f32.mrb[33].mxu0  ;;  %v3024_v40 = vld [vmem:[#allocation5] sm:$0xff] }
 0xfb1   : > { %v2657_v54 = vpop.f32.mrb[34].mxu0 }
 0xfb2   : > { %v4513_v55 = vpop.f32.mrb[35].mxu0 }
 0xfbf   : > { %v2784_v57 = vpop.f32.mrb[36].mxu0 }
 0xfc0   : > { %v2785_v58 = vadd.f32 %v4101_v56, %v2784_v57  ;;  %v4530_v60 = vpop.f32.mrb[37].mxu0 }
 0xfc1   : > { %v2787_v61 = vpop.f32.mrb[38].mxu0 }
 0xfc2   : > { %v2790_v62 = vpack.c.bf16 %v2785_v58, %v2785_v58  ;;  %v4531_v63 = vpop.f32.mrb[39].mxu0  ;;  %v4182_v58 = vld [vmem:[%s5623_s1 + $0x3] ss:$0 sm:$0xff] }
 0xfc4   : > { %4559 = vmatmul.mubr.msk.bf16.vlgmr.msra.gmra.mrb[36].mxu1 %vm2062_vm8, %v2790_v62 }
 0xfc5   : > { %4564 = vmatprep.mubr.msk.bf16.mxu1 %vm4897_vm1, %v4896_v9 }
 0xfcf   : > { %v2947_v1 = vpop.f32.mrb[40].mxu0 }
 0xfd0   : > { %v2948_v2 = vadd.f32 %v4131_v0, %v2947_v1  ;;  %v4554_v3 = vpop.f32.mrb[41].mxu0 }
 0xfd1   : > { %v2950_v4 = vpop.f32.mrb[42].mxu0 }
 0xfd2   : > { %v2955_v5 = vpack.c.bf16 %v2948_v2, %v2948_v2  ;;  %v4555_v6 = vpop.f32.mrb[43].mxu0 }
 0xfd4   : > { %2956 = vst.msk [vmem:[#allocation3] sm:$0xf] %vm2055_vm9, %v2955_v5  ;;  %v4783_v5 = vld [vmem:[%s5616_s7 + $0x60] sm:$0xff]  }
 0xfdb   : > { %v2961_v7 = vld [vmem:[#allocation3] sm:$0xf] }
 0xfdc   : > { %v3043_v8 = vsel %vm2160_vm10, %v2961_v7, 0  ;;  %v4784_v7 = vld [vmem:[%s5616_s7 + $0x68] sm:$0xff]  }
 0xfdd   : > { %4563 = vmatpush3.bf16.msra.mxu1 %v3043_v8  ;;  %v4785_v8 = vld [vmem:[%s5616_s7 + $0x70] sm:$0xff]  }
 0xfde   : > { %4574 = vmatprep.subr.bf16.mxu1 %v4896_v9 }
0x1097   : > { %v3002_v10 = vpop.f32.mrb[36].mxu1 }
0x1098   : > { %v3003_v11 = vadd.f32 %v3002_v10, %v5315_v50  ;;  %v4560_v12 = vpop.f32.mrb[37].mxu1  ;;  %v4786_v10 = vld [vmem:[%s5616_s7 + $0x78] sm:$0xff]  }
0x1099   : > { %v3005_v13 = vpop.f32.mrb[38].mxu1 }
0x109a   : > { %v4561_v14 = vpop.f32.mrb[39].mxu1  ;;  %v3009_v15 = vsel %vm2126_vm13, %v3003_v11, -inf }
0x109b   : > { %3010 = vmax.xlane.f32.xlu1 %v3009_v15 }
0x1128   : > { %v3011_v17 = vpop.xlane.xlu1 %3010 }
0x1129   : > { %v3012_v18 = vmax.f32 %v3008_v16, %v3011_v17 }
0x112b   : > { %v3013_v19 = vsub.f32 %v3008_v16, %v3012_v18  ;;  %3087 = vst.msk [vmem:[#allocation4] sm:$0xff] %vm2059_vm11, %v3012_v18  ;;  %3018 = vperm.xlu0 %4710, %v3012_v18   ;;  %v4167_v16 = vld [vmem:[%s5621_s23 + $0x3] ss:$0 sm:$0xff] }
0x112c   : > { %3399 = vst.msk [vmem:[#allocation4] sm:$0xff] %vm2059_vm11, %v4899_v39  ;;  %v4775_v39 = vld [vmem:[%s5615_s2 + $0x68] sm:$0xff]  }
0x112d   : > { %v3014_v20 = vmul.f32 1.442695, %v3013_v19 }
0x112f   : > { %4830 = vpow2.f32 %v3014_v20 }
0x1139   : > { %v4831_v21 = vpop.eup %4830 }
0x113a   : > { %3034 = vperm.xlu1 %4711, %v4831_v21   ;;  %v3025_v41 = vmul.f32 %v4831_v21, %v3024_v40 }
0x11aa   : > { %v3019_v22 = vpop.permute.xlu0 %3018 }
0x11ab   : > { %v3021_v23 = vsub.f32 %v3003_v11, %v3019_v22 }
0x11ad   : > { %v3022_v24 = vmul.f32 1.442695, %v3021_v23 }
0x11af   : > { %4832 = vpow2.f32 %v3022_v24 }
0x11b9   : > { %v4833_v25 = vpop.eup %4832  ;;  %v3035_v47 = vpop.permute.xlu1 %3034 }
0x11ba   : > { %v3026_v27 = vsel %vm2126_vm13, %v4833_v25, 0.0  ;;  %v3038_v28 = vpack.c.bf16 %v4833_v25, %v4833_v25  ;;  %v3037_v48 = vmul.f32 %v3035_v47, %v3031_v46 }
0x11bb   : > { %3027 = vadd.xlane.f32.xlu0 %v3026_v27 }
0x11bc   : > { %4565 = vmatmul.mubr.msk.bf16.vlgmr.msra.gmra.mrb[40].mxu1 %vm2126_vm13, %v3038_v28 }
0x11bd   : > { %4575 = vmatpush3.bf16.msra.mxu1 %v4774_v26  ;;  %4582 = vmatprep.mubr.msk.bf16.mxu1 %vm4897_vm1, %v4896_v9 }
0x11be   : > { %4576 = vmatprep.subr.bf16.mxu1 %v4896_v9 }
0x11c1   : > { %4577 = vmatpush3.bf16.msra.mxu1 %v4775_v39 }
0x11c2   : > { %4578 = vmatprep.subr.bf16.mxu1 %v4896_v9 }
0x11c5   : > { %4579 = vmatpush3.bf16.msra.mxu1 %v4776_v31 }
0x11c6   : > { %4580 = vmatprep.subr.bf16.mxu1 %v4896_v9 }
0x11c9   : > { %4581 = vmatpush3.bf16.msra.mxu1 %v4777_v34 }
0x11ca   : > { %4598 = vmatprep.subr.bf16.mxu1 %v4896_v9 }
0x11cc   : > { %4583 = vmatmul.mubr.msk.bf16.vlgmr.msra.gmra.mrb[44].mxu1 %vm1167_vm0, %v5246_v59 }
0x11cd   : > { %4599 = vmatpush3.bf16.msra.mxu1 %v4778_v35  ;;  %4606 = vmatprep.mubr.msk.bf16.mxu1 %vm4897_vm1, %v4896_v9 }
0x11ce   : > { %4600 = vmatprep.subr.bf16.mxu1 %v4896_v9 }
0x11d1   : > { %4601 = vmatpush3.bf16.msra.mxu1 %v4779_v36 }
0x11d2   : > { %4602 = vmatprep.subr.bf16.mxu1 %v4896_v9 }
0x11d5   : > { %4603 = vmatpush3.bf16.msra.mxu1 %v4780_v37  ;;  %v3450_v37 = vld [vmem:[#allocation4] sm:$0xff] }
0x11d6   : > { %4604 = vmatprep.subr.bf16.mxu1 %v4896_v9 }
0x11d9   : > { %4605 = vmatpush3.bf16.msra.mxu1 %v4781_v38 }
0x11da   : > { %4622 = vmatprep.subr.bf16.mxu1 %v4896_v9 }
0x11dc   : > { %4607 = vmatmul.mubr.msk.bf16.vlgmr.msra.gmra.mrb[48].mxu1 %vm1167_vm0, %v5246_v59 }
0x11dd   : > { %4624 = vmatprep.mubr.msk.bf16.mxu1 %vm4897_vm1, %v4896_v9 }
0x1248   : > { %v3028_v42 = vpop.xlane.xlu0 %3027 }
0x1249   : > { %v3029_v43 = vadd.f32 %v3028_v42, %v3025_v41 }
0x124b   : > { %3030 = vst.msk [vmem:[#allocation5] sm:$0xff] %vm2059_vm11, %v3029_v43 }
0x1252   : > { %v3089_v44 = vld [vmem:[#allocation5] sm:$0xff] }
0x1253   : > { %3092 = vperm.xlu0 %4710, %v3089_v44   ;;  %3400 = vst.msk [vmem:[#allocation5] sm:$0xff] %vm2059_vm11, %v4896_v9 }
0x128f   : > { %v3079_v49 = vpop.f32.mrb[40].mxu1 }
0x1290   : > { %v3085_v29 = vadd.f32 %v3079_v49, %v3037_v48  ;;  %v4566_v51 = vpop.f32.mrb[41].mxu1  ;;  %v3466_v49 = vld [vmem:[#allocation5] sm:$0xff] }
0x1291   : > { %v3082_v30 = vpop.f32.mrb[42].mxu1 }
0x1292   : > { %3086 = vst.msk [vmem:[#allocation6] sm:$0xff] %vm2062_vm8, %v3085_v29  ;;  %v4567_v52 = vpop.f32.mrb[43].mxu1 }
0x1299   : > { %v3088_v53 = vld [vmem:[#allocation6] sm:$0xff] }
0x129a   : > { %3401 = vst.msk [vmem:[#allocation6] sm:$0xff] %vm2062_vm8, %v4896_v9 }
0x129f   : > { %v3226_v54 = vpop.f32.mrb[44].mxu1 }
0x12a0   : > { %v4584_v55 = vpop.f32.mrb[45].mxu1 }
0x12a1   : > { %v3229_v56 = vpop.f32.mrb[46].mxu1 }
0x12a2   : > { %v4585_v57 = vpop.f32.mrb[47].mxu1 }
0x12af   : > { %v3389_v60 = vpop.f32.mrb[48].mxu1 }
0x12b0   : > { %v3390_v61 = vadd.f32 %v4182_v58, %v3389_v60  ;;  %v4608_v62 = vpop.f32.mrb[49].mxu1 }
0x12b1   : > { %v3392_v63 = vpop.f32.mrb[50].mxu1 }
0x12b2   : > { %v3397_v0 = vpack.c.bf16 %v3390_v61, %v3390_v61  ;;  %v4609_v1 = vpop.f32.mrb[51].mxu1 }
0x12b4   : > { %3398 = vst.msk [vmem:[#allocation3] sm:$0xf] %vm2055_vm9, %v3397_v0 }
0x12d2   : > { %v3093_v2 = vpop.permute.xlu0 %3092 }
0x12d3   : > { %4834 = vrcp.f32 %v3093_v2 }
0x12dd   : > { %v4835_v3 = vpop.eup %4834 }
0x12de   : > { %v3096_v4 = vmul.f32 %v4835_v3, %v3088_v53  ;;  %v4787_v53 = vld [vmem:[%s5624_s10 + $0x18] sm:$0xff]  }
0x12df   : > { %4623 = vmatpush3.bf16.msra.mxu1 %v4787_v53 }
0x12e0   : > { %v3097_v6 = vpack.c.bf16 %v3096_v4, %v3096_v4  ;;  %4640 = vmatprep.subr.bf16.mxu1 %v4896_v9 }
0x12e2   : > { %4571 = vmatmul.mubr.msk.bf16.vlgmr.msra.gmra.mrb[44].mxu0 %vm2062_vm8, %v3097_v6 }
0x12e3   : > { %4587 = vmatpush3.bf16.msra.mxu0 %v4783_v5  ;;  %4594 = vmatprep.mubr.msk.bf16.mxu0 %vm4897_vm1, %v4896_v9  ;;  %v4194_v5 = vld [vmem:[%s5625_s11] ss:$0 sm:$0xff]  ;;  %s5628_s11 = sld [smem:[#allocation24_spill]] }
0x12e4   : > { %4588 = vmatprep.subr.bf16.mxu0 %v4896_v9 }
0x12e7   : > { %4589 = vmatpush3.bf16.msra.mxu0 %v4784_v7 }
0x12e8   : > { %4590 = vmatprep.subr.bf16.mxu0 %v4896_v9 }
0x12eb   : > { %4591 = vmatpush3.bf16.msra.mxu0 %v4785_v8 }
0x12ec   : > { %4592 = vmatprep.subr.bf16.mxu0 %v4896_v9 }
0x12ef   : > { %4593 = vmatpush3.bf16.msra.mxu0 %v4786_v10 }
0x12f0   : > { %4610 = vmatprep.subr.bf16.mxu0 %v4896_v9 }
0x12f2   : > { %4595 = vmatmul.mubr.msk.bf16.vlgmr.msra.gmra.mrb[48].mxu0 %vm1167_vm0, %v5246_v59  ;;  %v4152_v59 = vld [vmem:[%s5622_s28 + $0x3] ss:$0 sm:$0xff] }
0x12f3   : > { %4612 = vmatprep.mubr.msk.bf16.mxu0 %vm4897_vm1, %v4896_v9  ;;  %v3227_v25 = vadd.f32 %v4152_v59, %v3226_v54  ;;  %v3473_v54 = vld [vmem:[#allocation6] sm:$0xff] }
0x12f5   : > { %v3232_v26 = vpack.c.bf16 %v3227_v25, %v3227_v25  ;;  %v4195_v25 = vld [vmem:[%s5627_s26] ss:$0 sm:$0xff]  ;;  %s5630_s26 = sld [smem:[#allocation26_spill]] }
0x13b5   : > { %v3144_v11 = vpop.f32.mrb[44].mxu0 }
0x13b6   : > { %v5505_v12 = vadd.f32 %v3144_v11, %v5436_v33  ;;  %v4572_v13 = vpop.f32.mrb[45].mxu0  ;;  %v3403_v33 = vld [vmem:[#allocation3] sm:$0xf] }
0x13b7   : > { %v3147_v14 = vpop.f32.mrb[46].mxu0  ;;  %v3485_v27 = vsel %vm2160_vm10, %v3403_v33, 0 }
0x13b8   : > { %v4573_v15 = vpop.f32.mrb[47].mxu0 }
0x13c5   : > { %v3308_v17 = vpop.f32.mrb[48].mxu0 }
0x13c6   : > { %v3309_v18 = vadd.f32 %v4167_v16, %v3308_v17  ;;  %v4596_v19 = vpop.f32.mrb[49].mxu0 }
0x13c7   : > { %v3311_v20 = vpop.f32.mrb[50].mxu0  ;;  %v4788_v19 = vld [vmem:[%s5626_s22] sm:$0xff]  }
0x13c8   : > { %v3395_v21 = vpack.c.bf16 %v3309_v18, %v3309_v18  ;;  %v4597_v22 = vpop.f32.mrb[51].mxu0  ;;  %v4790_v20 = vld [vmem:[%s5626_s22 + $0x10] sm:$0xff]  }
0x13ca   : > { %3396 = vst.msk [vmem:[#allocation2] sm:$0xf] %vm2055_vm9, %v3395_v21  ;;  %v4791_v21 = vld [vmem:[%s5626_s22 + $0x18] sm:$0xff]  }
0x13d1   : > { %v3402_v23 = vld [vmem:[#allocation2] sm:$0xf] }
0x13d2   : > { %v3408_v24 = vsel %vm2062_vm8, %v3402_v23, 0 }
0x13d3   : > { %4611 = vmatpush3.bf16.xpose.msra.mxu0 %v3408_v24 }
0x13d4   : > { %4616 = vmatprep.subr.bf16.mxu0 %v4896_v9 }
0x13da   : > { %4613 = vmatmul.mubr.msk.bf16.vlgmr.msra.gmra.mrb[52].mxu0 %vm2062_vm8, %v3232_v26  ;;  %v4196_v26 = vld [vmem:[%s5628_s11] ss:$0 sm:$0xff]  ;;  %s5631_s11 = sshll.u32 %s5633_s16, 2 }
0x13db   : > { %4617 = vmatpush3.bf16.msra.mxu0 %v3485_v27  ;;  %4618 = vmatprep.mubr.msk.bf16.mxu0 %vm4897_vm1, %v4896_v9 }
0x13dc   : > { %4628 = vmatprep.subr.bf16.mxu0 %v4896_v9 }
0x14ad   : > { %v3444_v28 = vpop.f32.mrb[52].mxu0 }
0x14ae   : > { %v3445_v39 = vadd.f32 %v3444_v28, %v5315_v50  ;;  %v4614_v31 = vpop.f32.mrb[53].mxu0 }
0x14af   : > { %v3447_v34 = vpop.f32.mrb[54].mxu0  ;;  %v4792_v31 = vld [vmem:[%s5629_s0] sm:$0xff]  }
0x14b0   : > { %v4615_v35 = vpop.f32.mrb[55].mxu0  ;;  %v3451_v36 = vsel %vm2126_vm13, %v3445_v39, -inf  ;;  %v4793_v34 = vld [vmem:[%s5629_s0 + $0x8] sm:$0xff]  }
0x14b1   : > { %3452 = vmax.xlane.f32.xlu1 %v3451_v36  ;;  %v4794_v35 = vld [vmem:[%s5629_s0 + $0x10] sm:$0xff]   ;;  %v4795_v36 = vld [vmem:[%s5629_s0 + $0x18] sm:$0xff]  }
0x153e   : > { %v3453_v38 = vpop.xlane.xlu1 %3452 }
0x153f   : > { %v3454_v40 = vmax.f32 %v3450_v37, %v3453_v38  ;;  %v4797_v38 = vld [vmem:[%s5629_s0 + $0x28] sm:$0xff]  }
0x1541   : > { %v3455_v41 = vsub.f32 %v3450_v37, %v3454_v40  ;;  %3529 = vst.msk [vmem:[#allocation4] sm:$0xff] %vm2059_vm11, %v3454_v40  ;;  %3460 = vperm.xlu0 %4710, %v3454_v40   ;;  %v4796_v37 = vld [vmem:[%s5629_s0 + $0x20] sm:$0xff]   ;;  %v4798_v40 = vld [vmem:[%s5629_s0 + $0x30] sm:$0xff]  }
0x1543   : > { %v3456_v42 = vmul.f32 1.442695, %v3455_v41  ;;  %v4799_v41 = vld [vmem:[%s5629_s0 + $0x38] sm:$0xff]  }
0x1545   : > { %4836 = vpow2.f32 %v3456_v42  ;;  %v4197_v42 = vld [vmem:[%s5630_s26] ss:$0 sm:$0xff]  ;;  %s1163_s26 = scalar_lea.vmem %s5098_s12, %s5631_s11 }
0x154f   : > { %v4837_v43 = vpop.eup %4836 }
0x1550   : > { %3476 = vperm.xlu1 %4711, %v4837_v43   ;;  %v3467_v29 = vmul.f32 %v4837_v43, %v3466_v49 }
0x15c0   : > { %v3461_v44 = vpop.permute.xlu0 %3460 }
0x15c1   : > { %v3463_v45 = vsub.f32 %v3445_v39, %v3461_v44 }
0x15c3   : > { %v3464_v50 = vmul.f32 1.442695, %v3463_v45 }
0x15c5   : > { %4838 = vpow2.f32 %v3464_v50 }
0x15cf   : > { %v4839_v46 = vpop.eup %4838  ;;  %v3477_v55 = vpop.permute.xlu1 %3476 }
0x15d0   : > { %v3468_v47 = vsel %vm2126_vm13, %v4839_v46, 0.0  ;;  %v3480_v48 = vpack.c.bf16 %v4839_v46, %v4839_v46  ;;  %v3479_v56 = vmul.f32 %v3477_v55, %v3473_v54 }
0x15d1   : > { %3469 = vadd.xlane.f32.xlu0 %v3468_v47 }
0x15d2   : > { %4619 = vmatmul.mubr.msk.bf16.vlgmr.msra.gmra.mrb[56].mxu0 %vm2126_vm13, %v3480_v48 }
0x15d3   : > { %4636 = vmatprep.mubr.msk.bf16.mxu0 %vm4897_vm1, %v4896_v9  ;;  %4629 = vmatpush3.bf16.msra.mxu0 %v4788_v19 }
0x15d4   : > { %4630 = vmatprep.subr.bf16.mxu0 %v4896_v9 }
0x165e   : > { %v3470_v51 = vpop.xlane.xlu0 %3469 }
0x165f   : > { %v3471_v30 = vadd.f32 %v3470_v51, %v3467_v29 }
0x1661   : > { %3472 = vst.msk [vmem:[#allocation5] sm:$0xff] %vm2059_vm11, %v3471_v30 }
0x1668   : > { %v3531_v52 = vld [vmem:[#allocation5] sm:$0xff] }
0x1669   : > { %3534 = vperm.xlu1 %4711, %v3531_v52   ;;  %v4204_v52 = vld [vmem:[%s5083_s20] ss:$0 sm:$0xff] }
0x16a5   : > { %v3521_v57 = vpop.f32.mrb[56].mxu0 }
0x16a6   : > { %v3527_v58 = vadd.f32 %v3521_v57, %v3479_v56  ;;  %v4620_v60 = vpop.f32.mrb[57].mxu0 }
0x16a7   : > { %v3524_v61 = vpop.f32.mrb[58].mxu0 }
0x16a8   : > { %3528 = vst.msk [vmem:[#allocation6] sm:$0xff] %vm2062_vm8, %v3527_v58  ;;  %v4621_v62 = vpop.f32.mrb[59].mxu0 }
0x16af   : > { %v3530_v1 = vld [vmem:[#allocation6] sm:$0xff] }
0x16e8   : > { %v3535_v63 = vpop.permute.xlu1 %3534 }
0x16e9   : > { %4840 = vrcp.f32 %v3535_v63 }
0x16f3   : > { %v4841_v0 = vpop.eup %4840 }
0x16f4   : > { %v3538_v2 = vmul.f32 %v4841_v0, %v3530_v1 }
0x16f6   : > { %v3539_v3 = vpack.c.bf16 %v3538_v2, %v3538_v2 }
0x16f8   : > { %4625 = vmatmul.mubr.msk.bf16.vlgmr.msra.gmra.mrb[52].mxu1 %vm2062_vm8, %v3539_v3 }
0x16f9   : > { %4656 = vmatprep.mubr.msk.bf16.mxu1 %vm4897_vm1, %v4896_v9  ;;  %4641 = vmatpush3.bf16.msra.mxu1 %v4792_v31 }
0x16fa   : > { %4642 = vmatprep.subr.bf16.mxu1 %v4896_v9 }
0x16fd   : > { %4643 = vmatpush3.bf16.msra.mxu1 %v4793_v34 }
0x16fe   : > { %4644 = vmatprep.subr.bf16.mxu1 %v4896_v9 }
0x1701   : > { %4645 = vmatpush3.bf16.msra.mxu1 %v4794_v35 }
0x1702   : > { %4646 = vmatprep.subr.bf16.mxu1 %v4896_v9 }
0x1705   : > { %4647 = vmatpush3.bf16.msra.mxu1 %v4795_v36 }
0x1706   : > { %4648 = vmatprep.subr.bf16.mxu1 %v4896_v9 }
0x1709   : > { %4649 = vmatpush3.bf16.msra.mxu1 %v4796_v37 }
0x170a   : > { %4650 = vmatprep.subr.bf16.mxu1 %v4896_v9 }
0x170d   : > { %4651 = vmatpush3.bf16.msra.mxu1 %v4797_v38 }
0x170e   : > { %4652 = vmatprep.subr.bf16.mxu1 %v4896_v9 }
0x1711   : > { %4653 = vmatpush3.bf16.msra.mxu1 %v4798_v40 }
0x1712   : > { %4654 = vmatprep.subr.bf16.mxu1 %v4896_v9 }
0x1715   : > { %4655 = vmatpush3.bf16.msra.mxu1 %v4799_v41 }
0x17cb   : > { %v3586_v4 = vpop.f32.mrb[52].mxu1 }
0x17cc   : > { %v3592_v6 = vadd.f32 %v3586_v4, %v5505_v12  ;;  %v4626_v7 = vpop.f32.mrb[53].mxu1 }
0x17cd   : > { %v3589_v8 = vpop.f32.mrb[54].mxu1 }
0x17ce   : > { %v3600_v10 = vadd.f32 %v4194_v5, %v3592_v6  ;;  %v4627_v11 = vpop.f32.mrb[55].mxu1  ;;  %v4213_v6 = vld [vmem:[%s5088_s27] ss:$0 sm:$0xff] }
0x17cf   : > { %v4214_v8 = vld [vmem:[%s5093_s4] ss:$0 sm:$0xff] }
0x17d0   : > { %v5534_v13 = vadd.f32 %v3600_v10, %v5221_v32  ;;  %v4789_v32 = vld [vmem:[%s5626_s22 + $0x8] sm:$0xff]  }
0x17d1   : > { %4631 = vmatpush3.bf16.msra.mxu0 %v4789_v32 }
0x17d2   : > { %v3602_v14 = vsel %vm1167_vm0, %v5534_v13, 0.0  ;;  %4632 = vmatprep.subr.bf16.mxu0 %v4896_v9 }
0x17d3   : > { %3603 = vadd.xlane.f32.xlu0 %v3602_v14 }
0x17d5   : > { %4633 = vmatpush3.bf16.msra.mxu0 %v4790_v20 }
0x17d6   : > { %4634 = vmatprep.subr.bf16.mxu0 %v4896_v9 }
0x17d9   : > { %4635 = vmatpush3.bf16.msra.mxu0 %v4791_v21 }
0x1860   : > { %v3604_v15 = vpop.xlane.xlu0 %3603 }
0x1861   : > { %v3605_v16 = vmul.f32 0.015625, %v3604_v15 }
0x1863   : > { %v3606_v17 = vsub.f32 %v5534_v13, %v3605_v16 }
0x1865   : > { %v3607_v18 = vmul.f32 %v3606_v17, %v3606_v17 }
0x1867   : > { %v3608_v12 = vsel %vm1167_vm0, %v3607_v18, 0.0 }
0x1868   : > { %3609 = vadd.xlane.f32.xlu1 %v3608_v12 }
0x18f5   : > { %v3610_v22 = vpop.xlane.xlu1 %3609 }
0x18f6   : > { %v3611_v59 = vmul.f32 0.015625, %v3610_v22 }
0x18f8   : > { %v3612_v23 = vadd.f32 1e-05, %v3611_v59 }
0x18fa   : > { %4842 = vrsqrt.f32 %v3612_v23 }
0x1904   : > { %v4843_v24 = vpop.eup %4842 }
0x1905   : > { %v3614_v33 = vmul.f32 %v4843_v24, %v3606_v17 }
0x1907   : > { %v3622_v27 = vmul.f32 %v4195_v25, %v3614_v33 }
0x1909   : > { %v3630_v28 = vadd.f32 %v4196_v26, %v3622_v27 }
0x190b   : > { %v3631_v39 = vpack.c.bf16 %v3630_v28, %v3630_v28 }
0x190d   : > { %4637 = vmatmul.mubr.msk.bf16.vlgmr.msra.gmra.mrb[60].mxu0 %vm1167_vm0, %v3631_v39 }
0x19e0   : > { %v3708_v43 = vpop.f32.mrb[60].mxu0 }
0x19e1   : > { %v3709_v44 = vadd.f32 %v4197_v42, %v3708_v43  ;;  %v4638_v45 = vpop.f32.mrb[61].mxu0 }
0x19e2   : > { %v3711_v50 = vpop.f32.mrb[62].mxu0 }
0x19e3   : > { %v4203_v46 = vmul.f32 -1.442695, %v3709_v44  ;;  %v4639_v47 = vpop.f32.mrb[63].mxu0 }
0x19e5   : > { %4844 = vpow2.f32 %v4203_v46 }
0x19ef   : > { %v4845_v48 = vpop.eup %4844 }
0x19f0   : > { %v3717_v49 = vadd.f32 1.0, %v4845_v48 }
0x19f2   : > { %4846 = vrcp.f32 %v3717_v49 }
0x19fc   : > { %v4847_v29 = vpop.eup %4846 }
0x19fd   : > { %v3720_v51 = vmul.f32 %v4847_v29, %v3709_v44 }
0x19ff   : > { %v3721_v30 = vpack.c.bf16 %v3720_v51, %v3720_v51 }
0x1a01   : > { %4657 = vmatmul.mubr.bf16.vlgmr.msra.gmra.mrb[56].mxu1 %v3721_v30 }
0x1ad4   : > { %v3827_v9 = vpop.f32.mrb[56].mxu1 }
0x1ad5   : > { %v3828_v53 = vadd.f32 %v4204_v52, %v3827_v9  ;;  %v4658_v54 = vpop.f32.mrb[57].mxu1 }
0x1ad6   : > { %v3830_v55 = vpop.f32.mrb[58].mxu1 }
0x1ad7   : > { %v3833_v56 = vmul.f32 0.5, %v3828_v53  ;;  %v4659_v57 = vpop.f32.mrb[59].mxu1 }
0x1ad9   : > { %v3834_v58 = vadd.f32 %v3833_v56, %v5534_v13 }
0x1adb   : > { %v3835_v60 = vsel %vm1167_vm0, %v3834_v58, 0.0 }
0x1adc   : > { %3836 = vadd.xlane.f32.xlu0 %v3835_v60 }
0x1b69   : > { %v3837_v61 = vpop.xlane.xlu0 %3836 }
0x1b6a   : > { %v3838_v62 = vmul.f32 0.015625, %v3837_v61 }
0x1b6c   : > { %v3839_v63 = vsub.f32 %v3834_v58, %v3838_v62 }
0x1b6e   : > { %v3840_v0 = vmul.f32 %v3839_v63, %v3839_v63 }
0x1b70   : > { %v3841_v1 = vsel %vm1167_vm0, %v3840_v0, 0.0 }
0x1b71   : > { %3842 = vadd.xlane.f32.xlu0 %v3841_v1 }
0x1bfe   : > { %v3843_v2 = vpop.xlane.xlu0 %3842 }
0x1bff   : > { %v3844_v3 = vmul.f32 0.015625, %v3843_v2 }
0x1c01   : > { %v3845_v4 = vadd.f32 1e-05, %v3844_v3 }
0x1c03   : > { %4848 = vrsqrt.f32 %v3845_v4 }
0x1c0d   : > { %v4849_v5 = vpop.eup %4848 }
0x1c0e   : > { %v3847_v7 = vmul.f32 %v4849_v5, %v3839_v63 }
0x1c10   : > { %v3855_v10 = vmul.f32 %v4213_v6, %v3847_v7 }
0x1c12   : > { %v3863_v11 = vadd.f32 %v4214_v8, %v3855_v10 }
0x1c14   : > { %v3864_v13 = vpack.c.bf16 %v3863_v11, %v3863_v11 }
0x1c16   : > { %3866 = vst.msk [vmem:[%s1163_s26] sm:$0xf] %vm3865_vm14, %v3864_v13 }
0x1c17 PF: > { %s87_s15 = sadd.s32 1, %s4856_s15  }
0x1c18   : > { %p84_p4 = scmp.ge.s32.totalorder %s87_s15, 4  }
0x1c1a   :  { %86 = sbr.rel (!%p84_p4) target bundleno = 70 (0x46), region = 264 }

</bundles_post_ra>
